<compile_context>
chip_gen: v5e
topology: v5e:2x2
jax: 0.10.0
libtpu: 0.0.40
codegen_flags: <defaults>
</compile_context>

<pallas_src>
import functools

import jax
import jax.numpy as jnp
from jax.experimental import pallas as pl
from jax.experimental.pallas import tpu as pltpu

EPS = 1e-5


def _round_up(x, m):
    return (x + m - 1) // m * m


def _vmem_limit_bytes():
    """Per-generation VMEM budget with headroom for compiler scratch."""
    mib = 1024 * 1024
    cap = 0
    try:
        cap = int(getattr(pltpu.get_tpu_info(), "vmem_capacity_bytes", 0))
    except Exception:
        cap = 0
    if cap <= 0:
        return 64 * mib          # unknown generation: safe everywhere
    if cap <= 64 * mib:
        return 48 * mib          # v7x: stay well inside 64 MiB physical
    return 96 * mib              # v5e / v6e: 128 MiB physical


def _partial_stats(x, m_rows):
    """Per-channel (sum, sum of squared deviations from the tile mean)."""
    ssum = jnp.sum(x, axis=0, keepdims=True)                  # (1, c)
    mu = ssum * (1.0 / m_rows)
    d = x - mu
    m2 = jnp.sum(d * d, axis=0, keepdims=True)                # (1, c)
    return jnp.concatenate([ssum, m2], axis=0)                # (2, c)


# ---------------------------------------------------------------------------
# Pallas kernels
# ---------------------------------------------------------------------------
def _k1_kernel(*refs, stride, ho, wo, tile_n, has_proj):
    """conv1 as one deep-K matmul (K = 9*cin) + shortcut branch.

    Outputs per grid step:
      y1: (tile_n, ho*wo, cout) bf16 - conv1 result
      sc: (tile_n, ho*wo, cout) bf16 - 1x1-projection result, or x itself
      s1: (1, 2, cout)          f32  - (sum, centred M2) partials of y1
      ssc (projection only):    f32  - same for sc
    """
    if has_proj:
        xph_ref, w1_ref, ws_ref, y1_ref, sc_ref, s1_ref, ssc_ref = refs
    else:
        xph_ref, w1_ref, y1_ref, sc_ref, s1_ref = refs
    s = stride
    cin = xph_ref.shape[-1]
    cout = y1_ref.shape[-1]
    hph = xph_ref.shape[1] // (s * s)          # rows per stride-phase
    m_img = ho * wo
    m_rows = tile_n * m_img

    patches, centers = [], []
    for b in range(tile_n):
        taps = []
        for di in range(3):
            for dj in range(3):
                p = (di % s) * s + (dj % s)    # stride-phase of this tap
                r0 = p * hph + di // s
                c0 = dj // s
                win = xph_ref[b, r0:r0 + ho, c0:c0 + wo, :].reshape(m_img, cin)
                taps.append(win)
                if di == 1 and dj == 1:
                    centers.append(win)        # == x[b, ::s, ::s, :]
        patches.append(jnp.concatenate(taps, axis=-1))        # (m_img, 9*cin)
    patch = jnp.concatenate(patches, axis=0).astype(jnp.bfloat16)  # (M, 9*cin)
    xs = jnp.concatenate(centers, axis=0).astype(jnp.bfloat16)     # (M, cin)

    # single deep-K MXU dot, f32 accumulation
    acc = jnp.dot(patch, w1_ref[...], preferred_element_type=jnp.float32)
    y1_q = acc.astype(jnp.bfloat16)
    y1_ref[...] = y1_q.reshape(tile_n, m_img, cout)
    s1_ref[0] = _partial_stats(y1_q.astype(jnp.float32), m_rows)

    if has_proj:
        sc = jnp.dot(xs, ws_ref[...], preferred_element_type=jnp.float32)
        sc_q = sc.astype(jnp.bfloat16)
        sc_ref[...] = sc_q.reshape(tile_n, m_img, cout)
        ssc_ref[0] = _partial_stats(sc_q.astype(jnp.float32), m_rows)
    else:
        # identity shortcut: pass x through (cin == cout here)
        sc_ref[...] = xs.reshape(tile_n, m_img, cout)


def _k2_kernel(y1_ref, a1_ref, b1_ref, w2_ref, y2_ref, s2_ref, h_ref,
               *, ho, wo, tile_n):
    """bn1 (scale/shift) + relu, then conv2 as one deep-K matmul (K = 9*c)."""
    c = y1_ref.shape[-1]
    m_img = ho * wo
    m_rows = tile_n * m_img

    # Halo scratch: only the 1-pixel zero border is refreshed (thin stores);
    # the interior is fully overwritten for every image below.
    zrow = jnp.zeros((1, wo + 2, c), jnp.float32)
    zcol = jnp.zeros((ho, 1, c), jnp.float32)
    h_ref[0:1, :, :] = zrow
    h_ref[ho + 1:ho + 2, :, :] = zrow
    h_ref[1:ho + 1, 0:1, :] = zcol
    h_ref[1:ho + 1, wo + 1:wo + 2, :] = zcol

    patches = []
    for b in range(tile_n):
        hb = jnp.maximum(
            y1_ref[b].astype(jnp.float32) * a1_ref[...] + b1_ref[...], 0.0)
        h_ref[1:ho + 1, 1:wo + 1, :] = hb.reshape(ho, wo, c)
        taps = [h_ref[di:di + ho, dj:dj + wo, :].reshape(m_img, c)
                for di in range(3) for dj in range(3)]
        patches.append(jnp.concatenate(taps, axis=-1))         # (m_img, 9*c)
    patch = jnp.concatenate(patches, axis=0).astype(jnp.bfloat16)   # (M, 9*c)

    acc = jnp.dot(patch, w2_ref[...], preferred_element_type=jnp.float32)
    y2_q = acc.astype(jnp.bfloat16)
    y2_ref[...] = y2_q.reshape(tile_n, m_img, c)
    s2_ref[0] = _partial_stats(y2_q.astype(jnp.float32), m_rows)


def _k3_kernel(y2_ref, a2_ref, b2_ref, sc_ref, asc_ref, bsc_ref, out_ref):
    """bn2 + shortcut (bn_sc scale/shift or identity) + add + relu."""
    main = y2_ref[...].astype(jnp.float32) * a2_ref[...] + b2_ref[...]
    sc = sc_ref[...].astype(jnp.float32) * asc_ref[...] + bsc_ref[...]
    out_ref[...] = jnp.maximum(main + sc, 0.0)


# ---------------------------------------------------------------------------
# JAX-side glue: stride-phase decomposition, BN finalization, orchestration
# ---------------------------------------------------------------------------
def _finalize_bn(stats, rows_per_tile, total_rows, gamma, beta):
    """Chan-merge per-tile (sum, centred M2) partials -> BN scale & shift."""
    sums = stats[:, 0, :]                                      # (tiles, c)
    m2s = stats[:, 1, :]
    tile_mean = sums / rows_per_tile
    mean = jnp.sum(sums, axis=0) / total_rows
    m2 = jnp.sum(m2s, axis=0) + rows_per_tile * jnp.sum(
        jnp.square(tile_mean - mean[None, :]), axis=0)
    var = m2 / total_rows                                      # biased, as in BN
    scale = gamma * jax.lax.rsqrt(var + EPS)
    shift = beta - mean * scale
    return scale.reshape(1, -1), shift.reshape(1, -1)


def basic_block_forward(x_nhwc, params, stride):
    """BasicBlock forward (training-mode BN). x is NHWC f32; weights HWIO."""
    n, h, w, cin = x_nhwc.shape
    cout = params["w1"].shape[-1]
    s = int(stride)
    ho = (h - 1) // s + 1
    wo = (w - 1) // s + 1
    m_img = ho * wo
    has_proj = (s != 1) or (cin != cout)

    vmem_budget = _vmem_limit_bytes()
    cparams = pltpu.CompilerParams(
        dimension_semantics=("parallel",), vmem_limit_bytes=vmem_budget)

    # ---- conv1 input: pad + stride-phase decomposition (no HBM im2col) ------
    hpp = _round_up(h + 2, s)
    wpp = _round_up(w + 2, s)
    xp = jnp.pad(x_nhwc, ((0, 0), (1, hpp - h - 1), (1, wpp - w - 1), (0, 0)))
    hph, wph = hpp // s, wpp // s
    xph = xp.reshape(n, hph, s, wph, s, cin)
    xph = jnp.transpose(xph, (0, 2, 4, 1, 3, 5)).reshape(n, s * s * hph, wph, cin)

    # ---- images per grid step: fill the MXU M dim, respect the VMEM budget --
    def _step_bytes(t):
        rows = t * m_img
        return (t * (s * s * hph) * wph * cin * 4      # conv1 input block
                + rows * 9 * max(cin, cout) * 2        # im2col patch (bf16)
                + 3 * rows * cout * 2                  # y1 / y2 / sc blocks
                + rows * cout * 4                      # f32 accumulator
                + (ho + 2) * (wo + 2) * cout * 4)      # conv2 halo scratch

    tile_n = min(n, max(1, -(-256 // m_img)))          # target >= 256 rows
    while tile_n > 1 and (n % tile_n or 4 * _step_bytes(tile_n) > vmem_budget):
        tile_n -= 1
    n_tiles = n // tile_n
    rows_per_tile = tile_n * m_img
    total_rows = n * m_img

    def img_spec(shape):               # tile_n-image slab per grid step
        nd = len(shape)
        return pl.BlockSpec((tile_n,) + tuple(shape[1:]),
                            lambda i, _nd=nd: (i,) + (0,) * (_nd - 1))

    def step_spec(shape):              # one stats block per grid step
        nd = len(shape)
        return pl.BlockSpec((1,) + tuple(shape[1:]),
                            lambda i, _nd=nd: (i,) + (0,) * (_nd - 1))

    def rep_spec(shape):               # replicated across the grid
        nd = len(shape)
        return pl.BlockSpec(tuple(shape), lambda i, _nd=nd: (0,) * _nd)

    # ---- weights reshaped for the fused deep-K dots (tap-major, HWIO) -------
    w1r = params["w1"].reshape(9 * cin, cout).astype(jnp.bfloat16)
    w2r = params["w2"].reshape(9 * cout, cout).astype(jnp.bfloat16)

    act_bf16 = jax.ShapeDtypeStruct((n, m_img, cout), jnp.bfloat16)
    stats_sd = jax.ShapeDtypeStruct((n_tiles, 2, cout), jnp.float32)

    # ---- stage 1: conv1 + shortcut branch ------------------------------------
    k1 = functools.partial(_k1_kernel, stride=s, ho=ho, wo=wo,
                           tile_n=tile_n, has_proj=has_proj)
    in_arrays = [xph, w1r]
    in_specs = [img_spec(xph.shape), rep_spec(w1r.shape)]
    out_shape = [act_bf16, act_bf16, stats_sd]
    out_specs = [img_spec((n, m_img, cout)), img_spec((n, m_img, cout)),
                 step_spec((n_tiles, 2, cout))]
    flops1 = 2 * total_rows * (9 * cin) * cout
    bytes1 = (xph.size * 4 + w1r.size * 2 + 2 * total_rows * cout * 2
              + n_tiles * 2 * cout * 4)
    if has_proj:
        wsr = params["ws"].astype(jnp.bfloat16)     # (cin, cout)
        in_arrays.append(wsr)
        in_specs.append(rep_spec(wsr.shape))
        out_shape.append(stats_sd)
        out_specs.append(step_spec((n_tiles, 2, cout)))
        flops1 += 2 * total_rows * cin * cout
        bytes1 += wsr.size * 2 + n_tiles * 2 * cout * 4

    outs = pl.pallas_call(
        k1,
        grid=(n_tiles,),
        in_specs=in_specs,
        out_specs=tuple(out_specs),
        out_shape=tuple(out_shape),
        compiler_params=cparams,
        cost_estimate=pl.CostEstimate(flops=int(flops1), transcendentals=0,
                                      bytes_accessed=int(bytes1)),
    )(*in_arrays)
    if has_proj:
        y1, sc, s1, ssc = outs
    else:
        y1, sc, s1 = outs

    a1, sh1 = _finalize_bn(s1, rows_per_tile, total_rows,
                           params["g1"], params["b1"])

    # ---- stage 2: bn1 + relu + conv2 -----------------------------------------
    k2 = functools.partial(_k2_kernel, ho=ho, wo=wo, tile_n=tile_n)
    flops2 = 2 * total_rows * (9 * cout) * cout
    bytes2 = (2 * total_rows * cout * 2 + w2r.size * 2 + 4 * cout * 4
              + n_tiles * 2 * cout * 4)
    y2, s2 = pl.pallas_call(
        k2,
        grid=(n_tiles,),
        in_specs=[img_spec(y1.shape), rep_spec(a1.shape), rep_spec(sh1.shape),
                  rep_spec(w2r.shape)],
        out_specs=(img_spec((n, m_img, cout)), step_spec((n_tiles, 2, cout))),
        out_shape=(act_bf16, stats_sd),
        scratch_shapes=[pltpu.VMEM((ho + 2, wo + 2, cout), jnp.float32)],
        compiler_params=cparams,
        cost_estimate=pl.CostEstimate(flops=int(flops2), transcendentals=0,
                                      bytes_accessed=int(bytes2)),
    )(y1, a1, sh1, w2r)

    a2, sh2 = _finalize_bn(s2, rows_per_tile, total_rows,
                           params["g2"], params["b2"])
    if has_proj:
        asc, shsc = _finalize_bn(ssc, rows_per_tile, total_rows,
                                 params["gs"], params["bs"])
    else:
        asc = jnp.ones((1, cout), jnp.float32)      # identity shortcut: no BN
        shsc = jnp.zeros((1, cout), jnp.float32)

    # ---- stage 3: bn2 + shortcut + add + relu --------------------------------
    flops3 = 6 * total_rows * cout
    bytes3 = 2 * total_rows * cout * 2 + total_rows * cout * 4 + 4 * cout * 4
    out = pl.pallas_call(
        _k3_kernel,
        grid=(n_tiles,),
        in_specs=[img_spec(y2.shape), rep_spec(a2.shape), rep_spec(sh2.shape),
                  img_spec(sc.shape), rep_spec(asc.shape), rep_spec(shsc.shape)],
        out_specs=img_spec((n, m_img, cout)),
        out_shape=jax.ShapeDtypeStruct((n, m_img, cout), jnp.float32),
        compiler_params=cparams,
        cost_estimate=pl.CostEstimate(flops=int(flops3), transcendentals=0,
                                      bytes_accessed=int(bytes3)),
    )(y2, a2, sh2, sc, asc, shsc)

    # contiguous dim-split only: no copy, no de-padding slice
    return out.reshape(n, ho, wo, cout)


# ---------------------------------------------------------------------------
# Pure-JAX reference (for sanity checking only)
# ---------------------------------------------------------------------------
def _ref_conv(x, w, stride, pad):
    return jax.lax.conv_general_dilated(
        x, w, window_strides=(stride, stride),
        padding=[(pad, pad), (pad, pad)],
        dimension_numbers=("NHWC", "HWIO", "NHWC"))


def _ref_bn(y, g, b):
    mean = jnp.mean(y, axis=(0, 1, 2), keepdims=True)
    var = jnp.mean(jnp.square(y - mean), axis=(0, 1, 2), keepdims=True)
    return (y - mean) * jax.lax.rsqrt(var + EPS) * g.reshape(1, 1, 1, -1) \
        + b.reshape(1, 1, 1, -1)


def basic_block_reference(x_nhwc, params, stride):
    cin, cout = x_nhwc.shape[-1], params["w1"].shape[-1]
    out = jax.nn.relu(_ref_bn(_ref_conv(x_nhwc, params["w1"], stride, 1),
                              params["g1"], params["b1"]))
    out = _ref_bn(_ref_conv(out, params["w2"], 1, 1), params["g2"], params["b2"])
    if stride != 1 or cin != cout:
        sc = _ref_bn(_ref_conv(x_nhwc, params["ws"].reshape(1, 1, cin, cout),
                               stride, 0), params["gs"], params["bs"])
    else:
        sc = x_nhwc
    return jax.nn.relu(out + sc)


# ---------------------------------------------------------------------------
# Main
# ---------------------------------------------------------------------------
if __name__ == "__main__":
    def make_case(key, n, h, w, in_planes, planes, stride):
        k_x, k_w1, k_w2, k_ws = jax.random.split(key, 4)
        # PyTorch input is NCHW; convert to NHWC for the TPU kernels.
        x_nchw = jax.random.normal(k_x, (n, in_planes, h, w), dtype=jnp.float32)
        x_nhwc = jnp.transpose(x_nchw, (0, 2, 3, 1))
        params = {
            "w1": 0.1 * jax.random.normal(k_w1, (3, 3, in_planes, planes),
                                          jnp.float32),
            "g1": jnp.ones((planes,), jnp.float32),
            "b1": jnp.zeros((planes,), jnp.float32),
            "w2": 0.1 * jax.random.normal(k_w2, (3, 3, planes, planes),
                                          jnp.float32),
            "g2": jnp.ones((planes,), jnp.float32),
            "b2": jnp.zeros((planes,), jnp.float32),
        }
        if stride != 1 or in_planes != planes:
            params["ws"] = 0.1 * jax.random.normal(k_ws, (in_planes, planes),
                                                   jnp.float32)
            params["gs"] = jnp.ones((planes,), jnp.float32)
            params["bs"] = jnp.zeros((planes,), jnp.float32)
        return x_nhwc, params

    key_a, key_b = jax.random.split(jax.random.PRNGKey(0))

    # Case 1: projection shortcut. PyTorch NCHW input = (2, 4, 16, 16),
    # planes=8, stride=2 (1x1-conv + BN shortcut branch).
    x1, p1 = make_case(key_a, 2, 16, 16, 4, 8, 2)
    out1 = jax.block_until_ready(
        jax.jit(functools.partial(basic_block_forward, stride=2))(x1, p1))
    ref1 = basic_block_reference(x1, p1, 2)
    assert out1.shape == ref1.shape == (2, 8, 8, 8)
    err1 = float(jnp.max(jnp.abs(out1 - ref1)))
    assert bool(jnp.allclose(out1, ref1, atol=1e-1, rtol=1e-1)), \
        f"projection-branch mismatch (max abs err {err1:.4f})"

    # Case 2: identity shortcut. PyTorch NCHW input = (2, 8, 8, 8), stride=1.
    x2, p2 = make_case(key_b, 2, 8, 8, 8, 8, 1)
    out2 = jax.block_until_ready(
        jax.jit(functools.partial(basic_block_forward, stride=1))(x2, p2))
    ref2 = basic_block_reference(x2, p2, 1)
    assert out2.shape == ref2.shape == (2, 8, 8, 8)
    err2 = float(jnp.max(jnp.abs(out2 - ref2)))
    assert bool(jnp.allclose(out2, ref2, atol=1e-1, rtol=1e-1)), \
        f"identity-branch mismatch (max abs err {err2:.4f})"

    print("KERNEL_OK")
</pallas_src>

<mosaic_0001>
module attributes {stable_mosaic.version = 11 : i64} {
  func.func @_k1_kernel(%arg0: i32, %arg1: memref<2x36x9x4xf32, #tpu.memory_space<vmem>>, %arg2: memref<36x8xbf16, #tpu.memory_space<vmem>>, %arg3: memref<4x8xbf16, #tpu.memory_space<vmem>>, %arg4: memref<2x64x8xbf16, #tpu.memory_space<vmem>>, %arg5: memref<2x64x8xbf16, #tpu.memory_space<vmem>>, %arg6: memref<1x2x8xf32, #tpu.memory_space<vmem>>, %arg7: memref<1x2x8xf32, #tpu.memory_space<vmem>>) attributes {dimension_semantics = [#tpu.dimension_semantics<parallel>], iteration_bounds = array<i64: 1>, scalar_prefetch = 0 : i64, scratch_operands = 0 : i64, tpu.core_type = #tpu.core_type<tc>, window_params = [{transform_indices = @transform_0, window_bounds = array<i64: 2, 36, 9, 4>}, {pipeline_mode = #tpu.pipeline_mode<synchronous>, transform_indices = @transform_1, window_bounds = array<i64: 36, 8>}, {pipeline_mode = #tpu.pipeline_mode<synchronous>, transform_indices = @transform_2, window_bounds = array<i64: 4, 8>}, {transform_indices = @transform_3, window_bounds = array<i64: 2, 64, 8>}, {transform_indices = @transform_4, window_bounds = array<i64: 2, 64, 8>}, {transform_indices = @transform_5, window_bounds = array<i64: 1, 2, 8>}, {transform_indices = @transform_6, window_bounds = array<i64: 1, 2, 8>}]} {
    %c0 = arith.constant 0 : index
    %c0_0 = arith.constant 0 : index
    %c0_1 = arith.constant 0 : index
    %c0_2 = arith.constant 0 : index
    %0 = vector.load %arg1[%c0, %c0_0, %c0_1, %c0_2] : memref<2x36x9x4xf32, #tpu.memory_space<vmem>>, vector<1x8x8x4xf32>
    %1 = vector.shape_cast %0 : vector<1x8x8x4xf32> to vector<8x8x4xf32>
    %2 = vector.shape_cast %1 : vector<8x8x4xf32> to vector<64x4xf32>
    %c0_3 = arith.constant 0 : index
    %c9 = arith.constant 9 : index
    %c0_4 = arith.constant 0 : index
    %c0_5 = arith.constant 0 : index
    %3 = vector.load %arg1[%c0_3, %c9, %c0_4, %c0_5] : memref<2x36x9x4xf32, #tpu.memory_space<vmem>>, vector<1x8x8x4xf32>
    %4 = vector.shape_cast %3 : vector<1x8x8x4xf32> to vector<8x8x4xf32>
    %5 = vector.shape_cast %4 : vector<8x8x4xf32> to vector<64x4xf32>
    %c0_6 = arith.constant 0 : index
    %c0_7 = arith.constant 0 : index
    %c1 = arith.constant 1 : index
    %c0_8 = arith.constant 0 : index
    %6 = vector.load %arg1[%c0_6, %c0_7, %c1, %c0_8] : memref<2x36x9x4xf32, #tpu.memory_space<vmem>>, vector<1x8x8x4xf32>
    %7 = vector.shape_cast %6 : vector<1x8x8x4xf32> to vector<8x8x4xf32>
    %8 = vector.shape_cast %7 : vector<8x8x4xf32> to vector<64x4xf32>
    %c0_9 = arith.constant 0 : index
    %c18 = arith.constant 18 : index
    %c0_10 = arith.constant 0 : index
    %c0_11 = arith.constant 0 : index
    %9 = vector.load %arg1[%c0_9, %c18, %c0_10, %c0_11] : memref<2x36x9x4xf32, #tpu.memory_space<vmem>>, vector<1x8x8x4xf32>
    %10 = vector.shape_cast %9 : vector<1x8x8x4xf32> to vector<8x8x4xf32>
    %11 = vector.shape_cast %10 : vector<8x8x4xf32> to vector<64x4xf32>
    %c0_12 = arith.constant 0 : index
    %c27 = arith.constant 27 : index
    %c0_13 = arith.constant 0 : index
    %c0_14 = arith.constant 0 : index
    %12 = vector.load %arg1[%c0_12, %c27, %c0_13, %c0_14] : memref<2x36x9x4xf32, #tpu.memory_space<vmem>>, vector<1x8x8x4xf32>
    %13 = vector.shape_cast %12 : vector<1x8x8x4xf32> to vector<8x8x4xf32>
    %14 = vector.shape_cast %13 : vector<8x8x4xf32> to vector<64x4xf32>
    %c0_15 = arith.constant 0 : index
    %c18_16 = arith.constant 18 : index
    %c1_17 = arith.constant 1 : index
    %c0_18 = arith.constant 0 : index
    %15 = vector.load %arg1[%c0_15, %c18_16, %c1_17, %c0_18] : memref<2x36x9x4xf32, #tpu.memory_space<vmem>>, vector<1x8x8x4xf32>
    %16 = vector.shape_cast %15 : vector<1x8x8x4xf32> to vector<8x8x4xf32>
    %17 = vector.shape_cast %16 : vector<8x8x4xf32> to vector<64x4xf32>
    %c0_19 = arith.constant 0 : index
    %c1_20 = arith.constant 1 : index
    %c0_21 = arith.constant 0 : index
    %c0_22 = arith.constant 0 : index
    %18 = vector.load %arg1[%c0_19, %c1_20, %c0_21, %c0_22] : memref<2x36x9x4xf32, #tpu.memory_space<vmem>>, vector<1x8x8x4xf32>
    %19 = vector.shape_cast %18 : vector<1x8x8x4xf32> to vector<8x8x4xf32>
    %20 = vector.shape_cast %19 : vector<8x8x4xf32> to vector<64x4xf32>
    %c0_23 = arith.constant 0 : index
    %c10 = arith.constant 10 : index
    %c0_24 = arith.constant 0 : index
    %c0_25 = arith.constant 0 : index
    %21 = vector.load %arg1[%c0_23, %c10, %c0_24, %c0_25] : memref<2x36x9x4xf32, #tpu.memory_space<vmem>>, vector<1x8x8x4xf32>
    %22 = vector.shape_cast %21 : vector<1x8x8x4xf32> to vector<8x8x4xf32>
    %23 = vector.shape_cast %22 : vector<8x8x4xf32> to vector<64x4xf32>
    %c0_26 = arith.constant 0 : index
    %c1_27 = arith.constant 1 : index
    %c1_28 = arith.constant 1 : index
    %c0_29 = arith.constant 0 : index
    %24 = vector.load %arg1[%c0_26, %c1_27, %c1_28, %c0_29] : memref<2x36x9x4xf32, #tpu.memory_space<vmem>>, vector<1x8x8x4xf32>
    %25 = vector.shape_cast %24 : vector<1x8x8x4xf32> to vector<8x8x4xf32>
    %26 = vector.shape_cast %25 : vector<8x8x4xf32> to vector<64x4xf32>
    %27 = tpu.concatenate %2, %5, %8, %11, %14, %17, %20, %23, %26 in 1 : vector<64x4xf32>, vector<64x4xf32>, vector<64x4xf32>, vector<64x4xf32>, vector<64x4xf32>, vector<64x4xf32>, vector<64x4xf32>, vector<64x4xf32>, vector<64x4xf32> -> vector<64x36xf32>
    %c1_30 = arith.constant 1 : index
    %c0_31 = arith.constant 0 : index
    %c0_32 = arith.constant 0 : index
    %c0_33 = arith.constant 0 : index
    %28 = vector.load %arg1[%c1_30, %c0_31, %c0_32, %c0_33] : memref<2x36x9x4xf32, #tpu.memory_space<vmem>>, vector<1x8x8x4xf32>
    %29 = vector.shape_cast %28 : vector<1x8x8x4xf32> to vector<8x8x4xf32>
    %30 = vector.shape_cast %29 : vector<8x8x4xf32> to vector<64x4xf32>
    %c1_34 = arith.constant 1 : index
    %c9_35 = arith.constant 9 : index
    %c0_36 = arith.constant 0 : index
    %c0_37 = arith.constant 0 : index
    %31 = vector.load %arg1[%c1_34, %c9_35, %c0_36, %c0_37] : memref<2x36x9x4xf32, #tpu.memory_space<vmem>>, vector<1x8x8x4xf32>
    %32 = vector.shape_cast %31 : vector<1x8x8x4xf32> to vector<8x8x4xf32>
    %33 = vector.shape_cast %32 : vector<8x8x4xf32> to vector<64x4xf32>
    %c1_38 = arith.constant 1 : index
    %c0_39 = arith.constant 0 : index
    %c1_40 = arith.constant 1 : index
    %c0_41 = arith.constant 0 : index
    %34 = vector.load %arg1[%c1_38, %c0_39, %c1_40, %c0_41] : memref<2x36x9x4xf32, #tpu.memory_space<vmem>>, vector<1x8x8x4xf32>
    %35 = vector.shape_cast %34 : vector<1x8x8x4xf32> to vector<8x8x4xf32>
    %36 = vector.shape_cast %35 : vector<8x8x4xf32> to vector<64x4xf32>
    %c1_42 = arith.constant 1 : index
    %c18_43 = arith.constant 18 : index
    %c0_44 = arith.constant 0 : index
    %c0_45 = arith.constant 0 : index
    %37 = vector.load %arg1[%c1_42, %c18_43, %c0_44, %c0_45] : memref<2x36x9x4xf32, #tpu.memory_space<vmem>>, vector<1x8x8x4xf32>
    %38 = vector.shape_cast %37 : vector<1x8x8x4xf32> to vector<8x8x4xf32>
    %39 = vector.shape_cast %38 : vector<8x8x4xf32> to vector<64x4xf32>
    %c1_46 = arith.constant 1 : index
    %c27_47 = arith.constant 27 : index
    %c0_48 = arith.constant 0 : index
    %c0_49 = arith.constant 0 : index
    %40 = vector.load %arg1[%c1_46, %c27_47, %c0_48, %c0_49] : memref<2x36x9x4xf32, #tpu.memory_space<vmem>>, vector<1x8x8x4xf32>
    %41 = vector.shape_cast %40 : vector<1x8x8x4xf32> to vector<8x8x4xf32>
    %42 = vector.shape_cast %41 : vector<8x8x4xf32> to vector<64x4xf32>
    %c1_50 = arith.constant 1 : index
    %c18_51 = arith.constant 18 : index
    %c1_52 = arith.constant 1 : index
    %c0_53 = arith.constant 0 : index
    %43 = vector.load %arg1[%c1_50, %c18_51, %c1_52, %c0_53] : memref<2x36x9x4xf32, #tpu.memory_space<vmem>>, vector<1x8x8x4xf32>
    %44 = vector.shape_cast %43 : vector<1x8x8x4xf32> to vector<8x8x4xf32>
    %45 = vector.shape_cast %44 : vector<8x8x4xf32> to vector<64x4xf32>
    %c1_54 = arith.constant 1 : index
    %c1_55 = arith.constant 1 : index
    %c0_56 = arith.constant 0 : index
    %c0_57 = arith.constant 0 : index
    %46 = vector.load %arg1[%c1_54, %c1_55, %c0_56, %c0_57] : memref<2x36x9x4xf32, #tpu.memory_space<vmem>>, vector<1x8x8x4xf32>
    %47 = vector.shape_cast %46 : vector<1x8x8x4xf32> to vector<8x8x4xf32>
    %48 = vector.shape_cast %47 : vector<8x8x4xf32> to vector<64x4xf32>
    %c1_58 = arith.constant 1 : index
    %c10_59 = arith.constant 10 : index
    %c0_60 = arith.constant 0 : index
    %c0_61 = arith.constant 0 : index
    %49 = vector.load %arg1[%c1_58, %c10_59, %c0_60, %c0_61] : memref<2x36x9x4xf32, #tpu.memory_space<vmem>>, vector<1x8x8x4xf32>
    %50 = vector.shape_cast %49 : vector<1x8x8x4xf32> to vector<8x8x4xf32>
    %51 = vector.shape_cast %50 : vector<8x8x4xf32> to vector<64x4xf32>
    %c1_62 = arith.constant 1 : index
    %c1_63 = arith.constant 1 : index
    %c1_64 = arith.constant 1 : index
    %c0_65 = arith.constant 0 : index
    %52 = vector.load %arg1[%c1_62, %c1_63, %c1_64, %c0_65] : memref<2x36x9x4xf32, #tpu.memory_space<vmem>>, vector<1x8x8x4xf32>
    %53 = vector.shape_cast %52 : vector<1x8x8x4xf32> to vector<8x8x4xf32>
    %54 = vector.shape_cast %53 : vector<8x8x4xf32> to vector<64x4xf32>
    %55 = tpu.concatenate %30, %33, %36, %39, %42, %45, %48, %51, %54 in 1 : vector<64x4xf32>, vector<64x4xf32>, vector<64x4xf32>, vector<64x4xf32>, vector<64x4xf32>, vector<64x4xf32>, vector<64x4xf32>, vector<64x4xf32>, vector<64x4xf32> -> vector<64x36xf32>
    %56 = tpu.concatenate %27, %55 in 0 : vector<64x36xf32>, vector<64x36xf32> -> vector<128x36xf32>
    %57 = arith.truncf %56 : vector<128x36xf32> to vector<128x36xbf16>
    %58 = tpu.concatenate %14, %42 in 0 : vector<64x4xf32>, vector<64x4xf32> -> vector<128x4xf32>
    %59 = arith.truncf %58 : vector<128x4xf32> to vector<128x4xbf16>
    %c0_66 = arith.constant 0 : index
    %c0_67 = arith.constant 0 : index
    %60 = vector.load %arg2[%c0_66, %c0_67] : memref<36x8xbf16, #tpu.memory_space<vmem>>, vector<36x8xbf16>
    %cst = arith.constant dense<0.000000e+00> : vector<128x8xf32>
    %61 = tpu.matmul %57, %60, %cst {dimension_numbers = #tpu.dot_dimension_numbers<[1], [0], [0], [1], [0, 0, 1, 1], [], []>} : vector<128x36xbf16>, vector<36x8xbf16>, vector<128x8xf32> -> vector<128x8xf32>
    %62 = arith.truncf %61 : vector<128x8xf32> to vector<128x8xbf16>
    %63 = vector.shape_cast %62 : vector<128x8xbf16> to vector<2x64x8xbf16>
    %c0_68 = arith.constant 0 : index
    %c0_69 = arith.constant 0 : index
    %c0_70 = arith.constant 0 : index
    %64 = vector.load %arg4[%c0_68, %c0_69, %c0_70] : memref<2x64x8xbf16, #tpu.memory_space<vmem>>, vector<2x64x8xbf16>
    tpu.vector_store %arg4[%c0_68, %c0_69, %c0_70], %63 {strides = array<i32>} : memref<2x64x8xbf16, #tpu.memory_space<vmem>>, vector<2x64x8xbf16>,
    %65 = arith.extf %62 : vector<128x8xbf16> to vector<128x8xf32>
    %cst_71 = arith.constant dense<0.000000e+00> : vector<8xf32>
    %66 = vector.multi_reduction <add>, %65, %cst_71 [0] : vector<128x8xf32> to vector<8xf32>
    %67 = vector.shape_cast %66 : vector<8xf32> to vector<1x8xf32>
    %cst_72 = arith.constant 7.812500e-03 : f32
    %68 = vector.broadcast %cst_72 : f32 to vector<1x8xf32>
    %69 = arith.mulf %67, %68 : vector<1x8xf32>
    %70 = vector.broadcast %69 : vector<1x8xf32> to vector<128x8xf32>
    %71 = arith.subf %65, %70 : vector<128x8xf32>
    %72 = arith.mulf %71, %71 : vector<128x8xf32>
    %cst_73 = arith.constant dense<0.000000e+00> : vector<8xf32>
    %73 = vector.multi_reduction <add>, %72, %cst_73 [0] : vector<128x8xf32> to vector<8xf32>
    %74 = vector.shape_cast %73 : vector<8xf32> to vector<1x8xf32>
    %75 = tpu.concatenate %67, %74 in 0 : vector<1x8xf32>, vector<1x8xf32> -> vector<2x8xf32>
    %c0_74 = arith.constant 0 : index
    %c0_75 = arith.constant 0 : index
    %c0_76 = arith.constant 0 : index
    %76 = vector.load %arg6[%c0_74, %c0_75, %c0_76] : memref<1x2x8xf32, #tpu.memory_space<vmem>>, vector<1x2x8xf32>
    %77 = vector.shape_cast %76 : vector<1x2x8xf32> to vector<2x8xf32>
    %78 = vector.shape_cast %75 : vector<2x8xf32> to vector<1x2x8xf32>
    tpu.vector_store %arg6[%c0_74, %c0_75, %c0_76], %78 {strides = array<i32>} : memref<1x2x8xf32, #tpu.memory_space<vmem>>, vector<1x2x8xf32>,
    %c0_77 = arith.constant 0 : index
    %c0_78 = arith.constant 0 : index
    %79 = vector.load %arg3[%c0_77, %c0_78] : memref<4x8xbf16, #tpu.memory_space<vmem>>, vector<4x8xbf16>
    %cst_79 = arith.constant dense<0.000000e+00> : vector<128x8xf32>
    %80 = tpu.matmul %59, %79, %cst_79 {dimension_numbers = #tpu.dot_dimension_numbers<[1], [0], [0], [1], [0, 0, 1, 1], [], []>} : vector<128x4xbf16>, vector<4x8xbf16>, vector<128x8xf32> -> vector<128x8xf32>
    %81 = arith.truncf %80 : vector<128x8xf32> to vector<128x8xbf16>
    %82 = vector.shape_cast %81 : vector<128x8xbf16> to vector<2x64x8xbf16>
    %c0_80 = arith.constant 0 : index
    %c0_81 = arith.constant 0 : index
    %c0_82 = arith.constant 0 : index
    %83 = vector.load %arg5[%c0_80, %c0_81, %c0_82] : memref<2x64x8xbf16, #tpu.memory_space<vmem>>, vector<2x64x8xbf16>
    tpu.vector_store %arg5[%c0_80, %c0_81, %c0_82], %82 {strides = array<i32>} : memref<2x64x8xbf16, #tpu.memory_space<vmem>>, vector<2x64x8xbf16>,
    %84 = arith.extf %81 : vector<128x8xbf16> to vector<128x8xf32>
    %cst_83 = arith.constant dense<0.000000e+00> : vector<8xf32>
    %85 = vector.multi_reduction <add>, %84, %cst_83 [0] : vector<128x8xf32> to vector<8xf32>
    %86 = vector.shape_cast %85 : vector<8xf32> to vector<1x8xf32>
    %cst_84 = arith.constant 7.812500e-03 : f32
    %87 = vector.broadcast %cst_84 : f32 to vector<1x8xf32>
    %88 = arith.mulf %86, %87 : vector<1x8xf32>
    %89 = vector.broadcast %88 : vector<1x8xf32> to vector<128x8xf32>
    %90 = arith.subf %84, %89 : vector<128x8xf32>
    %91 = arith.mulf %90, %90 : vector<128x8xf32>
    %cst_85 = arith.constant dense<0.000000e+00> : vector<8xf32>
    %92 = vector.multi_reduction <add>, %91, %cst_85 [0] : vector<128x8xf32> to vector<8xf32>
    %93 = vector.shape_cast %92 : vector<8xf32> to vector<1x8xf32>
    %94 = tpu.concatenate %86, %93 in 0 : vector<1x8xf32>, vector<1x8xf32> -> vector<2x8xf32>
    %c0_86 = arith.constant 0 : index
    %c0_87 = arith.constant 0 : index
    %c0_88 = arith.constant 0 : index
    %95 = vector.load %arg7[%c0_86, %c0_87, %c0_88] : memref<1x2x8xf32, #tpu.memory_space<vmem>>, vector<1x2x8xf32>
    %96 = vector.shape_cast %95 : vector<1x2x8xf32> to vector<2x8xf32>
    %97 = vector.shape_cast %94 : vector<2x8xf32> to vector<1x2x8xf32>
    tpu.vector_store %arg7[%c0_86, %c0_87, %c0_88], %97 {strides = array<i32>} : memref<1x2x8xf32, #tpu.memory_space<vmem>>, vector<1x2x8xf32>,
    return
  }
  func.func @transform_0(%arg0: i32) -> (i32, i32, i32, i32) {
    %c0_i32 = arith.constant 0 : i32
    %c0_i32_0 = arith.constant 0 : i32
    %c0_i32_1 = arith.constant 0 : i32
    %c0_i32_2 = arith.constant 0 : i32
    return %arg0, %c0_i32, %c0_i32_0, %c0_i32_1 : i32, i32, i32, i32
  }
  func.func @transform_1(%arg0: i32) -> (i32, i32) {
    %c0_i32 = arith.constant 0 : i32
    %c0_i32_0 = arith.constant 0 : i32
    %c0_i32_1 = arith.constant 0 : i32
    return %c0_i32, %c0_i32_0 : i32, i32
  }
  func.func @transform_2(%arg0: i32) -> (i32, i32) {
    %c0_i32 = arith.constant 0 : i32
    %c0_i32_0 = arith.constant 0 : i32
    %c0_i32_1 = arith.constant 0 : i32
    return %c0_i32, %c0_i32_0 : i32, i32
  }
  func.func @transform_3(%arg0: i32) -> (i32, i32, i32) {
    %c0_i32 = arith.constant 0 : i32
    %c0_i32_0 = arith.constant 0 : i32
    %c0_i32_1 = arith.constant 0 : i32
    return %arg0, %c0_i32, %c0_i32_0 : i32, i32, i32
  }
  func.func @transform_4(%arg0: i32) -> (i32, i32, i32) {
    %c0_i32 = arith.constant 0 : i32
    %c0_i32_0 = arith.constant 0 : i32
    %c0_i32_1 = arith.constant 0 : i32
    return %arg0, %c0_i32, %c0_i32_0 : i32, i32, i32
  }
  func.func @transform_5(%arg0: i32) -> (i32, i32, i32) {
    %c0_i32 = arith.constant 0 : i32
    %c0_i32_0 = arith.constant 0 : i32
    %c0_i32_1 = arith.constant 0 : i32
    return %arg0, %c0_i32, %c0_i32_0 : i32, i32, i32
  }
  func.func @transform_6(%arg0: i32) -> (i32, i32, i32) {
    %c0_i32 = arith.constant 0 : i32
    %c0_i32_0 = arith.constant 0 : i32
    %c0_i32_1 = arith.constant 0 : i32
    return %arg0, %c0_i32, %c0_i32_0 : i32, i32, i32
  }
}

module attributes {stable_mosaic.version = 11 : i64} {
  func.func @_k2_kernel(%arg0: i32, %arg1: memref<2x64x8xbf16, #tpu.memory_space<vmem>>, %arg2: memref<1x8xf32, #tpu.memory_space<vmem>>, %arg3: memref<1x8xf32, #tpu.memory_space<vmem>>, %arg4: memref<72x8xbf16, #tpu.memory_space<vmem>>, %arg5: memref<2x64x8xbf16, #tpu.memory_space<vmem>>, %arg6: memref<1x2x8xf32, #tpu.memory_space<vmem>>, %arg7: memref<10x10x8xf32, #tpu.memory_space<vmem>>) attributes {dimension_semantics = [#tpu.dimension_semantics<parallel>], iteration_bounds = array<i64: 1>, scalar_prefetch = 0 : i64, scratch_operands = 1 : i64, tpu.core_type = #tpu.core_type<tc>, window_params = [{transform_indices = @transform_0, window_bounds = array<i64: 2, 64, 8>}, {pipeline_mode = #tpu.pipeline_mode<synchronous>, transform_indices = @transform_1, window_bounds = array<i64: 1, 8>}, {pipeline_mode = #tpu.pipeline_mode<synchronous>, transform_indices = @transform_2, window_bounds = array<i64: 1, 8>}, {pipeline_mode = #tpu.pipeline_mode<synchronous>, transform_indices = @transform_3, window_bounds = array<i64: 72, 8>}, {transform_indices = @transform_4, window_bounds = array<i64: 2, 64, 8>}, {transform_indices = @transform_5, window_bounds = array<i64: 1, 2, 8>}]} {
    %cst = arith.constant 0.000000e+00 : f32
    %0 = vector.broadcast %cst : f32 to vector<1x10x8xf32>
    %cst_0 = arith.constant 0.000000e+00 : f32
    %1 = vector.broadcast %cst_0 : f32 to vector<8x1x8xf32>
    %c0 = arith.constant 0 : index
    %c0_1 = arith.constant 0 : index
    %c0_2 = arith.constant 0 : index
    %2 = vector.load %arg7[%c0, %c0_1, %c0_2] : memref<10x10x8xf32, #tpu.memory_space<vmem>>, vector<1x10x8xf32>
    tpu.vector_store %arg7[%c0, %c0_1, %c0_2], %0 {strides = array<i32>} : memref<10x10x8xf32, #tpu.memory_space<vmem>>, vector<1x10x8xf32>,
    %c9 = arith.constant 9 : index
    %c0_3 = arith.constant 0 : index
    %c0_4 = arith.constant 0 : index
    %3 = vector.load %arg7[%c9, %c0_3, %c0_4] : memref<10x10x8xf32, #tpu.memory_space<vmem>>, vector<1x10x8xf32>
    tpu.vector_store %arg7[%c9, %c0_3, %c0_4], %0 {strides = array<i32>} : memref<10x10x8xf32, #tpu.memory_space<vmem>>, vector<1x10x8xf32>,
    %c1 = arith.constant 1 : index
    %c0_5 = arith.constant 0 : index
    %c0_6 = arith.constant 0 : index
    %4 = vector.load %arg7[%c1, %c0_5, %c0_6] : memref<10x10x8xf32, #tpu.memory_space<vmem>>, vector<8x1x8xf32>
    tpu.vector_store %arg7[%c1, %c0_5, %c0_6], %1 {strides = array<i32>} : memref<10x10x8xf32, #tpu.memory_space<vmem>>, vector<8x1x8xf32>,
    %c1_7 = arith.constant 1 : index
    %c9_8 = arith.constant 9 : index
    %c0_9 = arith.constant 0 : index
    %5 = vector.load %arg7[%c1_7, %c9_8, %c0_9] : memref<10x10x8xf32, #tpu.memory_space<vmem>>, vector<8x1x8xf32>
    tpu.vector_store %arg7[%c1_7, %c9_8, %c0_9], %1 {strides = array<i32>} : memref<10x10x8xf32, #tpu.memory_space<vmem>>, vector<8x1x8xf32>,
    %c0_10 = arith.constant 0 : index
    %c0_11 = arith.constant 0 : index
    %c0_12 = arith.constant 0 : index
    %6 = vector.load %arg1[%c0_10, %c0_11, %c0_12] : memref<2x64x8xbf16, #tpu.memory_space<vmem>>, vector<1x64x8xbf16>
    %7 = vector.shape_cast %6 : vector<1x64x8xbf16> to vector<64x8xbf16>
    %8 = arith.extf %7 : vector<64x8xbf16> to vector<64x8xf32>
    %c0_13 = arith.constant 0 : index
    %c0_14 = arith.constant 0 : index
    %9 = vector.load %arg2[%c0_13, %c0_14] : memref<1x8xf32, #tpu.memory_space<vmem>>, vector<1x8xf32>
    %10 = vector.broadcast %9 : vector<1x8xf32> to vector<64x8xf32>
    %11 = arith.mulf %8, %10 : vector<64x8xf32>
    %c0_15 = arith.constant 0 : index
    %c0_16 = arith.constant 0 : index
    %12 = vector.load %arg3[%c0_15, %c0_16] : memref<1x8xf32, #tpu.memory_space<vmem>>, vector<1x8xf32>
    %13 = vector.broadcast %12 : vector<1x8xf32> to vector<64x8xf32>
    %14 = arith.addf %11, %13 : vector<64x8xf32>
    %cst_17 = arith.constant 0.000000e+00 : f32
    %15 = vector.broadcast %cst_17 : f32 to vector<64x8xf32>
    %16 = arith.maximumf %14, %15 : vector<64x8xf32>
    %17 = vector.shape_cast %16 : vector<64x8xf32> to vector<8x8x8xf32>
    %c1_18 = arith.constant 1 : index
    %c1_19 = arith.constant 1 : index
    %c0_20 = arith.constant 0 : index
    %18 = vector.load %arg7[%c1_18, %c1_19, %c0_20] : memref<10x10x8xf32, #tpu.memory_space<vmem>>, vector<8x8x8xf32>
    tpu.vector_store %arg7[%c1_18, %c1_19, %c0_20], %17 {strides = array<i32>} : memref<10x10x8xf32, #tpu.memory_space<vmem>>, vector<8x8x8xf32>,
    %c0_21 = arith.constant 0 : index
    %c0_22 = arith.constant 0 : index
    %c0_23 = arith.constant 0 : index
    %19 = vector.load %arg7[%c0_21, %c0_22, %c0_23] : memref<10x10x8xf32, #tpu.memory_space<vmem>>, vector<8x8x8xf32>
    %20 = vector.shape_cast %19 : vector<8x8x8xf32> to vector<64x8xf32>
    %c0_24 = arith.constant 0 : index
    %c1_25 = arith.constant 1 : index
    %c0_26 = arith.constant 0 : index
    %21 = vector.load %arg7[%c0_24, %c1_25, %c0_26] : memref<10x10x8xf32, #tpu.memory_space<vmem>>, vector<8x8x8xf32>
    %22 = vector.shape_cast %21 : vector<8x8x8xf32> to vector<64x8xf32>
    %c0_27 = arith.constant 0 : index
    %c2 = arith.constant 2 : index
    %c0_28 = arith.constant 0 : index
    %23 = vector.load %arg7[%c0_27, %c2, %c0_28] : memref<10x10x8xf32, #tpu.memory_space<vmem>>, vector<8x8x8xf32>
    %24 = vector.shape_cast %23 : vector<8x8x8xf32> to vector<64x8xf32>
    %c1_29 = arith.constant 1 : index
    %c0_30 = arith.constant 0 : index
    %c0_31 = arith.constant 0 : index
    %25 = vector.load %arg7[%c1_29, %c0_30, %c0_31] : memref<10x10x8xf32, #tpu.memory_space<vmem>>, vector<8x8x8xf32>
    %26 = vector.shape_cast %25 : vector<8x8x8xf32> to vector<64x8xf32>
    %c1_32 = arith.constant 1 : index
    %c1_33 = arith.constant 1 : index
    %c0_34 = arith.constant 0 : index
    %27 = vector.load %arg7[%c1_32, %c1_33, %c0_34] : memref<10x10x8xf32, #tpu.memory_space<vmem>>, vector<8x8x8xf32>
    %28 = vector.shape_cast %27 : vector<8x8x8xf32> to vector<64x8xf32>
    %c1_35 = arith.constant 1 : index
    %c2_36 = arith.constant 2 : index
    %c0_37 = arith.constant 0 : index
    %29 = vector.load %arg7[%c1_35, %c2_36, %c0_37] : memref<10x10x8xf32, #tpu.memory_space<vmem>>, vector<8x8x8xf32>
    %30 = vector.shape_cast %29 : vector<8x8x8xf32> to vector<64x8xf32>
    %c2_38 = arith.constant 2 : index
    %c0_39 = arith.constant 0 : index
    %c0_40 = arith.constant 0 : index
    %31 = vector.load %arg7[%c2_38, %c0_39, %c0_40] : memref<10x10x8xf32, #tpu.memory_space<vmem>>, vector<8x8x8xf32>
    %32 = vector.shape_cast %31 : vector<8x8x8xf32> to vector<64x8xf32>
    %c2_41 = arith.constant 2 : index
    %c1_42 = arith.constant 1 : index
    %c0_43 = arith.constant 0 : index
    %33 = vector.load %arg7[%c2_41, %c1_42, %c0_43] : memref<10x10x8xf32, #tpu.memory_space<vmem>>, vector<8x8x8xf32>
    %34 = vector.shape_cast %33 : vector<8x8x8xf32> to vector<64x8xf32>
    %c2_44 = arith.constant 2 : index
    %c2_45 = arith.constant 2 : index
    %c0_46 = arith.constant 0 : index
    %35 = vector.load %arg7[%c2_44, %c2_45, %c0_46] : memref<10x10x8xf32, #tpu.memory_space<vmem>>, vector<8x8x8xf32>
    %36 = vector.shape_cast %35 : vector<8x8x8xf32> to vector<64x8xf32>
    %37 = tpu.concatenate %20, %22, %24, %26, %28, %30, %32, %34, %36 in 1 : vector<64x8xf32>, vector<64x8xf32>, vector<64x8xf32>, vector<64x8xf32>, vector<64x8xf32>, vector<64x8xf32>, vector<64x8xf32>, vector<64x8xf32>, vector<64x8xf32> -> vector<64x72xf32>
    %c1_47 = arith.constant 1 : index
    %c0_48 = arith.constant 0 : index
    %c0_49 = arith.constant 0 : index
    %38 = vector.load %arg1[%c1_47, %c0_48, %c0_49] : memref<2x64x8xbf16, #tpu.memory_space<vmem>>, vector<1x64x8xbf16>
    %39 = vector.shape_cast %38 : vector<1x64x8xbf16> to vector<64x8xbf16>
    %40 = arith.extf %39 : vector<64x8xbf16> to vector<64x8xf32>
    %c0_50 = arith.constant 0 : index
    %c0_51 = arith.constant 0 : index
    %41 = vector.load %arg2[%c0_50, %c0_51] : memref<1x8xf32, #tpu.memory_space<vmem>>, vector<1x8xf32>
    %42 = vector.broadcast %41 : vector<1x8xf32> to vector<64x8xf32>
    %43 = arith.mulf %40, %42 : vector<64x8xf32>
    %c0_52 = arith.constant 0 : index
    %c0_53 = arith.constant 0 : index
    %44 = vector.load %arg3[%c0_52, %c0_53] : memref<1x8xf32, #tpu.memory_space<vmem>>, vector<1x8xf32>
    %45 = vector.broadcast %44 : vector<1x8xf32> to vector<64x8xf32>
    %46 = arith.addf %43, %45 : vector<64x8xf32>
    %cst_54 = arith.constant 0.000000e+00 : f32
    %47 = vector.broadcast %cst_54 : f32 to vector<64x8xf32>
    %48 = arith.maximumf %46, %47 : vector<64x8xf32>
    %49 = vector.shape_cast %48 : vector<64x8xf32> to vector<8x8x8xf32>
    %c1_55 = arith.constant 1 : index
    %c1_56 = arith.constant 1 : index
    %c0_57 = arith.constant 0 : index
    %50 = vector.load %arg7[%c1_55, %c1_56, %c0_57] : memref<10x10x8xf32, #tpu.memory_space<vmem>>, vector<8x8x8xf32>
    tpu.vector_store %arg7[%c1_55, %c1_56, %c0_57], %49 {strides = array<i32>} : memref<10x10x8xf32, #tpu.memory_space<vmem>>, vector<8x8x8xf32>,
    %c0_58 = arith.constant 0 : index
    %c0_59 = arith.constant 0 : index
    %c0_60 = arith.constant 0 : index
    %51 = vector.load %arg7[%c0_58, %c0_59, %c0_60] : memref<10x10x8xf32, #tpu.memory_space<vmem>>, vector<8x8x8xf32>
    %52 = vector.shape_cast %51 : vector<8x8x8xf32> to vector<64x8xf32>
    %c0_61 = arith.constant 0 : index
    %c1_62 = arith.constant 1 : index
    %c0_63 = arith.constant 0 : index
    %53 = vector.load %arg7[%c0_61, %c1_62, %c0_63] : memref<10x10x8xf32, #tpu.memory_space<vmem>>, vector<8x8x8xf32>
    %54 = vector.shape_cast %53 : vector<8x8x8xf32> to vector<64x8xf32>
    %c0_64 = arith.constant 0 : index
    %c2_65 = arith.constant 2 : index
    %c0_66 = arith.constant 0 : index
    %55 = vector.load %arg7[%c0_64, %c2_65, %c0_66] : memref<10x10x8xf32, #tpu.memory_space<vmem>>, vector<8x8x8xf32>
    %56 = vector.shape_cast %55 : vector<8x8x8xf32> to vector<64x8xf32>
    %c1_67 = arith.constant 1 : index
    %c0_68 = arith.constant 0 : index
    %c0_69 = arith.constant 0 : index
    %57 = vector.load %arg7[%c1_67, %c0_68, %c0_69] : memref<10x10x8xf32, #tpu.memory_space<vmem>>, vector<8x8x8xf32>
    %58 = vector.shape_cast %57 : vector<8x8x8xf32> to vector<64x8xf32>
    %c1_70 = arith.constant 1 : index
    %c1_71 = arith.constant 1 : index
    %c0_72 = arith.constant 0 : index
    %59 = vector.load %arg7[%c1_70, %c1_71, %c0_72] : memref<10x10x8xf32, #tpu.memory_space<vmem>>, vector<8x8x8xf32>
    %60 = vector.shape_cast %59 : vector<8x8x8xf32> to vector<64x8xf32>
    %c1_73 = arith.constant 1 : index
    %c2_74 = arith.constant 2 : index
    %c0_75 = arith.constant 0 : index
    %61 = vector.load %arg7[%c1_73, %c2_74, %c0_75] : memref<10x10x8xf32, #tpu.memory_space<vmem>>, vector<8x8x8xf32>
    %62 = vector.shape_cast %61 : vector<8x8x8xf32> to vector<64x8xf32>
    %c2_76 = arith.constant 2 : index
    %c0_77 = arith.constant 0 : index
    %c0_78 = arith.constant 0 : index
    %63 = vector.load %arg7[%c2_76, %c0_77, %c0_78] : memref<10x10x8xf32, #tpu.memory_space<vmem>>, vector<8x8x8xf32>
    %64 = vector.shape_cast %63 : vector<8x8x8xf32> to vector<64x8xf32>
    %c2_79 = arith.constant 2 : index
    %c1_80 = arith.constant 1 : index
    %c0_81 = arith.constant 0 : index
    %65 = vector.load %arg7[%c2_79, %c1_80, %c0_81] : memref<10x10x8xf32, #tpu.memory_space<vmem>>, vector<8x8x8xf32>
    %66 = vector.shape_cast %65 : vector<8x8x8xf32> to vector<64x8xf32>
    %c2_82 = arith.constant 2 : index
    %c2_83 = arith.constant 2 : index
    %c0_84 = arith.constant 0 : index
    %67 = vector.load %arg7[%c2_82, %c2_83, %c0_84] : memref<10x10x8xf32, #tpu.memory_space<vmem>>, vector<8x8x8xf32>
    %68 = vector.shape_cast %67 : vector<8x8x8xf32> to vector<64x8xf32>
    %69 = tpu.concatenate %52, %54, %56, %58, %60, %62, %64, %66, %68 in 1 : vector<64x8xf32>, vector<64x8xf32>, vector<64x8xf32>, vector<64x8xf32>, vector<64x8xf32>, vector<64x8xf32>, vector<64x8xf32>, vector<64x8xf32>, vector<64x8xf32> -> vector<64x72xf32>
    %70 = tpu.concatenate %37, %69 in 0 : vector<64x72xf32>, vector<64x72xf32> -> vector<128x72xf32>
    %71 = arith.truncf %70 : vector<128x72xf32> to vector<128x72xbf16>
    %c0_85 = arith.constant 0 : index
    %c0_86 = arith.constant 0 : index
    %72 = vector.load %arg4[%c0_85, %c0_86] : memref<72x8xbf16, #tpu.memory_space<vmem>>, vector<72x8xbf16>
    %cst_87 = arith.constant dense<0.000000e+00> : vector<128x8xf32>
    %73 = tpu.matmul %71, %72, %cst_87 {dimension_numbers = #tpu.dot_dimension_numbers<[1], [0], [0], [1], [0, 0, 1, 1], [], []>} : vector<128x72xbf16>, vector<72x8xbf16>, vector<128x8xf32> -> vector<128x8xf32>
    %74 = arith.truncf %73 : vector<128x8xf32> to vector<128x8xbf16>
    %75 = vector.shape_cast %74 : vector<128x8xbf16> to vector<2x64x8xbf16>
    %c0_88 = arith.constant 0 : index
    %c0_89 = arith.constant 0 : index
    %c0_90 = arith.constant 0 : index
    %76 = vector.load %arg5[%c0_88, %c0_89, %c0_90] : memref<2x64x8xbf16, #tpu.memory_space<vmem>>, vector<2x64x8xbf16>
    tpu.vector_store %arg5[%c0_88, %c0_89, %c0_90], %75 {strides = array<i32>} : memref<2x64x8xbf16, #tpu.memory_space<vmem>>, vector<2x64x8xbf16>,
    %77 = arith.extf %74 : vector<128x8xbf16> to vector<128x8xf32>
    %cst_91 = arith.constant dense<0.000000e+00> : vector<8xf32>
    %78 = vector.multi_reduction <add>, %77, %cst_91 [0] : vector<128x8xf32> to vector<8xf32>
    %79 = vector.shape_cast %78 : vector<8xf32> to vector<1x8xf32>
    %cst_92 = arith.constant 7.812500e-03 : f32
    %80 = vector.broadcast %cst_92 : f32 to vector<1x8xf32>
    %81 = arith.mulf %79, %80 : vector<1x8xf32>
    %82 = vector.broadcast %81 : vector<1x8xf32> to vector<128x8xf32>
    %83 = arith.subf %77, %82 : vector<128x8xf32>
    %84 = arith.mulf %83, %83 : vector<128x8xf32>
    %cst_93 = arith.constant dense<0.000000e+00> : vector<8xf32>
    %85 = vector.multi_reduction <add>, %84, %cst_93 [0] : vector<128x8xf32> to vector<8xf32>
    %86 = vector.shape_cast %85 : vector<8xf32> to vector<1x8xf32>
    %87 = tpu.concatenate %79, %86 in 0 : vector<1x8xf32>, vector<1x8xf32> -> vector<2x8xf32>
    %c0_94 = arith.constant 0 : index
    %c0_95 = arith.constant 0 : index
    %c0_96 = arith.constant 0 : index
    %88 = vector.load %arg6[%c0_94, %c0_95, %c0_96] : memref<1x2x8xf32, #tpu.memory_space<vmem>>, vector<1x2x8xf32>
    %89 = vector.shape_cast %88 : vector<1x2x8xf32> to vector<2x8xf32>
    %90 = vector.shape_cast %87 : vector<2x8xf32> to vector<1x2x8xf32>
    tpu.vector_store %arg6[%c0_94, %c0_95, %c0_96], %90 {strides = array<i32>} : memref<1x2x8xf32, #tpu.memory_space<vmem>>, vector<1x2x8xf32>,
    return
  }
  func.func @transform_0(%arg0: i32) -> (i32, i32, i32) {
    %c0_i32 = arith.constant 0 : i32
    %c0_i32_0 = arith.constant 0 : i32
    %c0_i32_1 = arith.constant 0 : i32
    return %arg0, %c0_i32, %c0_i32_0 : i32, i32, i32
  }
  func.func @transform_1(%arg0: i32) -> (i32, i32) {
    %c0_i32 = arith.constant 0 : i32
    %c0_i32_0 = arith.constant 0 : i32
    %c0_i32_1 = arith.constant 0 : i32
    return %c0_i32, %c0_i32_0 : i32, i32
  }
  func.func @transform_2(%arg0: i32) -> (i32, i32) {
    %c0_i32 = arith.constant 0 : i32
    %c0_i32_0 = arith.constant 0 : i32
    %c0_i32_1 = arith.constant 0 : i32
    return %c0_i32, %c0_i32_0 : i32, i32
  }
  func.func @transform_3(%arg0: i32) -> (i32, i32) {
    %c0_i32 = arith.constant 0 : i32
    %c0_i32_0 = arith.constant 0 : i32
    %c0_i32_1 = arith.constant 0 : i32
    return %c0_i32, %c0_i32_0 : i32, i32
  }
  func.func @transform_4(%arg0: i32) -> (i32, i32, i32) {
    %c0_i32 = arith.constant 0 : i32
    %c0_i32_0 = arith.constant 0 : i32
    %c0_i32_1 = arith.constant 0 : i32
    return %arg0, %c0_i32, %c0_i32_0 : i32, i32, i32
  }
  func.func @transform_5(%arg0: i32) -> (i32, i32, i32) {
    %c0_i32 = arith.constant 0 : i32
    %c0_i32_0 = arith.constant 0 : i32
    %c0_i32_1 = arith.constant 0 : i32
    return %arg0, %c0_i32, %c0_i32_0 : i32, i32, i32
  }
}

module attributes {stable_mosaic.version = 11 : i64} {
  func.func @_k3_kernel(%arg0: i32, %arg1: memref<2x64x8xbf16, #tpu.memory_space<vmem>>, %arg2: memref<1x8xf32, #tpu.memory_space<vmem>>, %arg3: memref<1x8xf32, #tpu.memory_space<vmem>>, %arg4: memref<2x64x8xbf16, #tpu.memory_space<vmem>>, %arg5: memref<1x8xf32, #tpu.memory_space<vmem>>, %arg6: memref<1x8xf32, #tpu.memory_space<vmem>>, %arg7: memref<2x64x8xf32, #tpu.memory_space<vmem>>) attributes {dimension_semantics = [#tpu.dimension_semantics<parallel>], iteration_bounds = array<i64: 1>, scalar_prefetch = 0 : i64, scratch_operands = 0 : i64, tpu.core_type = #tpu.core_type<tc>, window_params = [{transform_indices = @transform_0, window_bounds = array<i64: 2, 64, 8>}, {pipeline_mode = #tpu.pipeline_mode<synchronous>, transform_indices = @transform_1, window_bounds = array<i64: 1, 8>}, {pipeline_mode = #tpu.pipeline_mode<synchronous>, transform_indices = @transform_2, window_bounds = array<i64: 1, 8>}, {transform_indices = @transform_3, window_bounds = array<i64: 2, 64, 8>}, {pipeline_mode = #tpu.pipeline_mode<synchronous>, transform_indices = @transform_4, window_bounds = array<i64: 1, 8>}, {pipeline_mode = #tpu.pipeline_mode<synchronous>, transform_indices = @transform_5, window_bounds = array<i64: 1, 8>}, {transform_indices = @transform_6, window_bounds = array<i64: 2, 64, 8>}]} {
    %c0 = arith.constant 0 : index
    %c0_0 = arith.constant 0 : index
    %c0_1 = arith.constant 0 : index
    %0 = vector.load %arg1[%c0, %c0_0, %c0_1] : memref<2x64x8xbf16, #tpu.memory_space<vmem>>, vector<2x64x8xbf16>
    %1 = arith.extf %0 : vector<2x64x8xbf16> to vector<2x64x8xf32>
    %c0_2 = arith.constant 0 : index
    %c0_3 = arith.constant 0 : index
    %2 = vector.load %arg2[%c0_2, %c0_3] : memref<1x8xf32, #tpu.memory_space<vmem>>, vector<1x8xf32>
    %3 = vector.shape_cast %2 : vector<1x8xf32> to vector<1x1x8xf32>
    %4 = vector.broadcast %3 : vector<1x1x8xf32> to vector<2x64x8xf32>
    %5 = arith.mulf %1, %4 : vector<2x64x8xf32>
    %c0_4 = arith.constant 0 : index
    %c0_5 = arith.constant 0 : index
    %6 = vector.load %arg3[%c0_4, %c0_5] : memref<1x8xf32, #tpu.memory_space<vmem>>, vector<1x8xf32>
    %7 = vector.shape_cast %6 : vector<1x8xf32> to vector<1x1x8xf32>
    %8 = vector.broadcast %7 : vector<1x1x8xf32> to vector<2x64x8xf32>
    %9 = arith.addf %5, %8 : vector<2x64x8xf32>
    %c0_6 = arith.constant 0 : index
    %c0_7 = arith.constant 0 : index
    %c0_8 = arith.constant 0 : index
    %10 = vector.load %arg4[%c0_6, %c0_7, %c0_8] : memref<2x64x8xbf16, #tpu.memory_space<vmem>>, vector<2x64x8xbf16>
    %11 = arith.extf %10 : vector<2x64x8xbf16> to vector<2x64x8xf32>
    %c0_9 = arith.constant 0 : index
    %c0_10 = arith.constant 0 : index
    %12 = vector.load %arg5[%c0_9, %c0_10] : memref<1x8xf32, #tpu.memory_space<vmem>>, vector<1x8xf32>
    %13 = vector.shape_cast %12 : vector<1x8xf32> to vector<1x1x8xf32>
    %14 = vector.broadcast %13 : vector<1x1x8xf32> to vector<2x64x8xf32>
    %15 = arith.mulf %11, %14 : vector<2x64x8xf32>
    %c0_11 = arith.constant 0 : index
    %c0_12 = arith.constant 0 : index
    %16 = vector.load %arg6[%c0_11, %c0_12] : memref<1x8xf32, #tpu.memory_space<vmem>>, vector<1x8xf32>
    %17 = vector.shape_cast %16 : vector<1x8xf32> to vector<1x1x8xf32>
    %18 = vector.broadcast %17 : vector<1x1x8xf32> to vector<2x64x8xf32>
    %19 = arith.addf %15, %18 : vector<2x64x8xf32>
    %20 = arith.addf %9, %19 : vector<2x64x8xf32>
    %cst = arith.constant 0.000000e+00 : f32
    %21 = vector.broadcast %cst : f32 to vector<2x64x8xf32>
    %22 = arith.maximumf %20, %21 : vector<2x64x8xf32>
    %c0_13 = arith.constant 0 : index
    %c0_14 = arith.constant 0 : index
    %c0_15 = arith.constant 0 : index
    %23 = vector.load %arg7[%c0_13, %c0_14, %c0_15] : memref<2x64x8xf32, #tpu.memory_space<vmem>>, vector<2x64x8xf32>
    tpu.vector_store %arg7[%c0_13, %c0_14, %c0_15], %22 {strides = array<i32>} : memref<2x64x8xf32, #tpu.memory_space<vmem>>, vector<2x64x8xf32>,
    return
  }
  func.func @transform_0(%arg0: i32) -> (i32, i32, i32) {
    %c0_i32 = arith.constant 0 : i32
    %c0_i32_0 = arith.constant 0 : i32
    %c0_i32_1 = arith.constant 0 : i32
    return %arg0, %c0_i32, %c0_i32_0 : i32, i32, i32
  }
  func.func @transform_1(%arg0: i32) -> (i32, i32) {
    %c0_i32 = arith.constant 0 : i32
    %c0_i32_0 = arith.constant 0 : i32
    %c0_i32_1 = arith.constant 0 : i32
    return %c0_i32, %c0_i32_0 : i32, i32
  }
  func.func @transform_2(%arg0: i32) -> (i32, i32) {
    %c0_i32 = arith.constant 0 : i32
    %c0_i32_0 = arith.constant 0 : i32
    %c0_i32_1 = arith.constant 0 : i32
    return %c0_i32, %c0_i32_0 : i32, i32
  }
  func.func @transform_3(%arg0: i32) -> (i32, i32, i32) {
    %c0_i32 = arith.constant 0 : i32
    %c0_i32_0 = arith.constant 0 : i32
    %c0_i32_1 = arith.constant 0 : i32
    return %arg0, %c0_i32, %c0_i32_0 : i32, i32, i32
  }
  func.func @transform_4(%arg0: i32) -> (i32, i32) {
    %c0_i32 = arith.constant 0 : i32
    %c0_i32_0 = arith.constant 0 : i32
    %c0_i32_1 = arith.constant 0 : i32
    return %c0_i32, %c0_i32_0 : i32, i32
  }
  func.func @transform_5(%arg0: i32) -> (i32, i32) {
    %c0_i32 = arith.constant 0 : i32
    %c0_i32_0 = arith.constant 0 : i32
    %c0_i32_1 = arith.constant 0 : i32
    return %c0_i32, %c0_i32_0 : i32, i32
  }
  func.func @transform_6(%arg0: i32) -> (i32, i32, i32) {
    %c0_i32 = arith.constant 0 : i32
    %c0_i32_0 = arith.constant 0 : i32
    %c0_i32_1 = arith.constant 0 : i32
    return %arg0, %c0_i32, %c0_i32_0 : i32, i32, i32
  }
}

</mosaic_0001>

<bundles_post_ra>
// kernel: basic_block_forward.5
= control target key start
LH: loop header
LB: loop body
LE: loop exit
PB: predicated region body
PF: predicated region fallthrough
CT: control target
= control target key end

     0   :  { %vm200_vm0 = vcmask 64512   ;;  %s535_s0 = inlined_call_operand.vmem [shape: bf16[2,64,8], index: 0, kind: input, shape index: {}]   ;;  %s536_s1 = inlined_call_operand.vmem [shape: f32[1,8], index: 1, kind: input, shape index: {}]   ;;  %s537_s2 = inlined_call_operand.vmem [shape: f32[1,8], index: 2, kind: input, shape index: {}]   ;;  %s538_s3 = inlined_call_operand.vmem [shape: bf16[2,64,8], index: 3, kind: input, shape index: {}]   ;;  %s539_s4 = inlined_call_operand.vmem [shape: f32[1,8], index: 4, kind: input, shape index: {}]   ;;  %s540_s5 = inlined_call_operand.vmem [shape: f32[1,8], index: 5, kind: input, shape index: {}]   ;;  %s541_s6 = inlined_call_operand.hbm [shape: f32[2,64,8], index: 6, kind: output, shape index: {}]  }
   0x1   :  { %v236_v0 = vld [vmem:[%s535_s0] sm:$0xff]   ;;  %v299_v12 = vld [vmem:[%s535_s0 + $0x8] sm:$0xff]   ;;  %v300_v18 = vld [vmem:[%s535_s0 + $0x10] sm:$0xff]  }
   0x2   :  { %v390_v1 = vld [vmem:[%s536_s1] ss:$0 sm:$0xff]  ;;  %v237_v2 = vunpack.c.l.bf16 %v236_v0  ;;  %v238_v5 = vunpack.c.h.bf16 %v236_v0  ;;  %v306_v13 = vld [vmem:[%s538_s3 + $0x8] sm:$0xff]   ;;  %v241_v16 = vunpack.c.l.bf16 %v299_v12  ;;  %v307_v19 = vld [vmem:[%s538_s3 + $0x10] sm:$0xff]   ;;  %v242_v22 = vunpack.c.h.bf16 %v299_v12 }
   0x3   :  { %v395_v3 = vld [vmem:[%s537_s2] ss:$0 sm:$0xff]  ;;  %v273_v17 = vunpack.c.l.bf16 %v306_v13  ;;  %v274_v23 = vunpack.c.h.bf16 %v306_v13  ;;  %v245_v30 = vunpack.c.l.bf16 %v300_v18  ;;  %v277_v31 = vunpack.c.l.bf16 %v307_v19 }
   0x4   :  { %v268_v4 = vld [vmem:[%s538_s3] sm:$0xff]   ;;  %v60_v9 = vmul.f32 %v390_v1, %v237_v2  ;;  %v61_v11 = vmul.f32 %v390_v1, %v238_v5  ;;  %v62_v26 = vmul.f32 %v390_v1, %v241_v16  ;;  %v63_v28 = vmul.f32 %v390_v1, %v242_v22 }
   0x5   :  { %v269_v6 = vunpack.c.l.bf16 %v268_v4  ;;  %v403_v7 = vld [vmem:[%s539_s4] ss:$0 sm:$0xff]  ;;  %v270_v8 = vunpack.c.h.bf16 %v268_v4 }
   0x6   :  { %v409_v10 = vld [vmem:[%s540_s5] ss:$0 sm:$0xff]  ;;  %v80_v20 = vadd.f32 %v395_v3, %v60_v9  ;;  %v81_v21 = vadd.f32 %v395_v3, %v61_v11  ;;  %v134_v27 = vmul.f32 %v403_v7, %v273_v17  ;;  %v135_v29 = vmul.f32 %v403_v7, %v274_v23 }
   0x7   :  { %v132_v14 = vmul.f32 %v403_v7, %v269_v6  ;;  %v133_v15 = vmul.f32 %v403_v7, %v270_v8  ;;  %v82_v34 = vadd.f32 %v395_v3, %v62_v26 }
   0x8   :  { %v154_v35 = vadd.f32 %v409_v10, %v134_v27 }
   0x9   :  { %v152_v24 = vadd.f32 %v409_v10, %v132_v14  ;;  %v153_v25 = vadd.f32 %v409_v10, %v133_v15 }
   0xb   :  { %v168_v32 = vadd.f32 %v152_v24, %v80_v20  ;;  %v169_v33 = vadd.f32 %v153_v25, %v81_v21 }
   0xc   :  { %11 = vsyncpa [#allocation3], 0  ;;  %v83_v36 = vadd.f32 %v395_v3, %v63_v28  ;;  %v155_v37 = vadd.f32 %v409_v10, %v135_v29  ;;  %v64_v38 = vmul.f32 %v390_v1, %v245_v30  ;;  %v136_v39 = vmul.f32 %v403_v7, %v277_v31  ;;  %v301_v40 = vld [vmem:[%s535_s0 + $0x18] sm:$0xff]   ;;  %v302_v54 = vld [vmem:[%s535_s0 + $0x20] sm:$0xff]   ;;  %s223_s9 = sshll.u32 %s541_s6, 4  ;;  %s347_s10 = smov 128   ;;  %s224_s9 = int_to_ptr.hbm [resolvable:$true] %s223_s9 }
   0xd   :  { %v308_v41 = vld [vmem:[%s538_s3 + $0x18] sm:$0xff]   ;;  %v184_v42 = vmax.f32 %v168_v32, 0.0  ;;  %v185_v43 = vmax.f32 %v169_v33, 0.0  ;;  %v170_v44 = vadd.f32 %v154_v35, %v82_v34  ;;  %v246_v45 = vunpack.c.h.bf16 %v300_v18  ;;  %v309_v59 = vld [vmem:[%s538_s3 + $0x20] sm:$0xff]   ;;  %v303_v12 = vld [vmem:[%s535_s0 + $0x28] sm:$0xff]   ;;  %s348_s4 = smov 8  }
   0xe   :  { %v171_v46 = vadd.f32 %v155_v37, %v83_v36  ;;  %v84_v47 = vadd.f32 %v395_v3, %v64_v38  ;;  %v156_v48 = vadd.f32 %v409_v10, %v136_v39  ;;  %v278_v49 = vunpack.c.h.bf16 %v307_v19  ;;  %v310_v21 = vld [vmem:[%s538_s3 + $0x28] sm:$0xff]   ;;  %v304_v30 = vld [vmem:[%s535_s0 + $0x30] sm:$0xff]  }
   0xf   :  { %201 = vst.msk [vmem:[#allocation2] sm:$0xff] %vm200_vm0, %v184_v42  ;;  %v186_v50 = vmax.f32 %v170_v44, 0.0  ;;  %v65_v51 = vmul.f32 %v390_v1, %v246_v45  ;;  %v249_v52 = vunpack.c.l.bf16 %v301_v40  ;;  %v281_v53 = vunpack.c.l.bf16 %v308_v41  ;;  %v311_v35 = vld [vmem:[%s538_s3 + $0x30] sm:$0xff]  }
  0x10   :  { %202 = vst.msk [vmem:[#allocation2 + $0x8] sm:$0xff] %vm200_vm0, %v185_v43  ;;  %v187_v55 = vmax.f32 %v171_v46, 0.0  ;;  %v172_v56 = vadd.f32 %v156_v48, %v84_v47  ;;  %v137_v57 = vmul.f32 %v403_v7, %v278_v49  ;;  %v250_v58 = vunpack.c.h.bf16 %v301_v40  ;;  %v305_v48 = vld [vmem:[%s535_s0 + $0x38] sm:$0xff]   ;;  %s346_s0 = smov [#allocation2]  }
  0x11   :  { %203 = vst.msk [vmem:[#allocation2 + $0x10] sm:$0xff] %vm200_vm0, %v186_v50  ;;  %v85_v60 = vadd.f32 %v395_v3, %v65_v51  ;;  %v66_v61 = vmul.f32 %v390_v1, %v249_v52  ;;  %v138_v62 = vmul.f32 %v403_v7, %v281_v53  ;;  %v282_v63 = vunpack.c.h.bf16 %v308_v41  ;;  %v312_v53 = vld [vmem:[%s538_s3 + $0x38] sm:$0xff]   ;;  %s221_s3 = sshll.u32 %s346_s0, 4  ;;  %s222_s3 = int_to_ptr.vmem [resolvable:$true] %s221_s3 }
  0x12   :  { %204 = vst.msk [vmem:[#allocation2 + $0x18] sm:$0xff] %vm200_vm0, %v187_v55  ;;  %v188_v0 = vmax.f32 %v172_v56, 0.0  ;;  %v157_v2 = vadd.f32 %v409_v10, %v137_v57  ;;  %v67_v4 = vmul.f32 %v390_v1, %v250_v58  ;;  %v253_v5 = vunpack.c.l.bf16 %v302_v54 }
  0x13   :  { %v86_v6 = vadd.f32 %v395_v3, %v66_v61  ;;  %v158_v8 = vadd.f32 %v409_v10, %v138_v62  ;;  %v139_v9 = vmul.f32 %v403_v7, %v282_v63  ;;  %v285_v11 = vunpack.c.l.bf16 %v309_v59 }
  0x14   :  { %205 = vst.msk [vmem:[#allocation2 + $0x20] sm:$0xff] %vm200_vm0, %v188_v0  ;;  %v173_v13 = vadd.f32 %v157_v2, %v85_v60  ;;  %v87_v14 = vadd.f32 %v395_v3, %v67_v4  ;;  %v68_v15 = vmul.f32 %v390_v1, %v253_v5  ;;  %v254_v16 = vunpack.c.h.bf16 %v302_v54 }
  0x15   :  { %v174_v17 = vadd.f32 %v158_v8, %v86_v6  ;;  %v159_v18 = vadd.f32 %v409_v10, %v139_v9  ;;  %v140_v19 = vmul.f32 %v403_v7, %v285_v11  ;;  %v286_v20 = vunpack.c.h.bf16 %v309_v59 }
  0x16   :  { %v189_v22 = vmax.f32 %v173_v13, 0.0  ;;  %v88_v23 = vadd.f32 %v395_v3, %v68_v15  ;;  %v69_v24 = vmul.f32 %v390_v1, %v254_v16  ;;  %v257_v25 = vunpack.c.l.bf16 %v303_v12 }
  0x17   :  { %v190_v26 = vmax.f32 %v174_v17, 0.0  ;;  %v175_v27 = vadd.f32 %v159_v18, %v87_v14  ;;  %v160_v28 = vadd.f32 %v409_v10, %v140_v19  ;;  %v141_v29 = vmul.f32 %v403_v7, %v286_v20 }
  0x18   :  { %206 = vst.msk [vmem:[#allocation2 + $0x28] sm:$0xff] %vm200_vm0, %v189_v22  ;;  %v89_v31 = vadd.f32 %v395_v3, %v69_v24  ;;  %v70_v32 = vmul.f32 %v390_v1, %v257_v25  ;;  %v289_v33 = vunpack.c.l.bf16 %v310_v21  ;;  %v258_v34 = vunpack.c.h.bf16 %v303_v12 }
  0x19   :  { %207 = vst.msk [vmem:[#allocation2 + $0x30] sm:$0xff] %vm200_vm0, %v190_v26  ;;  %v191_v36 = vmax.f32 %v175_v27, 0.0  ;;  %v176_v37 = vadd.f32 %v160_v28, %v88_v23  ;;  %v161_v38 = vadd.f32 %v409_v10, %v141_v29  ;;  %v290_v39 = vunpack.c.h.bf16 %v310_v21 }
  0x1a   :  { %v90_v40 = vadd.f32 %v395_v3, %v70_v32  ;;  %v142_v41 = vmul.f32 %v403_v7, %v289_v33  ;;  %v71_v42 = vmul.f32 %v390_v1, %v258_v34  ;;  %v261_v43 = vunpack.c.l.bf16 %v304_v30 }
  0x1b   :  { %208 = vst.msk [vmem:[#allocation2 + $0x38] sm:$0xff] %vm200_vm0, %v191_v36  ;;  %v192_v44 = vmax.f32 %v176_v37, 0.0  ;;  %v177_v45 = vadd.f32 %v161_v38, %v89_v31  ;;  %v143_v46 = vmul.f32 %v403_v7, %v290_v39  ;;  %v293_v47 = vunpack.c.l.bf16 %v311_v35 }
  0x1c   :  { %v162_v49 = vadd.f32 %v409_v10, %v142_v41  ;;  %v91_v50 = vadd.f32 %v395_v3, %v71_v42  ;;  %v72_v51 = vmul.f32 %v390_v1, %v261_v43  ;;  %v262_v52 = vunpack.c.h.bf16 %v304_v30 }
  0x1d   :  { %209 = vst.msk [vmem:[#allocation2 + $0x40] sm:$0xff] %vm200_vm0, %v192_v44  ;;  %v193_v54 = vmax.f32 %v177_v45, 0.0  ;;  %v163_v55 = vadd.f32 %v409_v10, %v143_v46  ;;  %v144_v56 = vmul.f32 %v403_v7, %v293_v47  ;;  %v294_v57 = vunpack.c.h.bf16 %v311_v35 }
  0x1e   :  { %v178_v58 = vadd.f32 %v162_v49, %v90_v40  ;;  %v92_v59 = vadd.f32 %v395_v3, %v72_v51  ;;  %v73_v60 = vmul.f32 %v390_v1, %v262_v52  ;;  %v265_v61 = vunpack.c.l.bf16 %v305_v48 }
  0x1f   :  { %210 = vst.msk [vmem:[#allocation2 + $0x48] sm:$0xff] %vm200_vm0, %v193_v54  ;;  %v179_v62 = vadd.f32 %v163_v55, %v91_v50  ;;  %v164_v63 = vadd.f32 %v409_v10, %v144_v56  ;;  %v145_v0 = vmul.f32 %v403_v7, %v294_v57  ;;  %v297_v2 = vunpack.c.l.bf16 %v312_v53 }
  0x20   :  { %v194_v4 = vmax.f32 %v178_v58, 0.0  ;;  %v93_v5 = vadd.f32 %v395_v3, %v73_v60  ;;  %v74_v6 = vmul.f32 %v390_v1, %v265_v61  ;;  %v266_v8 = vunpack.c.h.bf16 %v305_v48 }
  0x21   :  { %v195_v9 = vmax.f32 %v179_v62, 0.0  ;;  %v180_v11 = vadd.f32 %v164_v63, %v92_v59  ;;  %v165_v12 = vadd.f32 %v409_v10, %v145_v0  ;;  %v146_v13 = vmul.f32 %v403_v7, %v297_v2 }
  0x22   :  { %211 = vst.msk [vmem:[#allocation2 + $0x50] sm:$0xff] %vm200_vm0, %v194_v4  ;;  %v94_v14 = vadd.f32 %v395_v3, %v74_v6  ;;  %v75_v15 = vmul.f32 %v390_v1, %v266_v8  ;;  %v298_v16 = vunpack.c.h.bf16 %v312_v53 }
  0x23   :  { %212 = vst.msk [vmem:[#allocation2 + $0x58] sm:$0xff] %vm200_vm0, %v195_v9  ;;  %v196_v17 = vmax.f32 %v180_v11, 0.0  ;;  %v181_v18 = vadd.f32 %v165_v12, %v93_v5  ;;  %v166_v19 = vadd.f32 %v409_v10, %v146_v13 }
  0x24   :  { %v95_v20 = vadd.f32 %v395_v3, %v75_v15  ;;  %v147_v21 = vmul.f32 %v403_v7, %v298_v16 }
  0x25   :  { %213 = vst.msk [vmem:[#allocation2 + $0x60] sm:$0xff] %vm200_vm0, %v196_v17  ;;  %v197_v22 = vmax.f32 %v181_v18, 0.0  ;;  %v182_v23 = vadd.f32 %v166_v19, %v94_v14 }
  0x26   :  { %v167_v24 = vadd.f32 %v409_v10, %v147_v21 }
  0x27   :  { %214 = vst.msk [vmem:[#allocation2 + $0x68] sm:$0xff] %vm200_vm0, %v197_v22  ;;  %v198_v1 = vmax.f32 %v182_v23, 0.0 }
  0x28   :  { %v183_v25 = vadd.f32 %v167_v24, %v95_v20 }
  0x29   :  { %215 = vst.msk [vmem:[#allocation2 + $0x70] sm:$0xff] %vm200_vm0, %v198_v1 }
  0x2a   :  { %v199_v3 = vmax.f32 %v183_v25, 0.0 }
  0x2c   :  { %216 = vst.msk [vmem:[#allocation2 + $0x78] sm:$0xff] %vm200_vm0, %v199_v3 }
  0x2d   :  { %229 = dma.vmem_to_hbm [thread:$0]  %s222_s3, 2048, %s224_s9, [#allocation3], %s347_s10, %s347_s10, %s348_s4  }
  0x2e   :  { %344 = dma.done.wait [#allocation3], 2048  }
  0x2f   :  { %345 = vsyncadd [#allocation3], 4294965248 }
  0x30   :  { %234 = vsyncpa [#allocation3], 1 }

// kernel: basic_block_forward.3
= control target key start
LH: loop header
LB: loop body
LE: loop exit
PB: predicated region body
PF: predicated region fallthrough
CT: control target
= control target key end

     0   :  { %s1832_s9 = smov 8   ;;  %s1833_s12 = smov 4   ;;  %vm883_vm0 = vcmask 1041408   ;;  %vm352_vm1 = vcmask 31744   ;;  %vm361_vm2 = vcmask 64512   ;;  %vm370_vm3 = vcmask 97280   ;;  %s3059_s0 = inlined_call_operand.vmem [shape: f32[2,36,9,4], index: 0, kind: input, shape index: {}]   ;;  %s3060_s2 = inlined_call_operand.vmem [shape: bf16[4,8], index: 2, kind: input, shape index: {}]   ;;  %s3061_s1 = inlined_call_operand.vmem [shape: bf16[36,8], index: 1, kind: input, shape index: {}]   ;;  %s3062_s4 = inlined_call_operand.vmem [shape: bf16[2,64,8], index: 4, kind: output, shape index: {1}]   ;;  %s3063_s3 = inlined_call_operand.vmem [shape: bf16[2,64,8], index: 3, kind: output, shape index: {0}]   ;;  %s3064_s6 = inlined_call_operand.vmem [shape: f32[1,2,8], index: 6, kind: output, shape index: {3}]   ;;  %s3065_s5 = inlined_call_operand.vmem [shape: f32[1,2,8], index: 5, kind: output, shape index: {2}]  }
   0x1   :  { %v36_v0 = vld [vmem:[%s3059_s0 + $0x1] sm:$0xff]  ;;  %v1881_v1 = vld [vmem:[%s3059_s0 + $0x11] sm:$0xff]  ;;  %s1834_s13 = smov 12   ;;  %s1835_s17 = smov 24   ;;  %vm379_vm4 = vcmask 130048   ;;  %vm388_vm5 = vcmask 162816  }
   0x2   :  { %v1886_v2 = vld [vmem:[%s3059_s0 + $0xd0] sm:$0xff]  ;;  %v1532_v3 = vpack.i.bf16 %v1881_v1, %v36_v0  ;;  %v1892_v4 = vld [vmem:[%s3059_s0 + $0xe0] sm:$0xff]  ;;  %s1836_s18 = smov 20   ;;  %s1837_s19 = smov 16   ;;  %vm397_vm6 = vcmask 195584   ;;  %vm406_vm7 = vcmask 228352  }
   0x3   :  { %v1346_v5 = vld [vmem:[%s3059_s0 + $0x90] sm:$0xff]  ;;  %v1900_v6 = vld [vmem:[%s3059_s0 + $0xa0] sm:$0xff]  ;;  %v1522_v7 = vpack.i.bf16 %v1892_v4, %v1886_v2  ;;  %s1838_s26 = smov 32   ;;  %s1839_s27 = smov 28   ;;  %vm415_vm8 = vcmask 261120   ;;  %vm858_vm9 = vcmask 293888  }
   0x4   :  { %v1512_v8 = vpack.i.bf16 %v1900_v6, %v1346_v5  ;;  %1533 = vrot.lane.b32.xlu2 %v1532_v3, %s1832_s9  ;;  %v1909_v9 = vld [vmem:[%s3059_s0 + $0x21] sm:$0xff]  ;;  %v1916_v10 = vld [vmem:[%s3059_s0 + $0x31] sm:$0xff]  ;;  %vm952_vm10 = vcmask 60416   ;;  %vm1092_vm11 = vcmask 1040384   ;;  %vm1094_vm12 = vcmask 58368  }
   0x5   :  { %1523 = vrot.lane.b32.xlu1 %v1522_v7, %s1833_s12  ;;  %v1921_v11 = vld [vmem:[%s3059_s0 + $0xf0] sm:$0xff]  ;;  %v1926_v12 = vld [vmem:[%s3059_s0 + $0x100] sm:$0xff]  ;;  %v1537_v15 = vpack.i.bf16 %v1916_v10, %v1909_v9  ;;  %v1592_v48 = vpack.i.bf16 %v1909_v9, %v1881_v1 }
   0x6   :  { %1513 = vrot.lane.b32.xlu0 %v1512_v8, %s1833_s12  ;;  %v1348_v13 = vld [vmem:[%s3059_s0 + $0xb0] sm:$0xff]  ;;  %v1934_v14 = vld [vmem:[%s3059_s0 + $0xc0] sm:$0xff]  ;;  %v1527_v16 = vpack.i.bf16 %v1926_v12, %v1921_v11 }
   0x7   :  { %v1517_v17 = vpack.i.bf16 %v1934_v14, %v1348_v13  ;;  %v1354_v18 = vld [vmem:[%s3059_s0 + $0x120] sm:$0xff]  ;;  %v1355_v19 = vld [vmem:[%s3059_s0 + $0x130] sm:$0xff]  ;;  %v1587_v49 = vpack.i.bf16 %v1348_v13, %v1900_v6  ;;  %v1652_v51 = vpack.i.bf16 %v1886_v2, %v1934_v14 }
   0x8   :  { %v1953_v20 = vld [vmem:[%s3059_s0 + $0x61] sm:$0xff]  ;;  %v1958_v21 = vld [vmem:[%s3059_s0 + $0x71] sm:$0xff]  ;;  %v1552_v24 = vpack.i.bf16 %v1355_v19, %v1354_v18 }
   0x9   :  { %v1963_v22 = vld [vmem:[%s3059_s0 + $0x41] sm:$0xff]  ;;  %v1968_v23 = vld [vmem:[%s3059_s0 + $0x51] sm:$0xff]  ;;  %v1547_v25 = vpack.i.bf16 %v1958_v21, %v1953_v20 }
   0xa   :  { %v1542_v26 = vpack.i.bf16 %v1968_v23, %v1963_v22  ;;  %v1360_v27 = vld [vmem:[%s3059_s0 + $0x180] sm:$0xff]  ;;  %v1361_v28 = vld [vmem:[%s3059_s0 + $0x190] sm:$0xff]  ;;  %v1657_v19 = vpack.i.bf16 %v1963_v22, %v1916_v10 }
   0xb   :  { %v1358_v29 = vld [vmem:[%s3059_s0 + $0x160] sm:$0xff]  ;;  %v1359_v30 = vld [vmem:[%s3059_s0 + $0x170] sm:$0xff]  ;;  %v1567_v33 = vpack.i.bf16 %v1361_v28, %v1360_v27 }
   0xc   :  { %1538 = vrot.lane.b32.xlu2 %v1537_v15, %s1832_s9  ;;  %v1356_v31 = vld [vmem:[%s3059_s0 + $0x140] sm:$0xff]  ;;  %v1357_v32 = vld [vmem:[%s3059_s0 + $0x150] sm:$0xff]  ;;  %v1562_v34 = vpack.i.bf16 %v1359_v30, %v1358_v29 }
   0xd   :  { %1528 = vrot.lane.b32.xlu1 %v1527_v16, %s1833_s12  ;;  %v1557_v35 = vpack.i.bf16 %v1357_v32, %v1356_v31  ;;  %v1999_v36 = vld [vmem:[%s3059_s0 + $0x10] sm:$0xff]  ;;  %v2006_v37 = vld [vmem:[%s3059_s0 + $0x20] sm:$0xff] }
   0xe   :  { %1518 = vrot.lane.b32.xlu0 %v1517_v17, %s1833_s12  ;;  %v1370_v38 = vld [vmem:[%s3059_s0 + $0x121] sm:$0xff]  ;;  %v1371_v39 = vld [vmem:[%s3059_s0 + $0x131] sm:$0xff]  ;;  %v1582_v42 = vpack.i.bf16 %v2006_v37, %v1999_v36 }
   0xf   :  { %v2017_v40 = vld [vmem:[%s3059_s0 + $0x1b0] sm:$0xff]  ;;  %v2022_v41 = vld [vmem:[%s3059_s0 + $0x1c0] sm:$0xff]  ;;  %v1577_v43 = vpack.i.bf16 %v1371_v39, %v1370_v38 }
  0x10   :  { %v1572_v44 = vpack.i.bf16 %v2022_v41, %v2017_v40  ;;  %v1410_v45 = vld [vmem:[%s3059_s0 + $0x2d0] sm:$0xff]  ;;  %v1411_v46 = vld [vmem:[%s3059_s0 + $0x2e0] sm:$0xff]  ;;  %v830_v28 = vpack.c.bf16 %v2022_v41, %v2017_v40 }
  0x11   :  { %v1597_v47 = vpack.i.bf16 %v1411_v46, %v1410_v45  ;;  %v2044_v50 = vld [vmem:[%s3059_s0 + $0x3f0] sm:$0xff]  ;;  %v2053_v52 = vld [vmem:[%s3059_s0 + $0x400] sm:$0xff] }
  0x12   :  { %v1426_v53 = vld [vmem:[%s3059_s0 + $0x360] sm:$0xff]  ;;  %v1427_v54 = vld [vmem:[%s3059_s0 + $0x370] sm:$0xff]  ;;  %v1612_v57 = vpack.i.bf16 %v2053_v52, %v2044_v50 }
  0x13   :  { %v1418_v55 = vld [vmem:[%s3059_s0 + $0x241] sm:$0xff]  ;;  %v1419_v56 = vld [vmem:[%s3059_s0 + $0x251] sm:$0xff]  ;;  %v1607_v58 = vpack.i.bf16 %v1427_v54, %v1426_v53 }
  0x14   :  { %1553 = vrot.lane.b32.xlu2 %v1552_v24, %s1834_s13  ;;  %v1602_v59 = vpack.i.bf16 %v1419_v56, %v1418_v55  ;;  %v1459_v60 = vld [vmem:[%s3059_s0 + $0x2f0] sm:$0xff]  ;;  %v2083_v62 = vld [vmem:[%s3059_s0 + $0x260] sm:$0xff] }
  0x15   :  { %1548 = vrot.lane.b32.xlu1 %v1547_v25, %s1832_s9  ;;  %v2078_v61 = vld [vmem:[%s3059_s0 + $0x250] sm:$0xff]  ;;  %v1442_v63 = vld [vmem:[%s3059_s0 + $0x361] sm:$0xff]  ;;  %v1627_v1 = vpack.i.bf16 %v1459_v60, %v1411_v46 }
  0x16   :  { %1543 = vrot.lane.b32.xlu0 %v1542_v26, %s1832_s9  ;;  %v1443_v0 = vld [vmem:[%s3059_s0 + $0x371] sm:$0xff]  ;;  %v1622_v2 = vpack.i.bf16 %v2083_v62, %v2078_v61  ;;  %v1372_v5 = vld [vmem:[%s3059_s0 + $0x141] sm:$0xff] }
  0x17   :  { %v1617_v3 = vpack.i.bf16 %v1443_v0, %v1442_v63  ;;  %v1373_v6 = vld [vmem:[%s3059_s0 + $0x151] sm:$0xff]  ;;  %v1365_v8 = vld [vmem:[%s3059_s0 + $0x1e0] sm:$0xff] }
  0x18   :  { %v1364_v7 = vld [vmem:[%s3059_s0 + $0x1d0] sm:$0xff]  ;;  %v1467_v9 = vld [vmem:[%s3059_s0 + $0x261] sm:$0xff]  ;;  %v1642_v13 = vpack.i.bf16 %v1373_v6, %v1372_v5 }
  0x19   :  { %v1637_v14 = vpack.i.bf16 %v1365_v8, %v1364_v7  ;;  %v1632_v15 = vpack.i.bf16 %v1467_v9, %v1419_v56  ;;  %v2117_v16 = vld [vmem:[%s3059_s0 + $0x30] sm:$0xff]  ;;  %v2122_v17 = vld [vmem:[%s3059_s0 + $0x40] sm:$0xff] }
  0x1a   :  { %v1096_v18 = vld [vmem:[%s3060_s2] sm:$0x3]  ;;  %v1647_v25 = vpack.i.bf16 %v2122_v17, %v2117_v16  ;;  %v1429_v10 = vld [vmem:[%s3059_s0 + $0x390] sm:$0xff] }
  0x1b   :  { %v1122_v24 = vsel %vm883_vm0, %v1096_v18, 0  ;;  %v1428_v26 = vld [vmem:[%s3059_s0 + $0x380] sm:$0xff]  ;;  %v1421_v27 = vld [vmem:[%s3059_s0 + $0x271] sm:$0xff] }
  0x1c   :  { %1568 = vrot.lane.b32.xlu2 %v1567_v33, %s1834_s13  ;;  %1131 = vmatpush.bf16.msra.mxu1 %v1122_v24  ;;  %v1413_v22 = vld [vmem:[%s3059_s0 + $0x300] sm:$0xff]  ;;  %v1672_v29 = vpack.i.bf16 %v1429_v10, %v1428_v26  ;;  %v1667_v31 = vpack.i.bf16 %v1421_v27, %v1467_v9  ;;  %v2154_v32 = vld [vmem:[%s3059_s0 + $0x270] sm:$0xff] }
  0x1d   :  { %1563 = vrot.lane.b32.xlu1 %v1562_v34, %s1834_s13  ;;  %1503 = vmatpush.bf16.msra.mxu3 %v1122_v24  ;;  %v1662_v30 = vpack.i.bf16 %v1413_v22, %v1459_v60  ;;  %v2161_v33 = vld [vmem:[%s3059_s0 + $0x280] sm:$0xff]  ;;  %v1436_v34 = vld [vmem:[%s3059_s0 + $0x410] sm:$0xff] }
  0x1e   :  { %1558 = vrot.lane.b32.xlu0 %v1557_v35, %s1834_s13  ;;  %v1437_v35 = vld [vmem:[%s3059_s0 + $0x420] sm:$0xff]  ;;  %v1445_v39 = vld [vmem:[%s3059_s0 + $0x391] sm:$0xff]  ;;  %v1687_v40 = vpack.i.bf16 %v2161_v33, %v2154_v32 }
  0x1f   :  { %1490 = vmatmul.msk.bf16.vlgmr.msra.gmra.mxu1 %vm352_vm1, %v830_v28  ;;  %v1444_v38 = vld [vmem:[%s3059_s0 + $0x381] sm:$0xff]  ;;  %v1677_v41 = vpack.i.bf16 %v1437_v35, %v1436_v34  ;;  %v1461_v46 = vld [vmem:[%s3059_s0 + $0x310] sm:$0xff] }
  0x20   :  { %v1374_v54 = vld [vmem:[%s3059_s0 + $0x161] sm:$0xff]  ;;  %v1375_v56 = vld [vmem:[%s3059_s0 + $0x171] sm:$0xff] }
  0x21   :  { %v1707_v60 = vpack.i.bf16 %v1375_v56, %v1374_v54  ;;  %v1423_v0 = vld [vmem:[%s3059_s0 + $0x291] sm:$0xff]  ;;  %v1430_v6 = vld [vmem:[%s3059_s0 + $0x3a0] sm:$0xff] }
  0x22   :  { %v1498_v54 = vld [vmem:[%s3061_s1] sm:$0xff] }
  0x24   :  { %1583 = vrot.lane.b32.xlu2 %v1582_v42, %s1835_s17  ;;  %v1682_v42 = vpack.i.bf16 %v1445_v39, %v1444_v38  ;;  %v2282_v38 = vld [vmem:[%s3059_s0 + $0x290] sm:$0xff]  ;;  %v2287_v39 = vld [vmem:[%s3059_s0 + $0x2a0] sm:$0xff] }
  0x25   :  { %1578 = vrot.lane.b32.xlu1 %v1577_v43, %s1836_s18  ;;  %v1366_v43 = vld [vmem:[%s3059_s0 + $0x1f0] sm:$0xff] }
  0x26   :  { %1573 = vrot.lane.b32.xlu0 %v1572_v44, %s1837_s19  ;;  %v1367_v44 = vld [vmem:[%s3059_s0 + $0x200] sm:$0xff] }
  0x2c   :  { %1598 = vrot.lane.b32.xlu2 %v1597_v47, %s1833_s12  ;;  %v1469_v47 = vld [vmem:[%s3059_s0 + $0x281] sm:$0xff] }
  0x2d   :  { %1593 = vrot.lane.b32.xlu1 %v1592_v48, %s1838_s26  ;;  %v831_v48 = vpack.c.bf16 %v1365_v8, %v1364_v7  ;;  %v1697_v53 = vpack.i.bf16 %v1469_v47, %v1421_v27  ;;  %v835_v7 = vpack.c.bf16 %v1437_v35, %v1436_v34  ;;  %v1446_v8 = vld [vmem:[%s3059_s0 + $0x3a1] sm:$0xff] }
  0x2e   :  { %1588 = vrot.lane.b32.xlu0 %v1587_v49, %s1839_s27  ;;  %v1702_v49 = vpack.i.bf16 %v1367_v44, %v1366_v43  ;;  %v1499_v34 = vld [vmem:[%s3061_s1 + $0x8] sm:$0xff] }
  0x2f   :  { %1491 = vmatmul.msk.bf16.gmra.mxu1 %vm352_vm1, %v831_v48  ;;  %1495 = vmatmul.msk.bf16.vlgmr.msra.gmra.mxu3 %vm352_vm1, %v835_v7 }
  0x34   :  { %1613 = vrot.lane.b32.xlu2 %v1612_v57, %s1837_s19  ;;  %v1382_v57 = vld [vmem:[%s3059_s0 + $0x50] sm:$0xff] }
  0x35   :  { %1608 = vrot.lane.b32.xlu1 %v1607_v58, %s1834_s13  ;;  %v2212_v58 = vld [vmem:[%s3059_s0 + $0x60] sm:$0xff] }
  0x36   :  { %1603 = vrot.lane.b32.xlu0 %v1602_v59, %s1832_s9  ;;  %v1717_v59 = vpack.i.bf16 %v1921_v11, %v1892_v4  ;;  %v1712_v63 = vpack.i.bf16 %v2212_v58, %v1382_v57  ;;  %v832_v4 = vpack.c.bf16 %v1367_v44, %v1366_v43  ;;  %v1732_v11 = vpack.i.bf16 %v1423_v0, %v1469_v47  ;;  %v26_v43 = vld [vmem:[%s3059_s0 + $0x70] sm:$0xff] }
  0x3c   :  { %1628 = vrot.lane.b32.xlu2 %v1627_v1, %s1839_s27 }
  0x3d   :  { %1623 = vrot.lane.b32.xlu1 %v1622_v2, %s1835_s17  ;;  %v2228_v2 = vld [vmem:[%s3059_s0 + $0x320] sm:$0xff] }
  0x3e   :  { %1618 = vrot.lane.b32.xlu0 %v1617_v3, %s1836_s18  ;;  %v1722_v3 = vpack.i.bf16 %v1953_v20, %v1968_v23  ;;  %v1727_v5 = vpack.i.bf16 %v2228_v2, %v1461_v46  ;;  %v1447_v20 = vld [vmem:[%s3059_s0 + $0x3b1] sm:$0xff] }
  0x3f   :  { %1492 = vmatmul.msk.bf16.gmra.mxu1 %vm352_vm1, %v832_v4  ;;  %v842_v23 = vld [vmem:[%s3061_s1 + $0x10] sm:$0x3]  ;;  %v1747_v26 = vpack.i.bf16 %v1447_v20, %v1446_v8 }
  0x40   :  { %v852_v18 = vunpack.c.l.b16 %v842_v23 }
  0x42   :  { %v855_v27 = vpack.c.b16 %v852_v18, %v852_v18 }
  0x44   :  { %1643 = vrot.lane.b32.xlu2 %v1642_v13, %s1836_s18  ;;  %v1431_v13 = vld [vmem:[%s3059_s0 + $0x3b0] sm:$0xff] }
  0x45   :  { %1638 = vrot.lane.b32.xlu1 %v1637_v14, %s1837_s19  ;;  %v1438_v14 = vld [vmem:[%s3059_s0 + $0x430] sm:$0xff]  ;;  %v1737_v10 = vpack.i.bf16 %v1431_v13, %v1430_v6 }
  0x46   :  { %1633 = vrot.lane.b32.xlu0 %v1632_v15, %s1838_s26  ;;  %v1439_v15 = vld [vmem:[%s3059_s0 + $0x440] sm:$0xff] }
  0x4c   :  { %1658 = vrot.lane.b32.xlu2 %v1657_v19, %s1838_s26 }
  0x4d   :  { %1653 = vrot.lane.b32.xlu1 %v1652_v51, %s1839_s27  ;;  %v1692_v51 = vpack.i.bf16 %v1461_v46, %v1413_v22  ;;  %v1742_v22 = vpack.i.bf16 %v1439_v15, %v1438_v14  ;;  %v2302_v46 = vld [vmem:[%s3059_s0 + $0x2a1] sm:$0xff] }
  0x4e   :  { %1648 = vrot.lane.b32.xlu0 %v1647_v25, %s1835_s17 }
  0x54   :  { %1673 = vrot.lane.b32.xlu2 %v1672_v29, %s1834_s13  ;;  %v885_v29 = vsel %vm883_vm0, %v855_v27, 0  ;;  %v1401_v27 = vld [vmem:[%s3059_s0 + $0x81] sm:$0xff] }
  0x55   :  { %1668 = vrot.lane.b32.xlu1 %v1667_v31, %s1832_s9  ;;  %892 = vmatpush.bf16.msra.mxu0 %v885_v29  ;;  %v1369_v31 = vld [vmem:[%s3059_s0 + $0x220] sm:$0xff] }
  0x56   :  { %1663 = vrot.lane.b32.xlu0 %v1662_v30, %s1833_s12  ;;  %v1368_v30 = vld [vmem:[%s3059_s0 + $0x210] sm:$0xff]  ;;  %1500 = vmatpush.bf16.msra.mxu2 %v885_v29 }
  0x59   :  { %893 = vmatpush.bf16.msra.mxu0 %v1499_v34 }
  0x5a   :  { %1501 = vmatpush.bf16.msra.mxu2 %v1499_v34 }
  0x5c   :  { %1688 = vrot.lane.b32.xlu2 %v1687_v40, %s1835_s17  ;;  %v2292_v40 = vld [vmem:[%s3059_s0 + $0x330] sm:$0xff] }
  0x5d   :  { %1683 = vrot.lane.b32.xlu1 %v1682_v42, %s1836_s18  ;;  %894 = vmatpush.bf16.msra.mxu0 %v1498_v54 }
  0x5e   :  { %1678 = vrot.lane.b32.xlu0 %v1677_v41, %s1837_s19  ;;  %v2186_v45 = vpop.permute.xlu2 %1533  ;;  %v833_v41 = vpack.c.bf16 %v1369_v31, %v1368_v30  ;;  %1502 = vmatpush.bf16.msra.mxu2 %v1498_v54 }
  0x60   :  { %1493 = vmatmul.msk.bf16.gmra.mxu1 %vm352_vm1, %v833_v41 }
  0x64   :  { %1703 = vrot.lane.b32.xlu2 %v1702_v49, %s1837_s19  ;;  %v1762_v49 = vpack.i.bf16 %v2302_v46, %v1423_v0 }
  0x65   :  { %1698 = vrot.lane.b32.xlu1 %v1697_v53, %s1838_s26  ;;  %v1757_v53 = vpack.i.bf16 %v2292_v40, %v2228_v2  ;;  %v1377_v2 = vld [vmem:[%s3059_s0 + $0x191] sm:$0xff] }
  0x66   :  { %1693 = vrot.lane.b32.xlu0 %v1692_v51, %s1839_s27  ;;  %v2201_v55 = vpop.permute.xlu2 %1538  ;;  %v1752_v51 = vpack.i.bf16 %v2287_v39, %v2282_v38 }
  0x6c   :  { %1718 = vrot.lane.b32.xlu2 %v1717_v59, %s1839_s27  ;;  %v836_v59 = vpack.c.bf16 %v1439_v15, %v1438_v14  ;;  %v1767_v14 = vpack.i.bf16 %v1369_v31, %v1368_v30 }
  0x6d   :  { %1713 = vrot.lane.b32.xlu1 %v1712_v63, %s1835_s17 }
  0x6e   :  { %1708 = vrot.lane.b32.xlu0 %v1707_v60, %s1836_s18  ;;  %v2223_v1 = vpop.permute.xlu2 %1553  ;;  %v1385_v60 = vld [vmem:[%s3059_s0 + $0x80] sm:$0xff]  ;;  %1496 = vmatmul.msk.bf16.gmra.mxu3 %vm352_vm1, %v836_v59  ;;  %v2400_v59 = vld [vmem:[%s3059_s0 + $0x2b1] sm:$0xff] }
  0x6f   :  { %v1777_v6 = vpack.i.bf16 %v1385_v60, %v26_v43  ;;  %v1433_v60 = vld [vmem:[%s3059_s0 + $0x3d0] sm:$0xff] }
  0x74   :  { %1733 = vrot.lane.b32.xlu2 %v1732_v11, %s1832_s9 }
  0x75   :  { %1728 = vrot.lane.b32.xlu1 %v1727_v5, %s1833_s12 }
  0x76   :  { %1723 = vrot.lane.b32.xlu0 %v1722_v3, %s1838_s26  ;;  %v2249_v9 = vpop.permute.xlu2 %1568 }
  0x77   :  { %v1524_v19 = vpop.permute.xlu1 %1523  ;;  %v1571_v4 = vunpack.i.h.bf16 %v2249_v9  ;;  %v1570_v11 = vunpack.i.l.bf16 %v2249_v9 }
  0x78   :  { %v2261_v24 = vpop.permute.xlu0 %1513  ;;  %v1526_v25 = vunpack.i.h.bf16 %v1524_v19  ;;  %v1525_v63 = vunpack.i.l.bf16 %v1524_v19 }
  0x79   :  { %v1516_v29 = vunpack.i.h.bf16 %v2261_v24  ;;  %v1515_v34 = vunpack.i.l.bf16 %v2261_v24 }
  0x7a   :  { %v358_v28 = vsel %vm352_vm1, %v1382_v57, %v1526_v25  ;;  %v357_v13 = vsel %vm352_vm1, %v2122_v17, %v1525_v63  ;;  %v2351_v17 = vld [vmem:[%s3059_s0 + $0x340] sm:$0xff] }
  0x7b   :  { %v354_v54 = vsel %vm352_vm1, %v1999_v36, %v1516_v29  ;;  %v1432_v36 = vld [vmem:[%s3059_s0 + $0x3c0] sm:$0xff] }
  0x7c   :  { %1748 = vrot.lane.b32.xlu2 %v1747_v26, %s1836_s18 }
  0x7d   :  { %1743 = vrot.lane.b32.xlu1 %v1742_v22, %s1837_s19  ;;  %v1393_v22 = vld [vmem:[%s3059_s0 + $0x110] sm:$0xff] }
  0x7e   :  { %1738 = vrot.lane.b32.xlu0 %v1737_v10, %s1834_s13  ;;  %v2277_v35 = vpop.permute.xlu2 %1583 }
  0x7f   :  { %v1529_v42 = vpop.permute.xlu1 %1528 }
  0x80   :  { %v2297_v44 = vpop.permute.xlu0 %1518  ;;  %v1531_v47 = vunpack.i.h.bf16 %v1529_v42  ;;  %v1530_v48 = vunpack.i.l.bf16 %v1529_v42 }
  0x82   :  { %v359_v56 = vsel %vm352_vm1, %v2212_v58, %v1530_v48  ;;  %v360_v57 = vsel %vm352_vm1, %v26_v43, %v1531_v47  ;;  %v1376_v58 = vld [vmem:[%s3059_s0 + $0x181] sm:$0xff]  ;;  %v1792_v47 = vpack.i.bf16 %v2351_v17, %v2292_v40  ;;  %v1787_v48 = vpack.i.bf16 %v1401_v27, %v1958_v21  ;;  %v1449_v27 = vld [vmem:[%s3059_s0 + $0x3d1] sm:$0xff] }
  0x83   :  { %v1772_v15 = vpack.i.bf16 %v1377_v2, %v1376_v58  ;;  %v1535_v40 = vunpack.i.l.bf16 %v2186_v45 }
  0x84   :  { %1763 = vrot.lane.b32.xlu2 %v1762_v49, %s1838_s26 }
  0x85   :  { %1758 = vrot.lane.b32.xlu1 %v1757_v53, %s1839_s27  ;;  %v1440_v53 = vld [vmem:[%s3059_s0 + $0x450] sm:$0xff] }
  0x86   :  { %1753 = vrot.lane.b32.xlu0 %v1752_v51, %s1835_s17  ;;  %v2322_v0 = vpop.permute.xlu2 %1598  ;;  %v1536_v51 = vunpack.i.h.bf16 %v2186_v45  ;;  %v1556_v45 = vunpack.i.h.bf16 %v2223_v1 }
  0x87   :  { %v1549_v3 = vpop.permute.xlu1 %1548 }
  0x88   :  { %v1544_v5 = vpop.permute.xlu0 %1543  ;;  %v1551_v7 = vunpack.i.h.bf16 %v1549_v3  ;;  %v1550_v8 = vunpack.i.l.bf16 %v1549_v3  ;;  %v363_v58 = vsel %vm361_vm2, %v354_v54, %v1536_v51 }
  0x89   :  { %v1546_v20 = vunpack.i.h.bf16 %v1544_v5  ;;  %v1545_v23 = vunpack.i.l.bf16 %v1544_v5  ;;  %v1797_v5 = vpack.i.bf16 %v2400_v59, %v2302_v46  ;;  %v1465_v46 = vld [vmem:[%s3059_s0 + $0x350] sm:$0xff] }
  0x8a   :  { %v368_v18 = vsel %vm361_vm2, %v359_v56, %v1550_v8  ;;  %v369_v19 = vsel %vm361_vm2, %v360_v57, %v1551_v7  ;;  %v1555_v57 = vunpack.i.l.bf16 %v2223_v1 }
  0x8b   :  { %v366_v9 = vsel %vm361_vm2, %v357_v13, %v1545_v23  ;;  %v367_v25 = vsel %vm361_vm2, %v358_v28, %v1546_v20  ;;  %v2340_v26 = vsel %vm370_vm3, %v368_v18, %v1570_v11  ;;  %v2343_v10 = vsel %vm370_vm3, %v369_v19, %v1571_v4 }
  0x8c   :  { %1778 = vrot.lane.b32.xlu2 %v1777_v6, %s1835_s17  ;;  %v834_v28 = vpack.c.bf16 %v2053_v52, %v2044_v50  ;;  %v19_v50 = vld [vmem:[%s3059_s0] sm:$0xff]  ;;  %v1782_v52 = vpack.i.bf16 %v1393_v22, %v1926_v12  ;;  %v1802_v6 = vpack.i.bf16 %v1433_v60, %v1432_v36  ;;  %v372_v13 = vsel %vm370_vm3, %v363_v58, %v1556_v45 }
  0x8d   :  { %1773 = vrot.lane.b32.xlu1 %v1772_v15, %s1836_s18  ;;  %v1441_v12 = vld [vmem:[%s3059_s0 + $0x460] sm:$0xff]  ;;  %v353_v21 = vsel %vm352_vm1, %v19_v50, %v1515_v34  ;;  %v1586_v18 = vunpack.i.h.bf16 %v2277_v35  ;;  %v1585_v19 = vunpack.i.l.bf16 %v2277_v35  ;;  %v2438_v35 = vld [vmem:[%s3059_s0 + $0x2b0] sm:$0xff]  ;;  %v1822_v34 = vpack.i.bf16 %v1465_v46, %v2351_v17 }
  0x8e   :  { %1768 = vrot.lane.b32.xlu0 %v1767_v14, %s1837_s19  ;;  %v2365_v41 = vpop.permute.xlu2 %1613  ;;  %1494 = vmatmul.msk.bf16.gmra.mxu1 %vm352_vm1, %v834_v28  ;;  %v837_v56 = vpack.c.bf16 %v1441_v12, %v1440_v53  ;;  %v362_v63 = vsel %vm361_vm2, %v353_v21, %v1535_v40  ;;  %v1807_v3 = vpack.i.bf16 %v1441_v12, %v1440_v53  ;;  %v1457_v28 = vld [vmem:[%s3059_s0 + $0x2c0] sm:$0xff]  ;;  %v1601_v45 = vunpack.i.h.bf16 %v2322_v0 }
  0x8f   :  { %v1564_v30 = vpop.permute.xlu1 %1563  ;;  %v371_v23 = vsel %vm370_vm3, %v362_v63, %v1555_v57  ;;  %v1817_v40 = vpack.i.bf16 %v1457_v28, %v2438_v35  ;;  %v1600_v57 = vunpack.i.l.bf16 %v2322_v0  ;;  %v1402_v36 = vld [vmem:[%s3059_s0 + $0x240] sm:$0xff]  ;;  %v1521_v28 = vunpack.i.h.bf16 %v2297_v44 }
  0x90   :  { %v2362_v31 = vpop.permute.xlu0 %1558  ;;  %v1566_v42 = vunpack.i.h.bf16 %v1564_v30  ;;  %v1565_v43 = vunpack.i.l.bf16 %v1564_v30  ;;  %1497 = vmatmul.msk.bf16.gmra.mxu3 %vm352_vm1, %v837_v56  ;;  %v1473_v60 = vld [vmem:[%s3059_s0 + $0x2c1] sm:$0xff]  ;;  %v759_v0 = vsel %vm352_vm1, %v2078_v61, %v1601_v45 }
  0x92   :  { %v2376_v49 = vsel %vm370_vm3, %v366_v9, %v1565_v43  ;;  %v2379_v24 = vsel %vm370_vm3, %v367_v25, %v1566_v42  ;;  %v1448_v9 = vld [vmem:[%s3059_s0 + $0x3c1] sm:$0xff] }
  0x93   :  { %v1812_v51 = vpack.i.bf16 %v1449_v27, %v1448_v9 }
  0x94   :  { %1793 = vrot.lane.b32.xlu2 %v1792_v47, %s1833_s12 }
  0x95   :  { %1788 = vrot.lane.b32.xlu1 %v1787_v48, %s1838_s26 }
  0x96   :  { %1783 = vrot.lane.b32.xlu0 %v1782_v52, %s1839_s27  ;;  %v2413_v7 = vpop.permute.xlu2 %1628 }
  0x97   :  { %v1579_v1 = vpop.permute.xlu1 %1578 }
  0x98   :  { %v1574_v2 = vpop.permute.xlu0 %1573  ;;  %v1581_v8 = vunpack.i.h.bf16 %v1579_v1  ;;  %v1580_v20 = vunpack.i.l.bf16 %v1579_v1 }
  0x99   :  { %v1576_v4 = vunpack.i.h.bf16 %v1574_v2  ;;  %v1575_v11 = vunpack.i.l.bf16 %v1574_v2 }
  0x9b   :  { %v380_v14 = vsel %vm379_vm4, %v371_v23, %v1575_v11  ;;  %v381_v15 = vsel %vm379_vm4, %v372_v13, %v1576_v4  ;;  %v758_v4 = vsel %vm352_vm1, %v1402_v36, %v1600_v57  ;;  %v1827_v11 = vpack.i.bf16 %v1473_v60, %v2400_v59 }
  0x9c   :  { %1808 = vrot.lane.b32.xlu2 %v1807_v3, %s1837_s19  ;;  %v389_v25 = vsel %vm388_vm5, %v380_v14, %v1580_v20  ;;  %v390_v22 = vsel %vm388_vm5, %v381_v15, %v1581_v8  ;;  %v1616_v20 = vunpack.i.h.bf16 %v2365_v41  ;;  %v1615_v23 = vunpack.i.l.bf16 %v2365_v41 }
  0x9d   :  { %1803 = vrot.lane.b32.xlu1 %v1802_v6, %s1834_s13  ;;  %v398_v52 = vsel %vm397_vm6, %v389_v25, %v1585_v19  ;;  %v399_v48 = vsel %vm397_vm6, %v390_v22, %v1586_v18 }
  0x9e   :  { %1798 = vrot.lane.b32.xlu0 %v1797_v5, %s1832_s9  ;;  %v2451_v17 = vpop.permute.xlu2 %1643 }
  0x9f   :  { %v1594_v29 = vpop.permute.xlu1 %1593 }
  0xa0   :  { %v1589_v30 = vpop.permute.xlu0 %1588  ;;  %v1596_v42 = vunpack.i.h.bf16 %v1594_v29  ;;  %v1595_v43 = vunpack.i.l.bf16 %v1594_v29  ;;  %v1520_v29 = vunpack.i.l.bf16 %v2297_v44  ;;  %v356_v44 = vsel %vm352_vm1, %v2117_v16, %v1521_v28 }
  0xa1   :  { %v1591_v47 = vunpack.i.h.bf16 %v1589_v30  ;;  %v1590_v50 = vunpack.i.l.bf16 %v1589_v30  ;;  %v1631_v30 = vunpack.i.h.bf16 %v2413_v7 }
  0xa3   :  { %v407_v53 = vsel %vm406_vm7, %v398_v52, %v1590_v50  ;;  %v408_v12 = vsel %vm406_vm7, %v399_v48, %v1591_v47  ;;  %v1541_v47 = vunpack.i.h.bf16 %v2201_v55  ;;  %v1540_v50 = vunpack.i.l.bf16 %v2201_v55 }
  0xa4   :  { %v416_v21 = vsel %vm415_vm8, %v407_v53, %v1595_v43  ;;  %v417_v54 = vsel %vm415_vm8, %v408_v12, %v1596_v42  ;;  %1823 = vrot.lane.b32.xlu2 %v1822_v34, %s1839_s27  ;;  %v1630_v34 = vunpack.i.l.bf16 %v2413_v7  ;;  %v1561_v12 = vunpack.i.h.bf16 %v2362_v31 }
  0xa5   :  { %v822_v56 = vpack.c.bf16 %v417_v54, %v416_v21  ;;  %1818 = vrot.lane.b32.xlu1 %v1817_v40, %s1835_s17  ;;  %v1560_v21 = vunpack.i.l.bf16 %v2362_v31  ;;  %v365_v60 = vsel %vm361_vm2, %v356_v44, %v1541_v47  ;;  %v1646_v31 = vunpack.i.h.bf16 %v2451_v17 }
  0xa6   :  { %1813 = vrot.lane.b32.xlu0 %v1812_v51, %s1836_s18  ;;  %v2474_v13 = vpop.permute.xlu2 %1658  ;;  %v355_v51 = vsel %vm352_vm1, %v2006_v37, %v1520_v29 }
  0xa7   :  { %1482 = vmatmul.msk.bf16.vlgmr.msra.gmra.mxu0 %vm858_vm9, %v822_v56  ;;  %v1609_v63 = vpop.permute.xlu1 %1608  ;;  %v364_v16 = vsel %vm361_vm2, %v355_v51, %v1540_v50 }
  0xa8   :  { %v1604_v58 = vpop.permute.xlu0 %1603  ;;  %v1611_v3 = vunpack.i.h.bf16 %v1609_v63  ;;  %v1610_v5 = vunpack.i.l.bf16 %v1609_v63  ;;  %v373_v63 = vsel %vm370_vm3, %v364_v16, %v1560_v21 }
  0xa9   :  { %v1606_v1 = vunpack.i.h.bf16 %v1604_v58  ;;  %v1605_v2 = vunpack.i.l.bf16 %v1604_v58  ;;  %v374_v58 = vsel %vm370_vm3, %v365_v60, %v1561_v12 }
  0xab   :  { %v767_v6 = vsel %vm361_vm2, %v759_v0, %v1606_v1  ;;  %v766_v8 = vsel %vm361_vm2, %v758_v4, %v1605_v2  ;;  %v1645_v1 = vunpack.i.l.bf16 %v2451_v17  ;;  %v1661_v4 = vunpack.i.h.bf16 %v2474_v13 }
  0xac   :  { %v775_v61 = vsel %vm370_vm3, %v767_v6, %v1611_v3  ;;  %v774_v14 = vsel %vm370_vm3, %v766_v8, %v1610_v5 }
  0xad   :  { %v782_v25 = vsel %vm379_vm4, %v774_v14, %v1615_v23  ;;  %v783_v22 = vsel %vm379_vm4, %v775_v61, %v1616_v20 }
  0xae   :  { %1828 = vrot.lane.b32.xlu0 %v1827_v11, %s1838_s26  ;;  %v2494_v40 = vpop.permute.xlu2 %1673  ;;  %v1660_v11 = vunpack.i.l.bf16 %v2474_v13 }
  0xaf   :  { %v1624_v15 = vpop.permute.xlu1 %1623  ;;  %v1676_v47 = vunpack.i.h.bf16 %v2494_v40  ;;  %v1675_v50 = vunpack.i.l.bf16 %v2494_v40 }
  0xb0   :  { %v1619_v59 = vpop.permute.xlu0 %1618  ;;  %v1626_v19 = vunpack.i.h.bf16 %v1624_v15  ;;  %v1625_v9 = vunpack.i.l.bf16 %v1624_v15 }
  0xb1   :  { %v1621_v46 = vunpack.i.h.bf16 %v1619_v59  ;;  %v1620_v18 = vunpack.i.l.bf16 %v1619_v59 }
  0xb3   :  { %v790_v27 = vsel %vm388_vm5, %v782_v25, %v1620_v18  ;;  %v791_v41 = vsel %vm388_vm5, %v783_v22, %v1621_v46 }
  0xb4   :  { %v798_v42 = vsel %vm397_vm6, %v790_v27, %v1625_v9  ;;  %v799_v43 = vsel %vm397_vm6, %v791_v41, %v1626_v19 }
  0xb5   :  { %v806_v54 = vsel %vm406_vm7, %v798_v42, %v1630_v34  ;;  %v807_v55 = vsel %vm406_vm7, %v799_v43, %v1631_v30  ;;  %v1133_v43 = vpop.f32.mrf.mxu1 }
  0xb6   :  { %v1689_v14 = vpop.permute.xlu2 %1688 }
  0xb7   :  { %v1639_v52 = vpop.permute.xlu1 %1638 }
  0xb8   :  { %v1634_v48 = vpop.permute.xlu0 %1633  ;;  %v1641_v56 = vunpack.i.h.bf16 %v1639_v52  ;;  %v1640_v45 = vunpack.i.l.bf16 %v1639_v52  ;;  %v2528_v52 = vpack.c.bf16 %v1133_v43, %v1133_v43 }
  0xb9   :  { %v1636_v53 = vunpack.i.h.bf16 %v1634_v48  ;;  %v1635_v7 = vunpack.i.l.bf16 %v1634_v48 }
  0xba   :  { %v382_v2 = vsel %vm379_vm4, %v373_v63, %v1640_v45  ;;  %v383_v0 = vsel %vm379_vm4, %v374_v58, %v1641_v56  ;;  %1189 = vst.msk [vmem:[%s3062_s4] sm:$0xf] %vm952_vm10, %v2528_v52  ;;  %v1691_v45 = vunpack.i.h.bf16 %v1689_v14 }
  0xbb   :  { %v814_v57 = vsel %vm415_vm8, %v806_v54, %v1635_v7  ;;  %v815_v37 = vsel %vm415_vm8, %v807_v55, %v1636_v53  ;;  %v391_v61 = vsel %vm388_vm5, %v382_v2, %v1645_v1  ;;  %v392_v17 = vsel %vm388_vm5, %v383_v0, %v1646_v31 }
  0xbc   :  { %v826_v36 = vpack.c.bf16 %v815_v37, %v814_v57  ;;  %v1690_v57 = vunpack.i.l.bf16 %v1689_v14 }
  0xbd   :  { %v1135_v37 = vpop.f32.mrf.mxu1 }
  0xbe   :  { %1486 = vmatmul.msk.bf16.vlgmr.msra.gmra.mxu2 %vm858_vm9, %v826_v36  ;;  %v1704_v30 = vpop.permute.xlu2 %1703  ;;  %v2543_v60 = vpack.c.bf16 %v1135_v37, %v1135_v37 }
  0xbf   :  { %v1654_v5 = vpop.permute.xlu1 %1653 }
  0xc0   :  { %v1649_v3 = vpop.permute.xlu0 %1648  ;;  %v1656_v20 = vunpack.i.h.bf16 %v1654_v5  ;;  %v1655_v23 = vunpack.i.l.bf16 %v1654_v5  ;;  %1190 = vst.msk [vmem:[%s3062_s4 + $0x4] sm:$0xf] %vm952_vm10, %v2543_v60 }
  0xc1   :  { %v1651_v6 = vunpack.i.h.bf16 %v1649_v3  ;;  %v1650_v8 = vunpack.i.l.bf16 %v1649_v3 }
  0xc3   :  { %v400_v15 = vsel %vm397_vm6, %v391_v61, %v1650_v8  ;;  %v401_v59 = vsel %vm397_vm6, %v392_v17, %v1651_v6  ;;  %v1706_v61 = vunpack.i.h.bf16 %v1704_v30  ;;  %v1705_v17 = vunpack.i.l.bf16 %v1704_v30 }
  0xc4   :  { %v409_v46 = vsel %vm406_vm7, %v400_v15, %v1655_v23  ;;  %v410_v18 = vsel %vm406_vm7, %v401_v59, %v1656_v20 }
  0xc5   :  { %v418_v13 = vsel %vm415_vm8, %v409_v46, %v1660_v11  ;;  %v419_v19 = vsel %vm415_vm8, %v410_v18, %v1661_v4  ;;  %v1138_v23 = vpop.f32.mrf.mxu1 }
  0xc6   :  { %v823_v9 = vpack.c.bf16 %v419_v19, %v418_v13  ;;  %v1719_v56 = vpop.permute.xlu2 %1718  ;;  %v2557_v15 = vpack.c.bf16 %v1138_v23, %v1138_v23  ;;  %v384_v19 = vsel %vm379_vm4, %v2376_v49, %v1705_v17 }
  0xc7   :  { %v1669_v22 = vpop.permute.xlu1 %1668 }
  0xc8   :  { %v1664_v25 = vpop.permute.xlu0 %1663  ;;  %1483 = vmatmul.msk.bf16.gmra.mxu0 %vm858_vm9, %v823_v9  ;;  %v1671_v28 = vunpack.i.h.bf16 %v1669_v22  ;;  %v1670_v29 = vunpack.i.l.bf16 %v1669_v22  ;;  %1191 = vst.msk [vmem:[%s3062_s4 + $0x8] sm:$0xf] %vm952_vm10, %v2557_v15  ;;  %v385_v9 = vsel %vm379_vm4, %v2379_v24, %v1706_v61 }
  0xc9   :  { %v1666_v27 = vunpack.i.h.bf16 %v1664_v25  ;;  %v1665_v41 = vunpack.i.l.bf16 %v1664_v25 }
  0xcb   :  { %v761_v34 = vsel %vm352_vm1, %v2154_v32, %v1666_v27  ;;  %v760_v42 = vsel %vm352_vm1, %v2083_v62, %v1665_v41 }
  0xcc   :  { %v768_v48 = vsel %vm361_vm2, %v760_v42, %v1670_v29  ;;  %v769_v51 = vsel %vm361_vm2, %v761_v34, %v1671_v28  ;;  %v1721_v28 = vunpack.i.h.bf16 %v1719_v56  ;;  %v1720_v29 = vunpack.i.l.bf16 %v1719_v56 }
  0xcd   :  { %v776_v62 = vsel %vm370_vm3, %v768_v48, %v1675_v50  ;;  %v777_v32 = vsel %vm370_vm3, %v769_v51, %v1676_v47  ;;  %v1140_v30 = vpop.f32.mrf.mxu1 }
  0xce   :  { %v1734_v14 = vpop.permute.xlu2 %1733  ;;  %v2572_v43 = vpack.c.bf16 %v1140_v30, %v1140_v30 }
  0xcf   :  { %v1684_v53 = vpop.permute.xlu1 %1683 }
  0xd0   :  { %v1679_v44 = vpop.permute.xlu0 %1678  ;;  %v1686_v40 = vunpack.i.h.bf16 %v1684_v53  ;;  %v1685_v21 = vunpack.i.l.bf16 %v1684_v53  ;;  %1192 = vst.msk [vmem:[%s3062_s4 + $0xc] sm:$0xf] %vm952_vm10, %v2572_v43 }
  0xd1   :  { %v1681_v7 = vunpack.i.h.bf16 %v1679_v44  ;;  %v1680_v12 = vunpack.i.l.bf16 %v1679_v44 }
  0xd3   :  { %v784_v54 = vsel %vm379_vm4, %v776_v62, %v1680_v12  ;;  %v785_v55 = vsel %vm379_vm4, %v777_v32, %v1681_v7 }
  0xd4   :  { %v792_v36 = vsel %vm388_vm5, %v784_v54, %v1685_v21  ;;  %v793_v16 = vsel %vm388_vm5, %v785_v55, %v1686_v40  ;;  %v1736_v40 = vunpack.i.h.bf16 %v1734_v14  ;;  %v1735_v21 = vunpack.i.l.bf16 %v1734_v14 }
  0xd5   :  { %v800_v4 = vsel %vm397_vm6, %v792_v36, %v1690_v57  ;;  %v801_v11 = vsel %vm397_vm6, %v793_v16, %v1691_v45  ;;  %v1143_v56 = vpop.f32.mrf.mxu1 }
  0xd6   :  { %v1749_v24 = vpop.permute.xlu2 %1748  ;;  %v2588_v45 = vpack.c.bf16 %v1143_v56, %v1143_v56 }
  0xd7   :  { %v1699_v58 = vpop.permute.xlu1 %1698 }
  0xd8   :  { %v1694_v63 = vpop.permute.xlu0 %1693  ;;  %v1701_v2 = vunpack.i.h.bf16 %v1699_v58  ;;  %v1700_v0 = vunpack.i.l.bf16 %v1699_v58  ;;  %1193 = vst.msk [vmem:[%s3062_s4 + $0x10] sm:$0xf] %vm952_vm10, %v2588_v45 }
  0xd9   :  { %v1696_v31 = vunpack.i.h.bf16 %v1694_v63  ;;  %v1695_v1 = vunpack.i.l.bf16 %v1694_v63 }
  0xdb   :  { %v808_v3 = vsel %vm406_vm7, %v800_v4, %v1695_v1  ;;  %v809_v5 = vsel %vm406_vm7, %v801_v11, %v1696_v31  ;;  %v1206_v4 = vunpack.c.l.bf16 %v2543_v60  ;;  %v1751_v11 = vunpack.i.h.bf16 %v1749_v24 }
  0xdc   :  { %v816_v6 = vsel %vm415_vm8, %v808_v3, %v1700_v0  ;;  %v817_v8 = vsel %vm415_vm8, %v809_v5, %v1701_v2  ;;  %v1750_v3 = vunpack.i.l.bf16 %v1749_v24 }
  0xdd   :  { %v827_v20 = vpack.c.bf16 %v817_v8, %v816_v6  ;;  %v1145_v5 = vpop.f32.mrf.mxu1  ;;  %v1222_v61 = vsel %vm361_vm2, %v1206_v4, 0.0 }
  0xde   :  { %v1764_v1 = vpop.permute.xlu2 %1763  ;;  %v2606_v23 = vpack.c.bf16 %v1145_v5, %v1145_v5 }
  0xdf   :  { %1487 = vmatmul.msk.bf16.gmra.mxu2 %vm858_vm9, %v827_v20  ;;  %v1714_v46 = vpop.permute.xlu1 %1713 }
  0xe0   :  { %v1709_v59 = vpop.permute.xlu0 %1708  ;;  %v1716_v25 = vunpack.i.h.bf16 %v1714_v46  ;;  %v1715_v22 = vunpack.i.l.bf16 %v1714_v46  ;;  %v1765_v46 = vunpack.i.l.bf16 %v1764_v1  ;;  %1194 = vst.msk [vmem:[%s3062_s4 + $0x14] sm:$0xf] %vm952_vm10, %v2606_v23 }
  0xe1   :  { %v1711_v18 = vunpack.i.h.bf16 %v1709_v59  ;;  %v1710_v13 = vunpack.i.l.bf16 %v1709_v59  ;;  %v1766_v59 = vunpack.i.h.bf16 %v1764_v1 }
  0xe3   :  { %v393_v27 = vsel %vm388_vm5, %v384_v19, %v1710_v13  ;;  %v394_v41 = vsel %vm388_vm5, %v385_v9, %v1711_v18  ;;  %v1207_v18 = vunpack.c.l.bf16 %v2557_v15 }
  0xe4   :  { %v402_v34 = vsel %vm397_vm6, %v393_v27, %v1715_v22  ;;  %v403_v42 = vsel %vm397_vm6, %v394_v41, %v1716_v25  ;;  %v1158_v41 = vpop.f32.mrf.mxu3 }
  0xe5   :  { %v411_v51 = vsel %vm406_vm7, %v402_v34, %v1720_v29  ;;  %v412_v44 = vsel %vm406_vm7, %v403_v42, %v1721_v28 }
  0xe6   :  { %v1779_v24 = vpop.permute.xlu2 %1778 }
  0xe7   :  { %v1729_v49 = vpop.permute.xlu1 %1728  ;;  %v1781_v1 = vunpack.i.h.bf16 %v1779_v24 }
  0xe8   :  { %v1724_v47 = vpop.permute.xlu0 %1723  ;;  %v1731_v53 = vunpack.i.h.bf16 %v1729_v49  ;;  %v1730_v7 = vunpack.i.l.bf16 %v1729_v49  ;;  %v1224_v49 = vsel %vm361_vm2, %v1207_v18, 0.0 }
  0xe9   :  { %v1726_v50 = vunpack.i.h.bf16 %v1724_v47  ;;  %v1725_v48 = vunpack.i.l.bf16 %v1724_v47  ;;  %v2623_v47 = vpack.c.bf16 %v1158_v41, %v1158_v41 }
  0xea   :  { %v763_v54 = vsel %vm352_vm1, %v2282_v38, %v1731_v53  ;;  %v762_v55 = vsel %vm352_vm1, %v2161_v33, %v1730_v7  ;;  %v1205_v33 = vunpack.c.l.bf16 %v2528_v52  ;;  %v1148_v53 = vpop.f32.mrf.mxu1 }
  0xeb   :  { %v420_v12 = vsel %vm415_vm8, %v411_v51, %v1725_v48  ;;  %v421_v62 = vsel %vm415_vm8, %v412_v44, %v1726_v50  ;;  %v770_v36 = vsel %vm361_vm2, %v762_v55, %v1735_v21  ;;  %v771_v16 = vsel %vm361_vm2, %v763_v54, %v1736_v40  ;;  %1199 = vst.msk [vmem:[%s3062_s4 + $0x28] sm:$0xf] %vm952_vm10, %v2623_v47 }
  0xec   :  { %v824_v32 = vpack.c.bf16 %v421_v62, %v420_v12  ;;  %v1221_v6 = vsel %vm361_vm2, %v1205_v33, 0.0  ;;  %v1208_v51 = vunpack.c.l.bf16 %v2572_v43  ;;  %v2636_v7 = vpack.c.bf16 %v1148_v53, %v1148_v53  ;;  %v1160_v56 = vpop.f32.mrf.mxu3 }
  0xed   :  { %v1223_v30 = vadd.f32 %v1222_v61, %v1221_v6  ;;  %v1209_v55 = vunpack.c.l.bf16 %v2588_v45 }
  0xee   :  { %1484 = vmatmul.msk.bf16.gmra.mxu0 %vm858_vm9, %v824_v32  ;;  %v1226_v54 = vsel %vm361_vm2, %v1208_v51, 0.0  ;;  %1195 = vst.msk [vmem:[%s3062_s4 + $0x18] sm:$0xf] %vm952_vm10, %v2636_v7 }
  0xef   :  { %v1744_v37 = vpop.permute.xlu1 %1743  ;;  %v1225_v12 = vadd.f32 %v1224_v49, %v1223_v30 }
  0xf0   :  { %v1739_v57 = vpop.permute.xlu0 %1738  ;;  %v1746_v38 = vunpack.i.h.bf16 %v1744_v37  ;;  %v1745_v31 = vunpack.i.l.bf16 %v1744_v37 }
  0xf1   :  { %v1741_v63 = vunpack.i.h.bf16 %v1739_v57  ;;  %v1740_v58 = vunpack.i.l.bf16 %v1739_v57 }
  0xf3   :  { %v779_v2 = vsel %vm370_vm3, %v771_v16, %v1741_v63  ;;  %v778_v0 = vsel %vm370_vm3, %v770_v36, %v1740_v58  ;;  %v2648_v36 = vpack.c.bf16 %v1160_v56, %v1160_v56  ;;  %v1227_v58 = vadd.f32 %v1226_v54, %v1225_v12 }
  0xf4   :  { %v786_v8 = vsel %vm379_vm4, %v778_v0, %v1745_v31  ;;  %v787_v20 = vsel %vm379_vm4, %v779_v2, %v1746_v38  ;;  %v1210_v38 = vunpack.c.l.bf16 %v2606_v23  ;;  %v1228_v31 = vsel %vm361_vm2, %v1209_v55, 0.0  ;;  %v1150_v0 = vpop.f32.mrf.mxu1 }
  0xf5   :  { %v794_v22 = vsel %vm388_vm5, %v786_v8, %v1750_v3  ;;  %v795_v27 = vsel %vm388_vm5, %v787_v20, %v1751_v11  ;;  %1200 = vst.msk [vmem:[%s3062_s4 + $0x2c] sm:$0xf] %vm952_vm10, %v2648_v36  ;;  %v1780_v2 = vunpack.i.l.bf16 %v1779_v24  ;;  %v1794_v11 = vpop.permute.xlu2 %1793  ;;  %v1229_v6 = vadd.f32 %v1228_v31, %v1227_v58 }
  0xf6   :  { %v1230_v8 = vsel %vm361_vm2, %v1210_v38, 0.0 }
  0xf7   :  { %v1759_v14 = vpop.permute.xlu1 %1758 }
  0xf8   :  { %v1754_v17 = vpop.permute.xlu0 %1753  ;;  %v1761_v9 = vunpack.i.h.bf16 %v1759_v14  ;;  %v1760_v25 = vunpack.i.l.bf16 %v1759_v14 }
  0xf9   :  { %v1756_v13 = vunpack.i.h.bf16 %v1754_v17  ;;  %v1755_v19 = vunpack.i.l.bf16 %v1754_v17 }
  0xfb   :  { %v802_v28 = vsel %vm397_vm6, %v794_v22, %v1755_v19  ;;  %v803_v29 = vsel %vm397_vm6, %v795_v27, %v1756_v13  ;;  %v1211_v13 = vunpack.c.l.bf16 %v2636_v7  ;;  %v2671_v19 = vpack.c.bf16 %v1150_v0, %v1150_v0 }
  0xfc   :  { %v810_v34 = vsel %vm406_vm7, %v802_v28, %v1760_v25  ;;  %v811_v42 = vsel %vm406_vm7, %v803_v29, %v1761_v9  ;;  %v1163_v9 = vpop.f32.mrf.mxu3  ;;  %v1795_v29 = vunpack.i.l.bf16 %v1794_v11 }
  0xfd   :  { %v818_v50 = vsel %vm415_vm8, %v810_v34, %v1765_v46  ;;  %v819_v48 = vsel %vm415_vm8, %v811_v42, %v1766_v59  ;;  %v2675_v27 = vpack.c.bf16 %v1163_v9, %v1163_v9  ;;  %1196 = vst.msk [vmem:[%s3062_s4 + $0x1c] sm:$0xf] %vm952_vm10, %v2671_v19  ;;  %v1231_v34 = vadd.f32 %v1230_v8, %v1229_v6 }
  0xfe   :  { %v828_v44 = vpack.c.bf16 %v819_v48, %v818_v50  ;;  %v1796_v42 = vunpack.i.h.bf16 %v1794_v11  ;;  %v1232_v49 = vsel %vm361_vm2, %v1211_v13, 0.0  ;;  %v1212_v50 = vunpack.c.l.bf16 %v2671_v19 }
  0xff   :  { %v1774_v32 = vpop.permute.xlu1 %1773  ;;  %1201 = vst.msk [vmem:[%s3062_s4 + $0x30] sm:$0xf] %vm952_vm10, %v2675_v27  ;;  %v764_v53 = vsel %vm352_vm1, %v2287_v39, %v1795_v29 }
 0x100   :  { %v1769_v62 = vpop.permute.xlu0 %1768  ;;  %1488 = vmatmul.msk.bf16.gmra.mxu2 %vm858_vm9, %v828_v44  ;;  %v1776_v57 = vunpack.i.h.bf16 %v1774_v32  ;;  %v1775_v37 = vunpack.i.l.bf16 %v1774_v32  ;;  %v1809_v32 = vpop.permute.xlu2 %1808  ;;  %v1234_v54 = vsel %vm361_vm2, %v1212_v50, 0.0 }
 0x101   :  { %v1771_v40 = vunpack.i.h.bf16 %v1769_v62  ;;  %v1770_v21 = vunpack.i.l.bf16 %v1769_v62  ;;  %v1811_v11 = vunpack.i.h.bf16 %v1809_v32 }
 0x103   :  { %v386_v16 = vsel %vm379_vm4, %v2340_v26, %v1770_v21  ;;  %v387_v63 = vsel %vm379_vm4, %v2343_v10, %v1771_v40  ;;  %v1233_v40 = vadd.f32 %v1232_v49, %v1231_v34  ;;  %v765_v21 = vsel %vm352_vm1, %v2438_v35, %v1796_v42 }
 0x104   :  { %v395_v26 = vsel %vm388_vm5, %v386_v16, %v1775_v37  ;;  %v396_v10 = vsel %vm388_vm5, %v387_v63, %v1776_v57  ;;  %v1165_v57 = vpop.f32.mrf.mxu3  ;;  %v1217_v49 = vunpack.c.l.bf16 %v2675_v27 }
 0x105   :  { %v404_v59 = vsel %vm397_vm6, %v395_v26, %v1780_v2  ;;  %v405_v46 = vsel %vm397_vm6, %v396_v10, %v1781_v1  ;;  %v2703_v16 = vpack.c.bf16 %v1165_v57, %v1165_v57  ;;  %v1235_v31 = vadd.f32 %v1234_v54, %v1233_v40 }
 0x106   :  { %v1810_v1 = vunpack.i.l.bf16 %v1809_v32  ;;  %v1215_v2 = vunpack.c.l.bf16 %v2623_v47  ;;  %v1244_v57 = vsel %vm361_vm2, %v1217_v49, 0.0 }
 0x107   :  { %v1789_v5 = vpop.permute.xlu1 %1788  ;;  %1202 = vst.msk [vmem:[%s3062_s4 + $0x34] sm:$0xf] %vm952_vm10, %v2703_v16 }
 0x108   :  { %v1784_v3 = vpop.permute.xlu0 %1783  ;;  %v1791_v17 = vunpack.i.h.bf16 %v1789_v5  ;;  %v1790_v14 = vunpack.i.l.bf16 %v1789_v5  ;;  %v1824_v29 = vpop.permute.xlu2 %1823 }
 0x109   :  { %v1786_v20 = vunpack.i.h.bf16 %v1784_v3  ;;  %v1785_v61 = vunpack.i.l.bf16 %v1784_v3 }
 0x10b   :  { %v413_v25 = vsel %vm406_vm7, %v404_v59, %v1785_v61  ;;  %v414_v22 = vsel %vm406_vm7, %v405_v46, %v1786_v20  ;;  %v1153_v48 = vpop.f32.mrf.mxu1  ;;  %v1240_v59 = vsel %vm361_vm2, %v1215_v2, 0.0  ;;  %v1216_v46 = vunpack.c.l.bf16 %v2648_v36 }
 0x10c   :  { %v422_v41 = vsel %vm415_vm8, %v413_v25, %v1790_v14  ;;  %v423_v28 = vsel %vm415_vm8, %v414_v22, %v1791_v17  ;;  %v2701_v56 = vpack.c.bf16 %v1153_v48, %v1153_v48 }
 0x10d   :  { %v825_v30 = vpack.c.bf16 %v423_v28, %v422_v41 }
 0x10e   :  { %1197 = vst.msk [vmem:[%s3062_s4 + $0x20] sm:$0xf] %vm952_vm10, %v2701_v56  ;;  %v1213_v35 = vunpack.c.l.bf16 %v2701_v56 }
 0x10f   :  { %1485 = vmatmul.msk.bf16.gmra.mxu0 %vm858_vm9, %v825_v30  ;;  %v1804_v44 = vpop.permute.xlu1 %1803 }
 0x110   :  { %v1799_v24 = vpop.permute.xlu0 %1798  ;;  %v1805_v37 = vunpack.i.l.bf16 %v1804_v44  ;;  %v1806_v39 = vunpack.i.h.bf16 %v1804_v44  ;;  %v1236_v0 = vsel %vm361_vm2, %v1213_v35, 0.0  ;;  %v1826_v44 = vunpack.i.h.bf16 %v1824_v29 }
 0x111   :  { %v1801_v12 = vunpack.i.h.bf16 %v1799_v24  ;;  %v1800_v62 = vunpack.i.l.bf16 %v1799_v24  ;;  %v1237_v17 = vadd.f32 %v1236_v0, %v1235_v31 }
 0x113   :  { %v772_v63 = vsel %vm361_vm2, %v764_v53, %v1800_v62  ;;  %v773_v58 = vsel %vm361_vm2, %v765_v21, %v1801_v12  ;;  %v1155_v26 = vpop.f32.mrf.mxu1  ;;  %v1168_v25 = vpop.f32.mrf.mxu3  ;;  %v1825_v53 = vunpack.i.l.bf16 %v1824_v29  ;;  %v1242_v12 = vsel %vm361_vm2, %v1216_v46, 0.0 }
 0x114   :  { %v780_v10 = vsel %vm370_vm3, %v772_v63, %v1805_v37  ;;  %v2723_v3 = vpack.c.bf16 %v1155_v26, %v1155_v26  ;;  %v781_v5 = vsel %vm370_vm3, %v773_v58, %v1806_v39  ;;  %v2738_v30 = vpack.c.bf16 %v1168_v25, %v1168_v25 }
 0x115   :  { %v788_v14 = vsel %vm379_vm4, %v780_v10, %v1810_v1  ;;  %v789_v22 = vsel %vm379_vm4, %v781_v5, %v1811_v11  ;;  %v1218_v62 = vunpack.c.l.bf16 %v2703_v16 }
 0x116   :  { %1198 = vst.msk [vmem:[%s3062_s4 + $0x24] sm:$0xf] %vm952_vm10, %v2723_v3  ;;  %v1214_v9 = vunpack.c.l.bf16 %v2723_v3  ;;  %v1219_v37 = vunpack.c.l.bf16 %v2738_v30 }
 0x117   :  { %v1819_v8 = vpop.permute.xlu1 %1818  ;;  %1203 = vst.msk [vmem:[%s3062_s4 + $0x38] sm:$0xf] %vm952_vm10, %v2738_v30  ;;  %v1246_v0 = vsel %vm361_vm2, %v1218_v62, 0.0 }
 0x118   :  { %v1814_v6 = vpop.permute.xlu0 %1813  ;;  %v1821_v41 = vunpack.i.h.bf16 %v1819_v8  ;;  %v1820_v28 = vunpack.i.l.bf16 %v1819_v8  ;;  %v1238_v48 = vsel %vm361_vm2, %v1214_v9, 0.0 }
 0x119   :  { %v1816_v20 = vunpack.i.h.bf16 %v1814_v6  ;;  %v1815_v61 = vunpack.i.l.bf16 %v1814_v6  ;;  %v1239_v24 = vadd.f32 %v1238_v48, %v1237_v17 }
 0x11b   :  { %v796_v34 = vsel %vm388_vm5, %v788_v14, %v1815_v61  ;;  %v797_v42 = vsel %vm388_vm5, %v789_v22, %v1816_v20  ;;  %v1241_v21 = vadd.f32 %v1240_v59, %v1239_v24  ;;  %v1170_v26 = vpop.f32.mrf.mxu3  ;;  %v1248_v61 = vsel %vm361_vm2, %v1219_v37, 0.0 }
 0x11c   :  { %v804_v32 = vsel %vm397_vm6, %v796_v34, %v1820_v28  ;;  %v805_v40 = vsel %vm397_vm6, %v797_v42, %v1821_v41  ;;  %v2768_v6 = vpack.c.bf16 %v1170_v26, %v1170_v26 }
 0x11d   :  { %v1243_v58 = vadd.f32 %v1242_v12, %v1241_v21  ;;  %v812_v31 = vsel %vm406_vm7, %v804_v32, %v1825_v53  ;;  %v813_v1 = vsel %vm406_vm7, %v805_v40, %v1826_v44 }
 0x11e   :  { %1204 = vst.msk [vmem:[%s3062_s4 + $0x3c] sm:$0xf] %vm952_vm10, %v2768_v6  ;;  %v1220_v59 = vunpack.c.l.bf16 %v2768_v6 }
 0x11f   :  { %v1245_v5 = vadd.f32 %v1244_v57, %v1243_v58 }
 0x120   :  { %v1829_v54 = vpop.permute.xlu0 %1828  ;;  %v1250_v22 = vsel %vm361_vm2, %v1220_v59, 0.0 }
 0x121   :  { %v1831_v63 = vunpack.i.h.bf16 %v1829_v54  ;;  %v1830_v39 = vunpack.i.l.bf16 %v1829_v54  ;;  %v1247_v14 = vadd.f32 %v1246_v0, %v1245_v5 }
 0x123   :  { %v820_v10 = vsel %vm415_vm8, %v812_v31, %v1830_v39  ;;  %v821_v11 = vsel %vm415_vm8, %v813_v1, %v1831_v63  ;;  %v1249_v25 = vadd.f32 %v1248_v61, %v1247_v14 }
 0x124   :  { %v896_v8 = vpop.f32.mrf.mxu0  ;;  %v829_v20 = vpack.c.bf16 %v821_v11, %v820_v10 }
 0x125   :  { %v2773_v17 = vpack.c.bf16 %v896_v8, %v896_v8  ;;  %v1251_v41 = vadd.f32 %v1250_v22, %v1249_v25 }
 0x126   :  { %1489 = vmatmul.msk.bf16.gmra.mxu2 %vm858_vm9, %v829_v20 }
 0x127   :  { %953 = vst.msk [vmem:[%s3063_s3] sm:$0xf] %vm952_vm10, %v2773_v17  ;;  %v1252_v28 = vrot.slane %v1251_v41, 4  ;;  %v969_v34 = vunpack.c.l.bf16 %v2773_v17 }
 0x129   :  { %v1253_v48 = vadd.f32 %v1252_v28, %v1251_v41  ;;  %v985_v53 = vsel %vm361_vm2, %v969_v34, 0.0 }
 0x12b   :  { %v1254_v44 = vrot.slane %v1253_v48, 2 }
 0x12c   :  { %v898_v29 = vpop.f32.mrf.mxu0 }
 0x12d   :  { %v2791_v42 = vpack.c.bf16 %v898_v29, %v898_v29  ;;  %v1255_v32 = vadd.f32 %v1254_v44, %v1253_v48 }
 0x12f   :  { %954 = vst.msk [vmem:[%s3063_s3 + $0x4] sm:$0xf] %vm952_vm10, %v2791_v42  ;;  %v970_v24 = vunpack.c.l.bf16 %v2791_v42  ;;  %v1256_v21 = vrot.slane %v1255_v32, 1 }
 0x131   :  { %v986_v12 = vsel %vm361_vm2, %v970_v24, 0.0  ;;  %v2805_v54 = vadd.f32 %v1256_v21, %v1255_v32 }
 0x132   :  { %v987_v40 = vadd.f32 %v986_v12, %v985_v53 }
 0x133   :  { %v2808_v57 = vmul.f32 0.0078125, %v2805_v54 }
 0x135   :  { %v1259_v63 = vsub.f32 %v1205_v33, %v2808_v57  ;;  %v1260_v39 = vsub.f32 %v1206_v4, %v2808_v57  ;;  %v1261_v58 = vsub.f32 %v1207_v18, %v2808_v57  ;;  %v1262_v31 = vsub.f32 %v1208_v51, %v2808_v57 }
 0x136   :  { %v1263_v1 = vsub.f32 %v1209_v55, %v2808_v57  ;;  %v1264_v60 = vsub.f32 %v1210_v38, %v2808_v57  ;;  %v1265_v15 = vsub.f32 %v1211_v13, %v2808_v57  ;;  %v1266_v23 = vsub.f32 %v1212_v50, %v2808_v57 }
 0x137   :  { %v1275_v0 = vmul.f32 %v1259_v63, %v1259_v63  ;;  %v1276_v26 = vmul.f32 %v1260_v39, %v1260_v39  ;;  %v1277_v52 = vmul.f32 %v1261_v58, %v1261_v58  ;;  %v1278_v33 = vmul.f32 %v1262_v31, %v1262_v31 }
 0x138   :  { %v1279_v18 = vmul.f32 %v1263_v1, %v1263_v1  ;;  %v1280_v38 = vmul.f32 %v1264_v60, %v1264_v60  ;;  %v1267_v13 = vsub.f32 %v1213_v35, %v2808_v57  ;;  %v1281_v5 = vmul.f32 %v1265_v15, %v1265_v15 }
 0x139   :  { %v1291_v43 = vsel %vm361_vm2, %v1275_v0, 0.0  ;;  %v1292_v51 = vsel %vm361_vm2, %v1276_v26, 0.0  ;;  %v1294_v45 = vsel %vm361_vm2, %v1277_v52, 0.0  ;;  %v1296_v11 = vsel %vm361_vm2, %v1278_v33, 0.0 }
 0x13a   :  { %v1293_v10 = vadd.f32 %v1292_v51, %v1291_v43  ;;  %v1298_v8 = vsel %vm361_vm2, %v1279_v18, 0.0  ;;  %v1268_v61 = vsub.f32 %v1214_v9, %v2808_v57  ;;  %v1282_v14 = vmul.f32 %v1266_v23, %v1266_v23 }
 0x13b   :  { %v1300_v25 = vsel %vm361_vm2, %v1280_v38, 0.0  ;;  %v1269_v35 = vsub.f32 %v1215_v2, %v2808_v57  ;;  %v1283_v41 = vmul.f32 %v1267_v13, %v1267_v13  ;;  %v1302_v3 = vsel %vm361_vm2, %v1281_v5, 0.0 }
 0x13c   :  { %v1295_v7 = vadd.f32 %v1294_v45, %v1293_v10  ;;  %v1270_v44 = vsub.f32 %v1216_v46, %v2808_v57  ;;  %v1284_v53 = vmul.f32 %v1268_v61, %v1268_v61  ;;  %v1304_v12 = vsel %vm361_vm2, %v1282_v14, 0.0 }
 0x13d   :  { %v1271_v32 = vsub.f32 %v1217_v49, %v2808_v57  ;;  %v1285_v21 = vmul.f32 %v1269_v35, %v1269_v35  ;;  %v1306_v63 = vsel %vm361_vm2, %v1283_v41, 0.0  ;;  %v1273_v49 = vsub.f32 %v1219_v37, %v2808_v57 }
 0x13e   :  { %v1297_v19 = vadd.f32 %v1296_v11, %v1295_v7  ;;  %v1286_v58 = vmul.f32 %v1270_v44, %v1270_v44  ;;  %v1308_v31 = vsel %vm361_vm2, %v1284_v53, 0.0  ;;  %v1274_v52 = vsub.f32 %v1220_v59, %v2808_v57 }
 0x13f   :  { %v1287_v0 = vmul.f32 %v1271_v32, %v1271_v32  ;;  %v1310_v16 = vsel %vm361_vm2, %v1285_v21, 0.0  ;;  %v1289_v18 = vmul.f32 %v1273_v49, %v1273_v49 }
 0x140   :  { %v1299_v22 = vadd.f32 %v1298_v8, %v1297_v19  ;;  %v1312_v33 = vsel %vm361_vm2, %v1286_v58, 0.0  ;;  %v1290_v43 = vmul.f32 %v1274_v52, %v1274_v52 }
 0x141   :  { %v916_v4 = vpop.f32.mrf.mxu2  ;;  %v1314_v30 = vsel %vm361_vm2, %v1287_v0, 0.0  ;;  %v1318_v10 = vsel %vm361_vm2, %v1289_v18, 0.0 }
 0x142   :  { %v2834_v55 = vpack.c.bf16 %v916_v4, %v916_v4  ;;  %v1301_v28 = vadd.f32 %v1300_v25, %v1299_v22  ;;  %v1320_v38 = vsel %vm361_vm2, %v1290_v43, 0.0 }
 0x144   :  { %961 = vst.msk [vmem:[%s3063_s3 + $0x20] sm:$0xf] %vm952_vm10, %v2834_v55  ;;  %v1303_v2 = vadd.f32 %v1302_v3, %v1301_v28 }
 0x145   :  { %v901_v20 = vpop.f32.mrf.mxu0 }
 0x146   :  { %v2849_v50 = vpack.c.bf16 %v901_v20, %v901_v20  ;;  %v1305_v46 = vadd.f32 %v1304_v12, %v1303_v2 }
 0x148   :  { %955 = vst.msk [vmem:[%s3063_s3 + $0x8] sm:$0xf] %vm952_vm10, %v2849_v50  ;;  %v971_v56 = vunpack.c.l.bf16 %v2849_v50  ;;  %v1307_v1 = vadd.f32 %v1306_v63, %v1305_v46 }
 0x149   :  { %v918_v9 = vpop.f32.mrf.mxu2 }
 0x14a   :  { %v988_v29 = vsel %vm361_vm2, %v971_v56, 0.0  ;;  %v2868_v48 = vpack.c.bf16 %v918_v9, %v918_v9 }
 0x14b   :  { %v989_v47 = vadd.f32 %v988_v29, %v987_v40  ;;  %v1272_v40 = vsub.f32 %v1218_v62, %v2808_v57  ;;  %v1309_v62 = vadd.f32 %v1308_v31, %v1307_v1  ;;  %v977_v31 = vunpack.c.l.bf16 %v2834_v55 }
 0x14c   :  { %962 = vst.msk [vmem:[%s3063_s3 + $0x24] sm:$0xf] %vm952_vm10, %v2868_v48  ;;  %v978_v0 = vunpack.c.l.bf16 %v2868_v48 }
 0x14d   :  { %v903_v36 = vpop.f32.mrf.mxu0  ;;  %v1288_v60 = vmul.f32 %v1272_v40, %v1272_v40  ;;  %v1311_v4 = vadd.f32 %v1310_v16, %v1309_v62 }
 0x14e   :  { %v2883_v39 = vpack.c.bf16 %v903_v36, %v903_v36  ;;  %v1002_v55 = vsel %vm361_vm2, %v978_v0, 0.0 }
 0x14f   :  { %v1313_v37 = vadd.f32 %v1312_v33, %v1311_v4  ;;  %v1316_v51 = vsel %vm361_vm2, %v1288_v60, 0.0 }
 0x150   :  { %956 = vst.msk [vmem:[%s3063_s3 + $0xc] sm:$0xf] %vm952_vm10, %v2883_v39  ;;  %v972_v27 = vunpack.c.l.bf16 %v2883_v39 }
 0x151   :  { %v1315_v45 = vadd.f32 %v1314_v30, %v1313_v37 }
 0x152   :  { %v990_v26 = vsel %vm361_vm2, %v972_v27, 0.0 }
 0x153   :  { %v991_v15 = vadd.f32 %v990_v26, %v989_v47  ;;  %v1317_v23 = vadd.f32 %v1316_v51, %v1315_v45  ;;  %v1000_v26 = vsel %vm361_vm2, %v977_v31, 0.0 }
 0x155   :  { %v1319_v6 = vadd.f32 %v1318_v10, %v1317_v23 }
 0x157   :  { %v1321_v59 = vadd.f32 %v1320_v38, %v1319_v6 }
 0x159   :  { %v1322_v57 = vrot.slane %v1321_v59, 4 }
 0x15b   :  { %v1323_v11 = vadd.f32 %v1322_v57, %v1321_v59 }
 0x15d   :  { %v1324_v5 = vrot.slane %v1323_v11, 2 }
 0x15f   :  { %v1325_v8 = vadd.f32 %v1324_v5, %v1323_v11 }
 0x161   :  { %v1326_v20 = vrot.slane %v1325_v8, 1 }
 0x162   :  { %v921_v7 = vpop.f32.mrf.mxu2 }
 0x163   :  { %v2910_v13 = vpack.c.bf16 %v921_v7, %v921_v7  ;;  %v1327_v19 = vadd.f32 %v1326_v20, %v1325_v8 }
 0x165   :  { %963 = vst.msk [vmem:[%s3063_s3 + $0x28] sm:$0xf] %vm952_vm10, %v2910_v13  ;;  %v1328_v22 = vsel %vm1092_vm11, %v2805_v54, %v1327_v19  ;;  %v979_v52 = vunpack.c.l.bf16 %v2910_v13 }
 0x166   :  { %1329 = vst.msk [vmem:[%s3064_s6] sm:$0x3] %vm1094_vm12, %v1328_v22 }
 0x167   :  { %v1004_v4 = vsel %vm361_vm2, %v979_v52, 0.0 }
 0x16a   :  { %v923_v61 = vpop.f32.mrf.mxu2 }
 0x16b   :  { %v2917_v14 = vpack.c.bf16 %v923_v61, %v923_v61  ;;  %v906_v25 = vpop.f32.mrf.mxu0 }
 0x16c   :  { %v2921_v35 = vpack.c.bf16 %v906_v25, %v906_v25 }
 0x16d   :  { %964 = vst.msk [vmem:[%s3063_s3 + $0x2c] sm:$0xf] %vm952_vm10, %v2917_v14  ;;  %v980_v33 = vunpack.c.l.bf16 %v2917_v14 }
 0x16e   :  { %957 = vst.msk [vmem:[%s3063_s3 + $0x10] sm:$0xf] %vm952_vm10, %v2921_v35  ;;  %v973_v53 = vunpack.c.l.bf16 %v2921_v35 }
 0x16f   :  { %v1006_v30 = vsel %vm361_vm2, %v980_v33, 0.0 }
 0x170   :  { %v992_v2 = vsel %vm361_vm2, %v973_v53, 0.0 }
 0x171   :  { %v993_v63 = vadd.f32 %v992_v2, %v991_v15 }
 0x173   :  { %v908_v54 = vpop.f32.mrf.mxu0 }
 0x174   :  { %v2937_v41 = vpack.c.bf16 %v908_v54, %v908_v54 }
 0x176   :  { %958 = vst.msk [vmem:[%s3063_s3 + $0x14] sm:$0xf] %vm952_vm10, %v2937_v41  ;;  %v974_v47 = vunpack.c.l.bf16 %v2937_v41 }
 0x178   :  { %v994_v21 = vsel %vm361_vm2, %v974_v47, 0.0 }
 0x179   :  { %v995_v58 = vadd.f32 %v994_v21, %v993_v63 }
 0x183   :  { %v926_v3 = vpop.f32.mrf.mxu2 }
 0x184   :  { %v2944_v9 = vpack.c.bf16 %v926_v3, %v926_v3 }
 0x186   :  { %965 = vst.msk [vmem:[%s3063_s3 + $0x30] sm:$0xf] %vm952_vm10, %v2944_v9  ;;  %v981_v43 = vunpack.c.l.bf16 %v2944_v9 }
 0x188   :  { %v1008_v45 = vsel %vm361_vm2, %v981_v43, 0.0 }
 0x18b   :  { %v928_v28 = vpop.f32.mrf.mxu2 }
 0x18c   :  { %v2951_v29 = vpack.c.bf16 %v928_v28, %v928_v28  ;;  %v911_v44 = vpop.f32.mrf.mxu0 }
 0x18d   :  { %v2954_v12 = vpack.c.bf16 %v911_v44, %v911_v44 }
 0x18e   :  { %966 = vst.msk [vmem:[%s3063_s3 + $0x34] sm:$0xf] %vm952_vm10, %v2951_v29  ;;  %v982_v10 = vunpack.c.l.bf16 %v2951_v29 }
 0x18f   :  { %959 = vst.msk [vmem:[%s3063_s3 + $0x18] sm:$0xf] %vm952_vm10, %v2954_v12  ;;  %v975_v32 = vunpack.c.l.bf16 %v2954_v12 }
 0x190   :  { %v1010_v59 = vsel %vm361_vm2, %v982_v10, 0.0 }
 0x191   :  { %v996_v46 = vsel %vm361_vm2, %v975_v32, 0.0 }
 0x192   :  { %v997_v49 = vadd.f32 %v996_v46, %v995_v58 }
 0x194   :  { %v913_v36 = vpop.f32.mrf.mxu0 }
 0x195   :  { %v2977_v40 = vpack.c.bf16 %v913_v36, %v913_v36 }
 0x197   :  { %960 = vst.msk [vmem:[%s3063_s3 + $0x1c] sm:$0xf] %vm952_vm10, %v2977_v40  ;;  %v976_v1 = vunpack.c.l.bf16 %v2977_v40 }
 0x199   :  { %v998_v16 = vsel %vm361_vm2, %v976_v1, 0.0 }
 0x19a   :  { %v999_v62 = vadd.f32 %v998_v16, %v997_v49 }
 0x19c   :  { %v1001_v60 = vadd.f32 %v1000_v26, %v999_v62 }
 0x19e   :  { %v1003_v15 = vadd.f32 %v1002_v55, %v1001_v60 }
 0x1a0   :  { %v1005_v18 = vadd.f32 %v1004_v4, %v1003_v15 }
 0x1a2   :  { %v1007_v37 = vadd.f32 %v1006_v30, %v1005_v18 }
 0x1a4   :  { %v1009_v38 = vadd.f32 %v1008_v45, %v1007_v37 }
 0x1a6   :  { %v1011_v7 = vadd.f32 %v1010_v59, %v1009_v38 }
 0x1a9   :  { %v931_v48 = vpop.f32.mrf.mxu2 }
 0x1aa   :  { %v2995_v51 = vpack.c.bf16 %v931_v48, %v931_v48 }
 0x1ac   :  { %967 = vst.msk [vmem:[%s3063_s3 + $0x38] sm:$0xf] %vm952_vm10, %v2995_v51  ;;  %v983_v23 = vunpack.c.l.bf16 %v2995_v51 }
 0x1ae   :  { %v1012_v57 = vsel %vm361_vm2, %v983_v23, 0.0 }
 0x1af   :  { %v1013_v5 = vadd.f32 %v1012_v57, %v1011_v7 }
 0x1b1   :  { %v933_v6 = vpop.f32.mrf.mxu2 }
 0x1b2   :  { %v3009_v11 = vpack.c.bf16 %v933_v6, %v933_v6 }
 0x1b4   :  { %968 = vst.msk [vmem:[%s3063_s3 + $0x3c] sm:$0xf] %vm952_vm10, %v3009_v11  ;;  %v984_v13 = vunpack.c.l.bf16 %v3009_v11 }
 0x1b6   :  { %v1014_v8 = vsel %vm361_vm2, %v984_v13, 0.0 }
 0x1b7   :  { %v1015_v20 = vadd.f32 %v1014_v8, %v1013_v5 }
 0x1b9   :  { %v1016_v19 = vrot.slane %v1015_v20, 4 }
 0x1bb   :  { %v1017_v61 = vadd.f32 %v1016_v19, %v1015_v20 }
 0x1bd   :  { %v1018_v14 = vrot.slane %v1017_v61, 2 }
 0x1bf   :  { %v1019_v25 = vadd.f32 %v1018_v14, %v1017_v61 }
 0x1c1   :  { %v1020_v22 = vrot.slane %v1019_v25, 1 }
 0x1c3   :  { %v3018_v54 = vadd.f32 %v1020_v22, %v1019_v25 }
 0x1c5   :  { %v1022_v3 = vmul.f32 0.0078125, %v3018_v54 }
 0x1c7   :  { %v1023_v9 = vsub.f32 %v969_v34, %v1022_v3  ;;  %v1024_v28 = vsub.f32 %v970_v24, %v1022_v3  ;;  %v1025_v29 = vsub.f32 %v971_v56, %v1022_v3  ;;  %v1026_v44 = vsub.f32 %v972_v27, %v1022_v3 }
 0x1c8   :  { %v1031_v2 = vsub.f32 %v977_v31, %v1022_v3  ;;  %v1032_v21 = vsub.f32 %v978_v0, %v1022_v3  ;;  %v1033_v63 = vsub.f32 %v979_v52, %v1022_v3  ;;  %v1034_v36 = vsub.f32 %v980_v33, %v1022_v3 }
 0x1c9   :  { %v1039_v46 = vmul.f32 %v1023_v9, %v1023_v9  ;;  %v1040_v40 = vmul.f32 %v1024_v28, %v1024_v28  ;;  %v1027_v58 = vsub.f32 %v973_v53, %v1022_v3  ;;  %v1041_v17 = vmul.f32 %v1025_v29, %v1025_v29 }
 0x1ca   :  { %v1028_v34 = vsub.f32 %v974_v47, %v1022_v3  ;;  %v1042_v42 = vmul.f32 %v1026_v44, %v1026_v44  ;;  %v1029_v39 = vsub.f32 %v975_v32, %v1022_v3  ;;  %v1030_v0 = vsub.f32 %v976_v1, %v1022_v3 }
 0x1cb   :  { %v1055_v24 = vsel %vm361_vm2, %v1039_v46, 0.0  ;;  %v1056_v50 = vsel %vm361_vm2, %v1040_v40, 0.0  ;;  %v1043_v27 = vmul.f32 %v1027_v58, %v1027_v58  ;;  %v1058_v31 = vsel %vm361_vm2, %v1041_v17, 0.0 }
 0x1cc   :  { %v1057_v56 = vadd.f32 %v1056_v50, %v1055_v24  ;;  %v1044_v35 = vmul.f32 %v1028_v34, %v1028_v34  ;;  %v1060_v53 = vsel %vm361_vm2, %v1042_v42, 0.0  ;;  %v1045_v41 = vmul.f32 %v1029_v39, %v1029_v39 }
 0x1cd   :  { %v1062_v47 = vsel %vm361_vm2, %v1043_v27, 0.0  ;;  %v1046_v26 = vmul.f32 %v1030_v0, %v1030_v0  ;;  %v1047_v55 = vmul.f32 %v1031_v2, %v1031_v2  ;;  %v1048_v33 = vmul.f32 %v1032_v21, %v1032_v21 }
 0x1ce   :  { %v1059_v49 = vadd.f32 %v1058_v31, %v1057_v56  ;;  %v1064_v52 = vsel %vm361_vm2, %v1044_v35, 0.0  ;;  %v1066_v12 = vsel %vm361_vm2, %v1045_v41, 0.0  ;;  %v1035_v4 = vsub.f32 %v981_v43, %v1022_v3 }
 0x1cf   :  { %v1068_v15 = vsel %vm361_vm2, %v1046_v26, 0.0  ;;  %v1049_v18 = vmul.f32 %v1033_v63, %v1033_v63  ;;  %v1070_v30 = vsel %vm361_vm2, %v1047_v55, 0.0  ;;  %v1036_v48 = vsub.f32 %v982_v10, %v1022_v3 }
 0x1d0   :  { %v1061_v16 = vadd.f32 %v1060_v53, %v1059_v49  ;;  %v1050_v45 = vmul.f32 %v1034_v36, %v1034_v36  ;;  %v1072_v38 = vsel %vm361_vm2, %v1048_v33, 0.0  ;;  %v1037_v59 = vsub.f32 %v983_v23, %v1022_v3 }
 0x1d1   :  { %v1051_v57 = vmul.f32 %v1035_v4, %v1035_v4  ;;  %v1074_v11 = vsel %vm361_vm2, %v1049_v18, 0.0  ;;  %v1038_v5 = vsub.f32 %v984_v13, %v1022_v3  ;;  %v1052_v8 = vmul.f32 %v1036_v48, %v1036_v48 }
 0x1d2   :  { %v1063_v62 = vadd.f32 %v1062_v47, %v1061_v16  ;;  %v1076_v43 = vsel %vm361_vm2, %v1050_v45, 0.0  ;;  %v1053_v19 = vmul.f32 %v1037_v59, %v1037_v59 }
 0x1d3   :  { %v1078_v61 = vsel %vm361_vm2, %v1051_v57, 0.0  ;;  %v1054_v14 = vmul.f32 %v1038_v5, %v1038_v5  ;;  %v1080_v25 = vsel %vm361_vm2, %v1052_v8, 0.0 }
 0x1d4   :  { %v1065_v60 = vadd.f32 %v1064_v52, %v1063_v62  ;;  %v1082_v51 = vsel %vm361_vm2, %v1053_v19, 0.0 }
 0x1d5   :  { %v1084_v9 = vsel %vm361_vm2, %v1054_v14, 0.0 }
 0x1d6   :  { %v1067_v32 = vadd.f32 %v1066_v12, %v1065_v60 }
 0x1d8   :  { %v1069_v1 = vadd.f32 %v1068_v15, %v1067_v32 }
 0x1da   :  { %v1071_v37 = vadd.f32 %v1070_v30, %v1069_v1 }
 0x1dc   :  { %v1073_v6 = vadd.f32 %v1072_v38, %v1071_v37 }
 0x1de   :  { %v1075_v7 = vadd.f32 %v1074_v11, %v1073_v6 }
 0x1e0   :  { %v1077_v20 = vadd.f32 %v1076_v43, %v1075_v7 }
 0x1e2   :  { %v1079_v10 = vadd.f32 %v1078_v61, %v1077_v20 }
 0x1e4   :  { %v1081_v22 = vadd.f32 %v1080_v25, %v1079_v10 }
 0x1e6   :  { %v1083_v23 = vadd.f32 %v1082_v51, %v1081_v22 }
 0x1e8   :  { %v1085_v28 = vadd.f32 %v1084_v9, %v1083_v23 }
 0x1ea   :  { %v1086_v29 = vrot.slane %v1085_v28, 4 }
 0x1ec   :  { %v1087_v13 = vadd.f32 %v1086_v29, %v1085_v28 }
 0x1ee   :  { %v1088_v3 = vrot.slane %v1087_v13, 2 }
 0x1f0   :  { %v1089_v44 = vadd.f32 %v1088_v3, %v1087_v13 }
 0x1f2   :  { %v1090_v2 = vrot.slane %v1089_v44, 1 }
 0x1f4   :  { %v1091_v21 = vadd.f32 %v1090_v2, %v1089_v44 }
 0x1f6   :  { %v1093_v63 = vsel %vm1092_vm11, %v3018_v54, %v1091_v21 }
 0x1f7   :  { %1095 = vst.msk [vmem:[%s3065_s5] sm:$0x3] %vm1094_vm12, %v1093_v63 }

// kernel: basic_block_forward.4
= control target key start
LH: loop header
LB: loop body
LE: loop exit
PB: predicated region body
PF: predicated region fallthrough
CT: control target
= control target key end

     0   :  { %vm20_vm0 = vcmask 64512   ;;  %vm22_vm1 = vcmask 58368   ;;  %v1662_v2 = vmov 0.0   ;;  %vm28_vm2 = vcmask 57344   ;;  %s1666_s17 = smov 32   ;;  %s1667_s18 = smov 40   ;;  %s2532_s0 = inlined_call_operand.vmem [shape: bf16[2,64,8], index: 0, kind: input, shape index: {}]   ;;  %s2533_s1 = inlined_call_operand.vmem [shape: f32[1,8], index: 1, kind: input, shape index: {}]   ;;  %s2534_s2 = inlined_call_operand.vmem [shape: f32[1,8], index: 2, kind: input, shape index: {}]   ;;  %s2535_s3 = inlined_call_operand.vmem [shape: bf16[72,8], index: 3, kind: input, shape index: {}]   ;;  %s2536_s4 = inlined_call_operand.vmem [shape: bf16[2,64,8], index: 4, kind: output, shape index: {0}]   ;;  %s2537_s5 = inlined_call_operand.vmem [shape: f32[1,2,8], index: 5, kind: output, shape index: {1}]  }
   0x1   :  { %v1307_v0 = vld [vmem:[%s2532_s0 + $0x8] sm:$0xff]   ;;  %v1308_v1 = vld [vmem:[%s2532_s0 + $0x10] sm:$0xff]   ;;  %21 = vst.msk [vmem:[#allocation2] sm:$0xff] %vm20_vm0, %v1662_v2  ;;  %v1658_v5 = vld [vmem:[%s2533_s1] ss:$0 sm:$0xff]  ;;  %s1668_s19 = smov 48  }
   0x2   :  { %v1282_v3 = vunpack.c.h.bf16 %v1307_v0  ;;  %v1285_v4 = vunpack.c.l.bf16 %v1308_v1  ;;  %v1715_v6 = vld [vmem:[%s2534_s2] ss:$0 sm:$0xff]  ;;  %v1286_v7 = vunpack.c.h.bf16 %v1308_v1  ;;  %23 = vst.msk [vmem:[#allocation2 + $0x8] sm:$0x3] %vm22_vm1, %v1662_v2  ;;  %v1309_v14 = vld [vmem:[%s2532_s0 + $0x18] sm:$0xff]   ;;  %v1281_v18 = vunpack.c.l.bf16 %v1307_v0  ;;  %v1311_v23 = vld [vmem:[%s2532_s0 + $0x28] sm:$0xff]  }
   0x3   :  { %v1276_v10 = vld [vmem:[%s2532_s0] sm:$0xff]   ;;  %25 = vst.msk [vmem:[#allocation2 + $0x90] sm:$0xff] %vm20_vm0, %v1662_v2  ;;  %v1289_v21 = vunpack.c.l.bf16 %v1309_v14  ;;  %v1297_v33 = vunpack.c.l.bf16 %v1311_v23  ;;  %v1312_v34 = vld [vmem:[%s2532_s0 + $0x30] sm:$0xff]   ;;  %v1290_v38 = vunpack.c.h.bf16 %v1309_v14  ;;  %v1298_v40 = vunpack.c.h.bf16 %v1311_v23  ;;  %v1767_v43 = vld [vmem:[%s2532_s0 + $0x38] sm:$0xff]   ;;  %s1669_s20 = smov 64   ;;  %s1670_s21 = smov 56  }
   0x4   :  { %v68_v8 = vmul.f32 %v1658_v5, %v1282_v3  ;;  %v69_v9 = vmul.f32 %v1658_v5, %v1285_v4  ;;  %26 = vst.msk [vmem:[#allocation2 + $0x98] sm:$0x3] %vm22_vm1, %v1662_v2  ;;  %v1277_v13 = vunpack.c.l.bf16 %v1276_v10  ;;  %v70_v15 = vmul.f32 %v1658_v5, %v1286_v7  ;;  %v1772_v44 = vld [vmem:[%s2533_s1] ss:$0 sm:$0xff]  ;;  %s1663_s1 = smov 8  }
   0x5   :  { %37 = vst.msk [vmem:[#allocation2 + $0x19] sm:$0x1] %vm28_vm2, %v1662_v2  ;;  %v1278_v19 = vunpack.c.h.bf16 %v1276_v10  ;;  %v71_v25 = vmul.f32 %v1658_v5, %v1289_v21  ;;  %v67_v27 = vmul.f32 %v1658_v5, %v1281_v18  ;;  %v1301_v42 = vunpack.c.l.bf16 %v1312_v34  ;;  %v1796_v54 = vld [vmem:[%s2534_s2] ss:$0 sm:$0xff]  ;;  %s1664_s2 = smov 16  }
   0x6   :  { %v80_v11 = vadd.f32 %v1715_v6, %v68_v8  ;;  %v81_v12 = vadd.f32 %v1715_v6, %v69_v9  ;;  %29 = vst.msk [vmem:[#allocation2 + $0x10] sm:$0x1] %vm28_vm2, %v1662_v2  ;;  %v65_v20 = vmul.f32 %v1658_v5, %v1277_v13  ;;  %v82_v22 = vadd.f32 %v1715_v6, %v70_v15 }
   0x7   :  { %30 = vst.msk [vmem:[#allocation2 + $0x20] sm:$0x1] %vm28_vm2, %v1662_v2  ;;  %v66_v26 = vmul.f32 %v1658_v5, %v1278_v19  ;;  %v83_v30 = vadd.f32 %v1715_v6, %v71_v25  ;;  %v79_v32 = vadd.f32 %v1715_v6, %v67_v27  ;;  %v72_v45 = vmul.f32 %v1658_v5, %v1290_v38  ;;  %v1310_v5 = vld [vmem:[%s2532_s0 + $0x20] sm:$0xff]   ;;  %s1665_s0 = smov 24  }
   0x8   :  { %v88_v16 = vmax.f32 %v80_v11, 0.0  ;;  %v89_v17 = vmax.f32 %v81_v12, 0.0  ;;  %v77_v24 = vadd.f32 %v1715_v6, %v65_v20  ;;  %31 = vst.msk [vmem:[#allocation2 + $0x30] sm:$0x1] %vm28_vm2, %v1662_v2  ;;  %v90_v28 = vmax.f32 %v82_v22, 0.0 }
   0x9   :  { %32 = vst.msk [vmem:[#allocation2 + $0x40] sm:$0x1] %vm28_vm2, %v1662_v2  ;;  %v78_v31 = vadd.f32 %v1715_v6, %v66_v26  ;;  %v91_v35 = vmax.f32 %v83_v30, 0.0  ;;  %v87_v37 = vmax.f32 %v79_v32, 0.0  ;;  %v524_v47 = vmul.f32 %v1772_v44, %v1297_v33  ;;  %v1786_v51 = vld [vmem:[#allocation2 + $0x1] sm:$0xff] }
   0xa   :  { %96 = vst.msk [vmem:[#allocation2 + $0x41] sm:$0xff] %vm20_vm0, %v88_v16  ;;  %v85_v29 = vmax.f32 %v77_v24, 0.0  ;;  %v1302_v48 = vunpack.c.h.bf16 %v1312_v34  ;;  %v1305_v49 = vunpack.c.l.bf16 %v1767_v43  ;;  %v525_v50 = vmul.f32 %v1772_v44, %v1298_v40  ;;  %v1788_v52 = vld [vmem:[#allocation2 + $0x2] sm:$0xff] }
   0xb   :  { %97 = vst.msk [vmem:[#allocation2 + $0x51] sm:$0xff] %vm20_vm0, %v89_v17  ;;  %v86_v36 = vmax.f32 %v78_v31, 0.0  ;;  %v526_v53 = vmul.f32 %v1772_v44, %v1301_v42  ;;  %v84_v55 = vadd.f32 %v1715_v6, %v72_v45  ;;  %v536_v59 = vadd.f32 %v1796_v54, %v524_v47 }
   0xc   :  { %33 = vst.msk [vmem:[#allocation2 + $0x50] sm:$0x1] %vm28_vm2, %v1662_v2  ;;  %v527_v62 = vmul.f32 %v1772_v44, %v1302_v48  ;;  %v528_v63 = vmul.f32 %v1772_v44, %v1305_v49  ;;  %v537_v0 = vadd.f32 %v1796_v54, %v525_v50  ;;  %v1293_v9 = vunpack.c.l.bf16 %v1310_v5 }
   0xd   :  { %98 = vst.msk [vmem:[#allocation2 + $0x61] sm:$0xff] %vm20_vm0, %v90_v28  ;;  %v538_v3 = vadd.f32 %v1796_v54, %v526_v53  ;;  %v92_v6 = vmax.f32 %v84_v55, 0.0  ;;  %v1294_v10 = vunpack.c.h.bf16 %v1310_v5  ;;  %v544_v11 = vmax.f32 %v536_v59, 0.0 }
   0xe   :  { %93 = vst.msk [vmem:[#allocation2 + $0x11] sm:$0xff] %vm20_vm0, %v85_v29  ;;  %v539_v12 = vadd.f32 %v1796_v54, %v527_v62  ;;  %v545_v13 = vmax.f32 %v537_v0, 0.0  ;;  %v522_v14 = vmul.f32 %v1772_v44, %v1293_v9  ;;  %v540_v16 = vadd.f32 %v1796_v54, %v528_v63 }
   0xf   :  { %34 = vst.msk [vmem:[#allocation2 + $0x60] sm:$0x1] %vm28_vm2, %v1662_v2  ;;  %v523_v15 = vmul.f32 %v1772_v44, %v1294_v10  ;;  %v546_v17 = vmax.f32 %v538_v3, 0.0  ;;  %vm1019_vm3 = vcmask 1043456   ;;  %vm438_vm4 = vcmask 130048  }
  0x10   :  { %99 = vst.msk [vmem:[#allocation2 + $0x71] sm:$0xff] %vm20_vm0, %v91_v35  ;;  %v534_v22 = vadd.f32 %v1796_v54, %v522_v14  ;;  %v547_v26 = vmax.f32 %v539_v12, 0.0  ;;  %v548_v31 = vmax.f32 %v540_v16, 0.0  ;;  %vm447_vm5 = vcmask 195584  }
  0x11   :  { %v1758_v39 = vld [vmem:[#allocation2 + $0x41] sm:$0xff]  ;;  %94 = vst.msk [vmem:[#allocation2 + $0x21] sm:$0xff] %vm20_vm0, %v86_v36  ;;  %vm456_vm6 = vcmask 261120   ;;  %vm465_vm7 = vcmask 326656   ;;  %vm474_vm8 = vcmask 392192   ;;  %vm483_vm9 = vcmask 457728  }
  0x12   :  { %v1762_v41 = vld [vmem:[#allocation2 + $0x51] sm:$0xff]  ;;  %95 = vst.msk [vmem:[#allocation2 + $0x31] sm:$0xff] %vm20_vm0, %v87_v37  ;;  %v1862_v25 = vld [vmem:[#allocation2 + $0x40] sm:$0xff]  ;;  %v542_v29 = vmax.f32 %v534_v22, 0.0  ;;  %vm492_vm10 = vcmask 523264   ;;  %vm994_vm11 = vcmask 588800  }
  0x13   :  { %v1777_v46 = vpack.i.bf16 %v1762_v41, %v1758_v39  ;;  %35 = vst.msk [vmem:[#allocation2 + $0x70] sm:$0x1] %vm28_vm2, %v1662_v2  ;;  %v1865_v28 = vld [vmem:[#allocation2 + $0x50] sm:$0xff]  ;;  %vm1088_vm12 = vcmask 60416   ;;  %vm1228_vm13 = vcmask 1040384  }
  0x14   :  { %36 = vst.msk [vmem:[#allocation2 + $0x80] sm:$0x1] %vm28_vm2, %v1662_v2  ;;  %v1803_v57 = vld [vmem:[#allocation2 + $0x61] sm:$0xff] }
  0x15   :  { %1349 = vrot.lane.b32.xlu1 %v1777_v46, %s1663_s1  ;;  %v1801_v56 = vld [vmem:[#allocation2 + $0x11] sm:$0xff]  ;;  %38 = vst.msk [vmem:[#allocation2 + $0x29] sm:$0x1] %vm28_vm2, %v1662_v2  ;;  %v1408_v55 = vpack.i.bf16 %v1803_v57, %v1762_v41 }
  0x16   :  { %v1805_v58 = vld [vmem:[#allocation2 + $0x12] sm:$0xff]  ;;  %v1338_v60 = vpack.i.bf16 %v1801_v56, %v1786_v51  ;;  %39 = vst.msk [vmem:[#allocation2 + $0x39] sm:$0x1] %vm28_vm2, %v1662_v2  ;;  %v1880_v37 = vld [vmem:[#allocation2 + $0x60] sm:$0xff] }
  0x17   :  { %v1358_v61 = vpack.i.bf16 %v1805_v58, %v1788_v52  ;;  %v1819_v1 = vld [vmem:[#allocation2 + $0x71] sm:$0xff]  ;;  %40 = vst.msk [vmem:[#allocation2 + $0x49] sm:$0x1] %vm28_vm2, %v1662_v2  ;;  %v1388_v45 = vpack.i.bf16 %v1880_v37, %v1865_v28 }
  0x18   :  { %1339 = vrot.lane.b32.xlu0 %v1338_v60, %s1663_s1  ;;  %v1827_v4 = vpack.i.bf16 %v1819_v1, %v1803_v57  ;;  %41 = vst.msk [vmem:[#allocation2 + $0x59] sm:$0x1] %vm28_vm2, %v1662_v2  ;;  %v1835_v7 = vld [vmem:[#allocation2 + $0x21] sm:$0xff]  ;;  %v1871_v33 = vld [vmem:[#allocation2 + $0x10] sm:$0xff] }
  0x19   :  { %1359 = vrot.lane.b32.xlu2 %v1358_v61, %s1664_s2  ;;  %v112_v8 = vld [vmem:[#allocation2 + $0x31] sm:$0xff]  ;;  %42 = vst.msk [vmem:[#allocation2 + $0x69] sm:$0x1] %vm28_vm2, %v1662_v2  ;;  %v1876_v35 = vld [vmem:[#allocation2 + $0x20] sm:$0xff]  ;;  %v1398_v53 = vpack.i.bf16 %v1835_v7, %v1801_v56 }
  0x1a   :  { %43 = vst.msk [vmem:[#allocation2 + $0x79] sm:$0x1] %vm28_vm2, %v1662_v2  ;;  %v1850_v18 = vpack.i.bf16 %v112_v8, %v1835_v7  ;;  %v1855_v21 = vld [vmem:[#allocation2 + $0x30] sm:$0xff]  ;;  %v1378_v42 = vpack.i.bf16 %v1876_v35, %v1871_v33  ;;  %v1403_v50 = vpack.i.bf16 %v1758_v39, %v112_v8 }
  0x1b   :  { %44 = vst.msk [vmem:[#allocation2 + $0x89] sm:$0x1] %vm28_vm2, %v1662_v2  ;;  %v535_v2 = vadd.f32 %v1796_v54, %v523_v15  ;;  %v1883_v38 = vld [vmem:[#allocation2 + $0x70] sm:$0xff]  ;;  %v1383_v48 = vpack.i.bf16 %v1862_v25, %v1855_v21  ;;  %v1423_v56 = vpack.i.bf16 %v1855_v21, %v1876_v35 }
  0x1c   :  { %v119_v19 = vld [vmem:[#allocation2 + $0x22] sm:$0xff]  ;;  %100 = vst.msk [vmem:[#allocation2 + $0x81] sm:$0xff] %vm20_vm0, %v92_v6  ;;  %v1458_v6 = vpack.i.bf16 %v1883_v38, %v1880_v37 }
  0x1d   :  { %1354 = vrot.lane.b32.xlu1 %v1827_v4, %s1663_s1  ;;  %v1853_v20 = vld [vmem:[#allocation2 + $0x32] sm:$0xff]  ;;  %v543_v30 = vmax.f32 %v535_v2, 0.0  ;;  %550 = vst.msk [vmem:[#allocation2 + $0x11] sm:$0xff] %vm20_vm0, %v542_v29  ;;  %v1418_v59 = vpack.i.bf16 %v119_v19, %v1805_v58 }
  0x1e   :  { %v1859_v23 = vld [vmem:[#allocation2 + $0x42] sm:$0xff]  ;;  %v1363_v24 = vpack.i.bf16 %v1853_v20, %v119_v19  ;;  %552 = vst.msk [vmem:[#allocation2 + $0x31] sm:$0xff] %vm20_vm0, %v544_v11 }
  0x1f   :  { %v122_v27 = vld [vmem:[#allocation2 + $0x52] sm:$0xff]  ;;  %553 = vst.msk [vmem:[#allocation2 + $0x41] sm:$0xff] %vm20_vm0, %v545_v13  ;;  %v1508_v61 = vpack.i.bf16 %v1859_v23, %v1853_v20 }
  0x20   :  { %1344 = vrot.lane.b32.xlu0 %v1850_v18, %s1663_s1  ;;  %v123_v32 = vld [vmem:[#allocation2 + $0x62] sm:$0xff]  ;;  %554 = vst.msk [vmem:[#allocation2 + $0x51] sm:$0xff] %vm20_vm0, %v546_v17  ;;  %v1888_v40 = vpack.i.bf16 %v122_v27, %v1859_v23 }
  0x21   :  { %1364 = vrot.lane.b32.xlu2 %v1363_v24, %s1664_s2  ;;  %v1874_v34 = vld [vmem:[#allocation2 + $0x72] sm:$0xff]  ;;  %551 = vst.msk [vmem:[#allocation2 + $0x21] sm:$0xff] %vm20_vm0, %v543_v30  ;;  %v1448_v58 = vpack.i.bf16 %v123_v32, %v122_v27 }
  0x22   :  { %v1373_v36 = vpack.i.bf16 %v1874_v34, %v123_v32  ;;  %555 = vst.msk [vmem:[#allocation2 + $0x61] sm:$0xff] %vm20_vm0, %v547_v26  ;;  %v1518_v26 = vpack.i.bf16 %v1865_v28, %v1862_v25 }
  0x23   :  { %556 = vst.msk [vmem:[#allocation2 + $0x71] sm:$0xff] %vm20_vm0, %v548_v31  ;;  %v1898_v47 = vld [vmem:[#allocation2 + $0x80] sm:$0xff] }
  0x24   :  { %v1393_v49 = vpack.i.bf16 %v1898_v47, %v1883_v38  ;;  %v1916_v60 = vld [vmem:[#allocation2 + $0x81] sm:$0xff]  ;;  %v590_v41 = vld [vmem:[#allocation2 + $0x11] sm:$0xff] }
  0x25   :  { %1374 = vrot.lane.b32.xlu1 %v1373_v36, %s1664_s2  ;;  %v1413_v39 = vpack.i.bf16 %v1916_v60, %v1819_v1  ;;  %v1438_v57 = vpack.i.bf16 %v590_v41, %v1786_v51  ;;  %v575_v62 = vld [vmem:[#allocation2 + $0x12] sm:$0xff] }
  0x26   :  { %v1932_v63 = vld [vmem:[#allocation2 + $0x10] sm:$0xff]  ;;  %v1443_v1 = vpack.i.bf16 %v575_v62, %v1788_v52  ;;  %v1968_v16 = vld [vmem:[#allocation2 + $0x42] sm:$0xff] }
  0x27   :  { %v1948_v7 = vld [vmem:[#allocation2 + $0x30] sm:$0xff] }
  0x28   :  { %1369 = vrot.lane.b32.xlu0 %v1888_v40, %s1664_s2  ;;  %v1934_v0 = vld [vmem:[#allocation2 + $0x20] sm:$0xff]  ;;  %v1953_v10 = vld [vmem:[#allocation2 + $0x32] sm:$0xff] }
  0x29   :  { %1379 = vrot.lane.b32.xlu2 %v1378_v42, %s1665_s0  ;;  %v1453_v51 = vpack.i.bf16 %v1934_v0, %v1932_v63  ;;  %v591_v3 = vld [vmem:[#allocation2 + $0x21] sm:$0xff]  ;;  %v1483_v9 = vpack.i.bf16 %v1948_v7, %v1934_v0  ;;  %v1958_v12 = vld [vmem:[#allocation2 + $0x31] sm:$0xff]  ;;  %v1306_v42 = vunpack.c.h.bf16 %v1767_v43 }
  0x2a   :  { %v1463_v5 = vpack.i.bf16 %v591_v3, %v590_v41  ;;  %v599_v52 = vld [vmem:[#allocation2 + $0x22] sm:$0xff]  ;;  %v594_v13 = vld [vmem:[#allocation2 + $0x51] sm:$0xff]  ;;  %v1488_v14 = vpack.i.bf16 %v1958_v12, %v591_v3 }
  0x2b   :  { %v1473_v8 = vpack.i.bf16 %v599_v52, %v575_v62  ;;  %v1493_v11 = vpack.i.bf16 %v1953_v10, %v599_v52  ;;  %v579_v17 = vld [vmem:[#allocation2 + $0x52] sm:$0xff]  ;;  %v1974_v19 = vld [vmem:[#allocation2 + $0x60] sm:$0xff] }
  0x2c   :  { %v1978_v20 = vpack.i.bf16 %v579_v17, %v1968_v16  ;;  %v595_v2 = vld [vmem:[#allocation2 + $0x61] sm:$0xff]  ;;  %v1993_v29 = vld [vmem:[#allocation2 + $0x70] sm:$0xff] }
  0x2d   :  { %1389 = vrot.lane.b32.xlu1 %v1388_v45, %s1665_s0  ;;  %v1523_v23 = vpack.i.bf16 %v595_v2, %v594_v13  ;;  %v603_v27 = vld [vmem:[#allocation2 + $0x62] sm:$0xff]  ;;  %v1543_v32 = vpack.i.bf16 %v1993_v29, %v1974_v19  ;;  %v529_v45 = vmul.f32 %v1772_v44, %v1306_v42  ;;  %v2046_v3 = vld [vmem:[#allocation2 + $0x91] sm:$0xff] }
  0x2e   :  { %v1533_v31 = vpack.i.bf16 %v603_v27, %v579_v17  ;;  %v2020_v44 = vld [vmem:[#allocation2 + $0x82] sm:$0xff] }
  0x30   :  { %1384 = vrot.lane.b32.xlu0 %v1383_v48, %s1665_s0  ;;  %v2010_v48 = vld [vmem:[#allocation2 + $0x71] sm:$0xff] }
  0x31   :  { %1394 = vrot.lane.b32.xlu2 %v1393_v49, %s1665_s0  ;;  %v2018_v43 = vpack.i.bf16 %v2010_v48, %v595_v2 }
  0x35   :  { %1404 = vrot.lane.b32.xlu1 %v1403_v50, %s1666_s17 }
  0x38   :  { %1399 = vrot.lane.b32.xlu0 %v1398_v53, %s1666_s17 }
  0x39   :  { %1409 = vrot.lane.b32.xlu2 %v1408_v55, %s1666_s17  ;;  %v966_v55 = vld [vmem:[%s2535_s3 + $0x20] sm:$0xf] }
  0x3d   :  { %1419 = vrot.lane.b32.xlu1 %v1418_v59, %s1667_s18  ;;  %v2033_v59 = vld [vmem:[#allocation2 + $0x40] sm:$0xff] }
  0x40   :  { %1414 = vrot.lane.b32.xlu0 %v1413_v39, %s1666_s17  ;;  %v984_v39 = vunpack.c.l.b16 %v966_v55  ;;  %v1593_v55 = vpack.i.bf16 %v1968_v16, %v1953_v10 }
  0x41   :  { %1424 = vrot.lane.b32.xlu2 %v1423_v56, %s1668_s19 }
  0x45   :  { %1434 = vrot.lane.b32.xlu1 %v1363_v24, %s1669_s20 }
  0x48   :  { %1429 = vrot.lane.b32.xlu0 %v1850_v18, %s1670_s21  ;;  %v1972_v18 = vld [vmem:[#allocation2 + $0x50] sm:$0xff] }
  0x49   :  { %1439 = vrot.lane.b32.xlu2 %v1438_v57, %s1663_s1  ;;  %v1513_v22 = vpack.i.bf16 %v1974_v19, %v1972_v18  ;;  %v1573_v57 = vpack.i.bf16 %v2033_v59, %v1948_v7 }
  0x4d   :  { %1449 = vrot.lane.b32.xlu1 %v1448_v58, %s1667_s18  ;;  %v989_v58 = vpack.c.b16 %v984_v39, %v984_v39  ;;  %v1603_v39 = vpack.i.bf16 %v1972_v18, %v2033_v59 }
  0x50   :  { %1444 = vrot.lane.b32.xlu0 %v1443_v1, %s1664_s2 }
  0x51   :  { %1454 = vrot.lane.b32.xlu2 %v1453_v51, %s1665_s0  ;;  %v2044_v51 = vld [vmem:[#allocation2 + $0x90] sm:$0xff] }
  0x55   :  { %1464 = vrot.lane.b32.xlu1 %v1463_v5, %s1666_s17  ;;  %v1274_v5 = vld [vmem:[%s2535_s3 + $0x18] sm:$0xff] }
  0x58   :  { %1459 = vrot.lane.b32.xlu0 %v1458_v6, %s1668_s19 }
  0x59   :  { %1469 = vrot.lane.b32.xlu2 %v1827_v4, %s1670_s21  ;;  %v1960_v4 = vld [vmem:[#allocation2 + $0x41] sm:$0xff] }
  0x5a   :  { %v1965_v15 = vpack.i.bf16 %v594_v13, %v1960_v4  ;;  %v1583_v62 = vpack.i.bf16 %v1960_v4, %v1958_v12  ;;  %v1578_v13 = vpack.i.bf16 %v2044_v51, %v1898_v47  ;;  %v1273_v47 = vld [vmem:[%s2535_s3 + $0x10] sm:$0xff] }
  0x5d   :  { %1479 = vrot.lane.b32.xlu1 %v1373_v36, %s1669_s20  ;;  %v2001_v36 = vld [vmem:[#allocation2 + $0x72] sm:$0xff] }
  0x60   :  { %1474 = vrot.lane.b32.xlu0 %v1473_v8, %s1667_s18 }
  0x61   :  { %1484 = vrot.lane.b32.xlu2 %v1483_v9, %s1668_s19 }
  0x65   :  { %1494 = vrot.lane.b32.xlu1 %v1493_v11, %s1669_s20 }
  0x68   :  { %1489 = vrot.lane.b32.xlu0 %v1488_v14, %s1670_s21 }
  0x69   :  { %1499 = vrot.lane.b32.xlu2 %v1965_v15, %s1663_s1 }
  0x6d   :  { %1509 = vrot.lane.b32.xlu1 %v1508_v61, %s1667_s18  ;;  %v1021_v61 = vsel %vm1019_vm3, %v989_v58, 0 }
  0x6e   :  { %1026 = vmatpush.bf16.msra.mxu0 %v1021_v61  ;;  %1314 = vmatpush.bf16.msra.mxu1 %v1021_v61 }
  0x6f   :  { %1315 = vmatpush.bf16.msra.mxu2 %v1021_v61  ;;  %1316 = vmatpush.bf16.msra.mxu3 %v1021_v61 }
  0x70   :  { %1504 = vrot.lane.b32.xlu0 %v1978_v20, %s1664_s2 }
  0x71   :  { %1514 = vrot.lane.b32.xlu2 %v1513_v22, %s1665_s0 }
  0x72   :  { %1027 = vmatpush.bf16.msra.mxu0 %v1274_v5  ;;  %1317 = vmatpush.bf16.msra.mxu1 %v1274_v5 }
  0x73   :  { %v1985_v24 = vpop.permute.xlu2 %1359  ;;  %1318 = vmatpush.bf16.msra.mxu2 %v1274_v5  ;;  %1319 = vmatpush.bf16.msra.mxu3 %v1274_v5 }
  0x75   :  { %1524 = vrot.lane.b32.xlu1 %v1523_v23, %s1666_s17 }
  0x76   :  { %1028 = vmatpush.bf16.msra.mxu0 %v1273_v47  ;;  %1320 = vmatpush.bf16.msra.mxu1 %v1273_v47 }
  0x77   :  { %1321 = vmatpush.bf16.msra.mxu2 %v1273_v47  ;;  %1322 = vmatpush.bf16.msra.mxu3 %v1273_v47 }
  0x78   :  { %1519 = vrot.lane.b32.xlu0 %v1518_v26, %s1668_s19  ;;  %v2066_v26 = vld [vmem:[#allocation2 + $0x92] sm:$0xff] }
  0x79   :  { %1529 = vrot.lane.b32.xlu2 %v1777_v46, %s1670_s21  ;;  %v2007_v46 = vpack.i.bf16 %v2001_v36, %v603_v27 }
  0x7b   :  { %v1995_v30 = vpop.permute.xlu2 %1364 }
  0x7c   :  { %v1367_v6 = vunpack.i.h.bf16 %v1995_v30  ;;  %v1366_v52 = vunpack.i.l.bf16 %v1995_v30 }
  0x7d   :  { %1539 = vrot.lane.b32.xlu1 %v1888_v40, %s1669_s20  ;;  %v541_v40 = vadd.f32 %v1796_v54, %v529_v45  ;;  %v1568_v54 = vpack.i.bf16 %v2020_v44, %v1874_v34  ;;  %v1272_v45 = vld [vmem:[%s2535_s3 + $0x8] sm:$0xff] }
  0x7e   :  { %1029 = vmatpush.bf16.msra.mxu0 %v1272_v45  ;;  %1323 = vmatpush.bf16.msra.mxu1 %v1272_v45 }
  0x7f   :  { %v549_v50 = vmax.f32 %v541_v40, 0.0  ;;  %1324 = vmatpush.bf16.msra.mxu2 %v1272_v45  ;;  %1325 = vmatpush.bf16.msra.mxu3 %v1272_v45 }
  0x80   :  { %1534 = vrot.lane.b32.xlu0 %v1533_v31, %s1667_s18 }
  0x81   :  { %1544 = vrot.lane.b32.xlu2 %v1543_v32, %s1668_s19  ;;  %557 = vst.msk [vmem:[#allocation2 + $0x81] sm:$0xff] %vm20_vm0, %v549_v50  ;;  %v1598_v32 = vpack.i.bf16 %v2066_v26, %v2020_v44 }
  0x83   :  { %v2013_v49 = vpop.permute.xlu2 %1379 }
  0x85   :  { %1554 = vrot.lane.b32.xlu1 %v2007_v46, %s1669_s20 }
  0x87   :  { %v2022_v53 = vpop.permute.xlu1 %1349 }
  0x88   :  { %1549 = vrot.lane.b32.xlu0 %v2018_v43, %s1670_s21 }
  0x89   :  { %1559 = vrot.lane.b32.xlu2 %v1488_v14, %s1663_s1  ;;  %v1588_v14 = vpack.i.bf16 %v2046_v3, %v1916_v60 }
  0x8a   :  { %v2035_v56 = vpop.permute.xlu0 %1339 }
  0x8b   :  { %v1395_v41 = vpop.permute.xlu2 %1394 }
  0x8c   :  { %v1397_v23 = vunpack.i.h.bf16 %v1395_v41 }
  0x8d   :  { %1569 = vrot.lane.b32.xlu1 %v1568_v54, %s1667_s18 }
  0x8f   :  { %v1355_v34 = vpop.permute.xlu1 %1354 }
  0x90   :  { %1564 = vrot.lane.b32.xlu0 %v1493_v11, %s1664_s2  ;;  %v1357_v1 = vunpack.i.h.bf16 %v1355_v34  ;;  %v1356_v8 = vunpack.i.l.bf16 %v1355_v34 }
  0x91   :  { %1574 = vrot.lane.b32.xlu2 %v1573_v57, %s1665_s0 }
  0x92   :  { %v1345_v9 = vpop.permute.xlu0 %1344  ;;  %v437_v17 = vsel %vm20_vm0, %v1883_v38, %v1357_v1  ;;  %v436_v60 = vsel %vm20_vm0, %v1880_v37, %v1356_v8  ;;  %v1396_v38 = vunpack.i.l.bf16 %v1395_v41  ;;  %v1271_v41 = vld [vmem:[%s2535_s3] sm:$0xff] }
  0x93   :  { %v2053_v11 = vpop.permute.xlu2 %1409  ;;  %v1347_v12 = vunpack.i.h.bf16 %v1345_v9  ;;  %v1346_v4 = vunpack.i.l.bf16 %v1345_v9  ;;  %1030 = vmatpush.bf16.msra.mxu0 %v1271_v41  ;;  %1326 = vmatpush.bf16.msra.mxu1 %v1271_v41  ;;  %v589_v1 = vld [vmem:[#allocation2 + $0x80] sm:$0xff] }
  0x94   :  { %1327 = vmatpush.bf16.msra.mxu2 %v1271_v41  ;;  %1328 = vmatpush.bf16.msra.mxu3 %v1271_v41  ;;  %v1628_v8 = vpack.i.bf16 %v589_v1, %v1993_v29 }
  0x95   :  { %1584 = vrot.lane.b32.xlu1 %v1583_v62, %s1666_s17  ;;  %v433_v22 = vsel %vm20_vm0, %v1855_v21, %v1347_v12  ;;  %v432_v2 = vsel %vm20_vm0, %v1876_v35, %v1346_v4  ;;  %v597_v12 = vld [vmem:[#allocation2 + $0x81] sm:$0xff] }
  0x96   :  { %v441_v30 = vsel %vm438_vm4, %v432_v2, %v1366_v52  ;;  %v442_v21 = vsel %vm438_vm4, %v433_v22, %v1367_v6  ;;  %v2129_v22 = vld [vmem:[#allocation2] sm:$0xff]  ;;  %v1362_v2 = vunpack.i.h.bf16 %v1985_v24 }
  0x97   :  { %v1375_v27 = vpop.permute.xlu1 %1374 }
  0x98   :  { %v1377_v35 = vunpack.i.h.bf16 %v1375_v27  ;;  %v1376_v31 = vunpack.i.l.bf16 %v1375_v27  ;;  %1579 = vrot.lane.b32.xlu0 %v1578_v13, %s1668_s19  ;;  %v1382_v27 = vunpack.i.h.bf16 %v2013_v49 }
  0x99   :  { %1589 = vrot.lane.b32.xlu2 %v1588_v14, %s1670_s21  ;;  %v1342_v14 = vunpack.i.h.bf16 %v2035_v56 }
  0x9a   :  { %v445_v37 = vsel %vm438_vm4, %v436_v60, %v1376_v31  ;;  %v446_v42 = vsel %vm438_vm4, %v437_v17, %v1377_v35  ;;  %v2084_v40 = vpop.permute.xlu0 %1369  ;;  %v1341_v17 = vunpack.i.l.bf16 %v2035_v56  ;;  %v1643_v56 = vpack.i.bf16 %v2044_v51, %v589_v1 }
  0x9b   :  { %v2087_v50 = vsel %vm447_vm5, %v446_v42, %v1397_v23  ;;  %v2090_v44 = vsel %vm447_vm5, %v445_v37, %v1396_v38  ;;  %v2092_v54 = vpop.permute.xlu2 %1424  ;;  %v1361_v23 = vunpack.i.l.bf16 %v1985_v24  ;;  %v431_v60 = vsel %vm20_vm0, %v1871_v33, %v1342_v14 }
  0x9c   :  { %v430_v47 = vsel %vm20_vm0, %v2129_v22, %v1341_v17  ;;  %v1381_v38 = vunpack.i.l.bf16 %v2013_v49  ;;  %v1648_v51 = vpack.i.bf16 %v2046_v3, %v597_v12 }
  0x9d   :  { %1599 = vrot.lane.b32.xlu1 %v1598_v32, %s1669_s20  ;;  %v439_v24 = vsel %vm438_vm4, %v430_v47, %v1361_v23  ;;  %v1352_v23 = vunpack.i.h.bf16 %v2022_v53 }
  0x9f   :  { %v2102_v57 = vpop.permute.xlu1 %1389 }
  0xa0   :  { %1594 = vrot.lane.b32.xlu0 %v1593_v55, %s1667_s18 }
  0xa1   :  { %1604 = vrot.lane.b32.xlu2 %v1603_v39, %s1668_s19 }
  0xa2   :  { %v1385_v10 = vpop.permute.xlu0 %1384 }
  0xa3   :  { %v2106_v16 = vpop.permute.xlu2 %1439  ;;  %v1387_v58 = vunpack.i.h.bf16 %v1385_v10  ;;  %v1386_v34 = vunpack.i.l.bf16 %v1385_v10 }
  0xa5   :  { %1614 = vrot.lane.b32.xlu1 %v1978_v20, %s1669_s20  ;;  %v450_v61 = vsel %vm447_vm5, %v441_v30, %v1386_v34  ;;  %v451_v62 = vsel %vm447_vm5, %v442_v21, %v1387_v58  ;;  %v440_v21 = vsel %vm438_vm4, %v431_v60, %v1362_v2  ;;  %v1427_v58 = vunpack.i.h.bf16 %v2092_v54 }
  0xa6   :  { %v449_v41 = vsel %vm447_vm5, %v440_v21, %v1382_v27  ;;  %v1372_v60 = vunpack.i.h.bf16 %v2084_v40  ;;  %v1391_v27 = vunpack.i.l.bf16 %v2102_v57 }
  0xa7   :  { %v1405_v5 = vpop.permute.xlu1 %1404 }
  0xa8   :  { %v1407_v6 = vunpack.i.h.bf16 %v1405_v5  ;;  %v1406_v52 = vunpack.i.l.bf16 %v1405_v5  ;;  %1609 = vrot.lane.b32.xlu0 %v1965_v15, %s1670_s21  ;;  %v1633_v15 = vpack.i.bf16 %v597_v12, %v2010_v48  ;;  %v605_v48 = vld [vmem:[#allocation2 + $0x82] sm:$0xff] }
  0xa9   :  { %1619 = vrot.lane.b32.xlu2 %v2018_v43, %s1663_s1 }
  0xaa   :  { %v2118_v9 = vsel %vm456_vm6, %v450_v61, %v1406_v52  ;;  %v2121_v20 = vsel %vm456_vm6, %v451_v62, %v1407_v6  ;;  %v1400_v4 = vpop.permute.xlu0 %1399 }
  0xab   :  { %v2123_v13 = vpop.permute.xlu2 %1454  ;;  %v1402_v33 = vunpack.i.h.bf16 %v1400_v4  ;;  %v1401_v32 = vunpack.i.l.bf16 %v1400_v4 }
  0xad   :  { %1629 = vrot.lane.b32.xlu1 %v1628_v8, %s1665_s0  ;;  %v458_v10 = vsel %vm456_vm6, %v449_v41, %v1402_v33  ;;  %v1653_v8 = vpack.i.bf16 %v2066_v26, %v605_v48  ;;  %v1351_v26 = vunpack.i.l.bf16 %v2022_v53 }
  0xaf   :  { %v1420_v43 = vpop.permute.xlu1 %1419 }
  0xb0   :  { %1624 = vrot.lane.b32.xlu0 %v2007_v46, %s1664_s2  ;;  %v1638_v46 = vpack.i.bf16 %v605_v48, %v2001_v36  ;;  %v1422_v37 = vunpack.i.h.bf16 %v1420_v43  ;;  %v1421_v42 = vunpack.i.l.bf16 %v1420_v43  ;;  %v448_v36 = vsel %vm447_vm5, %v439_v24, %v1381_v38 }
  0xb1   :  { %1634 = vrot.lane.b32.xlu2 %v1633_v15, %s1666_s17  ;;  %v457_v3 = vsel %vm456_vm6, %v448_v36, %v1401_v32  ;;  %v1392_v48 = vunpack.i.h.bf16 %v2102_v57  ;;  %v435_v38 = vsel %vm20_vm0, %v1865_v28, %v1352_v23 }
  0xb2   :  { %v1415_v30 = vpop.permute.xlu0 %1414  ;;  %v467_v34 = vsel %vm465_vm7, %v458_v10, %v1422_v37  ;;  %v444_v21 = vsel %vm438_vm4, %v435_v38, %v1372_v60  ;;  %v1441_v10 = vunpack.i.l.bf16 %v2106_v16 }
  0xb3   :  { %v1417_v35 = vunpack.i.h.bf16 %v1415_v30  ;;  %v1416_v31 = vunpack.i.l.bf16 %v1415_v30  ;;  %v2156_v55 = vpop.permute.xlu2 %1469  ;;  %v434_v30 = vsel %vm20_vm0, %v1862_v25, %v1351_v26  ;;  %v453_v33 = vsel %vm447_vm5, %v444_v21, %v1392_v48 }
  0xb4   :  { %v1471_v41 = vunpack.i.l.bf16 %v2156_v55 }
  0xb5   :  { %1644 = vrot.lane.b32.xlu1 %v1643_v56, %s1668_s19  ;;  %v2150_v49 = vsel %vm456_vm6, %v2087_v50, %v1417_v35  ;;  %v2154_v45 = vsel %vm456_vm6, %v2090_v44, %v1416_v31  ;;  %v1426_v50 = vunpack.i.l.bf16 %v2092_v54  ;;  %v466_v44 = vsel %vm465_vm7, %v457_v3, %v1421_v42 }
  0xb6   :  { %v476_v54 = vsel %vm474_vm8, %v467_v34, %v1427_v58  ;;  %v1371_v56 = vunpack.i.l.bf16 %v2084_v40  ;;  %v1412_v35 = vunpack.i.h.bf16 %v2053_v11  ;;  %v1411_v31 = vunpack.i.l.bf16 %v2053_v11 }
  0xb7   :  { %v1435_v39 = vpop.permute.xlu1 %1434  ;;  %v475_v52 = vsel %vm474_vm8, %v466_v44, %v1426_v50  ;;  %v1472_v11 = vunpack.i.h.bf16 %v2156_v55  ;;  %v1442_v3 = vunpack.i.h.bf16 %v2106_v16  ;;  %v886_v55 = vsel %vm20_vm0, %v2129_v22, %v1441_v10 }
  0xb8   :  { %1639 = vrot.lane.b32.xlu0 %v1638_v46, %s1667_s18  ;;  %v1437_v61 = vunpack.i.h.bf16 %v1435_v39  ;;  %v1436_v62 = vunpack.i.l.bf16 %v1435_v39  ;;  %v443_v53 = vsel %vm438_vm4, %v434_v30, %v1371_v56 }
  0xb9   :  { %1649 = vrot.lane.b32.xlu2 %v1648_v51, %s1670_s21  ;;  %v452_v40 = vsel %vm447_vm5, %v443_v53, %v1391_v27  ;;  %v462_v51 = vsel %vm456_vm6, %v453_v33, %v1412_v35 }
  0xba   :  { %v1430_v1 = vpop.permute.xlu0 %1429  ;;  %v461_v25 = vsel %vm456_vm6, %v452_v40, %v1411_v31 }
  0xbb   :  { %v1432_v5 = vunpack.i.h.bf16 %v1430_v1  ;;  %v1431_v6 = vunpack.i.l.bf16 %v1430_v1  ;;  %v2175_v2 = vpop.permute.xlu2 %1484 }
  0xbc   :  { %v1487_v27 = vunpack.i.h.bf16 %v2175_v2  ;;  %v1486_v38 = vunpack.i.l.bf16 %v2175_v2 }
  0xbd   :  { %v484_v12 = vsel %vm483_vm9, %v475_v52, %v1431_v6  ;;  %v485_v4 = vsel %vm483_vm9, %v476_v54, %v1432_v5  ;;  %v887_v52 = vsel %vm20_vm0, %v1932_v63, %v1442_v3 }
  0xbe   :  { %v493_v14 = vsel %vm492_vm10, %v484_v12, %v1436_v62  ;;  %v494_v17 = vsel %vm492_vm10, %v485_v4, %v1437_v61  ;;  %v1457_v4 = vunpack.i.h.bf16 %v2123_v13 }
  0xbf   :  { %v1450_v15 = vpop.permute.xlu1 %1449  ;;  %v950_v43 = vpack.c.bf16 %v494_v17, %v493_v14  ;;  %v1456_v14 = vunpack.i.l.bf16 %v2123_v13 }
  0xc0   :  { %1654 = vrot.lane.b32.xlu0 %v1653_v8, %s1669_s20  ;;  %v1452_v57 = vunpack.i.h.bf16 %v1450_v15  ;;  %v1451_v32 = vunpack.i.l.bf16 %v1450_v15 }
  0xc1   :  { %1263 = vmatmul.msk.bf16.vlgmr.msra.gmra.mxu0 %vm994_vm11, %v950_v43 }
  0xc2   :  { %v1445_v47 = vpop.permute.xlu0 %1444  ;;  %v470_v39 = vsel %vm465_vm7, %v461_v25, %v1451_v32  ;;  %v471_v36 = vsel %vm465_vm7, %v462_v51, %v1452_v57 }
  0xc3   :  { %v2195_v46 = vpop.permute.xlu2 %1499  ;;  %v1447_v62 = vunpack.i.h.bf16 %v1445_v47  ;;  %v1446_v1 = vunpack.i.l.bf16 %v1445_v47 }
  0xc5   :  { %v894_v15 = vsel %vm438_vm4, %v886_v55, %v1446_v1  ;;  %v895_v43 = vsel %vm438_vm4, %v887_v52, %v1447_v62  ;;  %v1502_v1 = vunpack.i.h.bf16 %v2195_v46 }
  0xc6   :  { %v902_v60 = vsel %vm447_vm5, %v894_v15, %v1456_v14  ;;  %v903_v56 = vsel %vm447_vm5, %v895_v43, %v1457_v4 }
  0xc7   :  { %v1465_v24 = vpop.permute.xlu1 %1464 }
  0xc8   :  { %v1467_v22 = vunpack.i.h.bf16 %v1465_v24  ;;  %v1466_v23 = vunpack.i.l.bf16 %v1465_v24 }
  0xca   :  { %v1460_v28 = vpop.permute.xlu0 %1459  ;;  %v910_v48 = vsel %vm456_vm6, %v902_v60, %v1466_v23  ;;  %v911_v13 = vsel %vm456_vm6, %v903_v56, %v1467_v22 }
  0xcb   :  { %v1462_v37 = vunpack.i.h.bf16 %v1460_v28  ;;  %v1461_v42 = vunpack.i.l.bf16 %v1460_v28  ;;  %v2217_v17 = vpop.permute.xlu2 %1514 }
  0xcd   :  { %v480_v58 = vsel %vm474_vm8, %v471_v36, %v1462_v37  ;;  %v479_v50 = vsel %vm474_vm8, %v470_v39, %v1461_v42 }
  0xce   :  { %v489_v5 = vsel %vm483_vm9, %v480_v58, %v1472_v11  ;;  %v488_v6 = vsel %vm483_vm9, %v479_v50, %v1471_v41 }
  0xcf   :  { %v1480_v44 = vpop.permute.xlu1 %1479 }
  0xd0   :  { %v1482_v34 = vunpack.i.h.bf16 %v1480_v44  ;;  %v1481_v61 = vunpack.i.l.bf16 %v1480_v44 }
  0xd2   :  { %v497_v16 = vsel %vm492_vm10, %v488_v6, %v1481_v61  ;;  %v498_v54 = vsel %vm492_vm10, %v489_v5, %v1482_v34  ;;  %v1475_v8 = vpop.permute.xlu0 %1474  ;;  %v1501_v5 = vunpack.i.l.bf16 %v2195_v46 }
  0xd3   :  { %v952_v12 = vpack.c.bf16 %v498_v54, %v497_v16  ;;  %v1477_v63 = vunpack.i.h.bf16 %v1475_v8  ;;  %v1476_v26 = vunpack.i.l.bf16 %v1475_v8  ;;  %v1530_v25 = vpop.permute.xlu2 %1529 }
  0xd4   :  { %v1532_v61 = vunpack.i.h.bf16 %v1530_v25  ;;  %v1531_v62 = vunpack.i.l.bf16 %v1530_v25  ;;  %v890_v14 = vsel %vm20_vm0, %v2033_v59, %v1501_v5 }
  0xd5   :  { %1265 = vmatmul.msk.bf16.vlgmr.msra.gmra.mxu1 %vm994_vm11, %v952_v12  ;;  %v918_v30 = vsel %vm465_vm7, %v910_v48, %v1476_v26  ;;  %v919_v24 = vsel %vm465_vm7, %v911_v13, %v1477_v63  ;;  %v1517_v63 = vunpack.i.h.bf16 %v2217_v17  ;;  %v1516_v26 = vunpack.i.l.bf16 %v2217_v17 }
  0xd6   :  { %v926_v33 = vsel %vm474_vm8, %v918_v30, %v1486_v38  ;;  %v927_v57 = vsel %vm474_vm8, %v919_v24, %v1487_v27 }
  0xd7   :  { %v1495_v47 = vpop.permute.xlu1 %1494 }
  0xd8   :  { %v1497_v21 = vunpack.i.h.bf16 %v1495_v47  ;;  %v1496_v53 = vunpack.i.l.bf16 %v1495_v47 }
  0xda   :  { %v1490_v35 = vpop.permute.xlu0 %1489 }
  0xdb   :  { %v1492_v31 = vunpack.i.h.bf16 %v1490_v35  ;;  %v1491_v40 = vunpack.i.l.bf16 %v1490_v35  ;;  %v1545_v11 = vpop.permute.xlu2 %1544 }
  0xdc   :  { %v1547_v17 = vunpack.i.h.bf16 %v1545_v11 }
  0xdd   :  { %v934_v32 = vsel %vm483_vm9, %v926_v33, %v1491_v40  ;;  %v935_v28 = vsel %vm483_vm9, %v927_v57, %v1492_v31 }
  0xde   :  { %v942_v2 = vsel %vm492_vm10, %v934_v32, %v1496_v53  ;;  %v943_v51 = vsel %vm492_vm10, %v935_v28, %v1497_v21  ;;  %v1546_v21 = vunpack.i.l.bf16 %v1545_v11 }
  0xdf   :  { %v1510_v37 = vpop.permute.xlu1 %1509  ;;  %v954_v42 = vpack.c.bf16 %v943_v51, %v942_v2 }
  0xe0   :  { %v1512_v41 = vunpack.i.h.bf16 %v1510_v37  ;;  %v1511_v3 = vunpack.i.l.bf16 %v1510_v37 }
  0xe1   :  { %1267 = vmatmul.msk.bf16.vlgmr.msra.gmra.mxu2 %vm994_vm11, %v954_v42 }
  0xe2   :  { %v1505_v39 = vpop.permute.xlu0 %1504  ;;  %v469_v44 = vsel %vm465_vm7, %v2121_v20, %v1512_v41  ;;  %v468_v34 = vsel %vm465_vm7, %v2118_v9, %v1511_v3  ;;  %v891_v9 = vsel %vm20_vm0, %v1972_v18, %v1502_v1 }
  0xe3   :  { %v1507_v8 = vunpack.i.h.bf16 %v1505_v39  ;;  %v1506_v12 = vunpack.i.l.bf16 %v1505_v39  ;;  %v2253_v43 = vpop.permute.xlu2 %1559 }
  0xe5   :  { %v898_v47 = vsel %vm438_vm4, %v890_v14, %v1506_v12  ;;  %v899_v60 = vsel %vm438_vm4, %v891_v9, %v1507_v8 }
  0xe6   :  { %v906_v27 = vsel %vm447_vm5, %v898_v47, %v1516_v26  ;;  %v907_v38 = vsel %vm447_vm5, %v899_v60, %v1517_v63 }
  0xe7   :  { %v1525_v36 = vpop.permute.xlu1 %1524 }
  0xe8   :  { %v1527_v18 = vunpack.i.h.bf16 %v1525_v36  ;;  %v1526_v56 = vunpack.i.l.bf16 %v1525_v36 }
  0xea   :  { %v1520_v10 = vpop.permute.xlu0 %1519  ;;  %v914_v30 = vsel %vm456_vm6, %v906_v27, %v1526_v56  ;;  %v915_v24 = vsel %vm456_vm6, %v907_v38, %v1527_v18 }
  0xeb   :  { %v1522_v58 = vunpack.i.h.bf16 %v1520_v10  ;;  %v1521_v50 = vunpack.i.l.bf16 %v1520_v10  ;;  %v1575_v28 = vpop.permute.xlu2 %1574 }
  0xec   :  { %v1577_v26 = vunpack.i.h.bf16 %v1575_v28  ;;  %v1576_v47 = vunpack.i.l.bf16 %v1575_v28 }
  0xed   :  { %v478_v6 = vsel %vm474_vm8, %v469_v44, %v1522_v58  ;;  %v477_v55 = vsel %vm474_vm8, %v468_v34, %v1521_v50 }
  0xee   :  { %v487_v20 = vsel %vm483_vm9, %v478_v6, %v1532_v61  ;;  %v486_v4 = vsel %vm483_vm9, %v477_v55, %v1531_v62  ;;  %v1562_v55 = vunpack.i.h.bf16 %v2253_v43 }
  0xef   :  { %v1540_v52 = vpop.permute.xlu1 %1539 }
  0xf0   :  { %v1542_v16 = vunpack.i.h.bf16 %v1540_v52  ;;  %v1541_v54 = vunpack.i.l.bf16 %v1540_v52  ;;  %v1561_v52 = vunpack.i.l.bf16 %v2253_v43 }
  0xf2   :  { %v495_v46 = vsel %vm492_vm10, %v486_v4, %v1541_v54  ;;  %v496_v15 = vsel %vm492_vm10, %v487_v20, %v1542_v16  ;;  %v1535_v22 = vpop.permute.xlu0 %1534 }
  0xf3   :  { %v951_v23 = vpack.c.bf16 %v496_v15, %v495_v46  ;;  %v1537_v59 = vunpack.i.h.bf16 %v1535_v22  ;;  %v1536_v48 = vunpack.i.l.bf16 %v1535_v22  ;;  %v1590_v3 = vpop.permute.xlu2 %1589  ;;  %v889_v46 = vsel %vm20_vm0, %v1948_v7, %v1562_v55 }
  0xf4   :  { %v1592_v5 = vunpack.i.h.bf16 %v1590_v3  ;;  %v1591_v6 = vunpack.i.l.bf16 %v1590_v3  ;;  %v888_v15 = vsel %vm20_vm0, %v1934_v0, %v1561_v52 }
  0xf5   :  { %1264 = vmatmul.msk.bf16.gmra.mxu0 %vm994_vm11, %v951_v23  ;;  %v922_v53 = vsel %vm465_vm7, %v914_v30, %v1536_v48  ;;  %v923_v35 = vsel %vm465_vm7, %v915_v24, %v1537_v59 }
  0xf6   :  { %v930_v25 = vsel %vm474_vm8, %v922_v53, %v1546_v21  ;;  %v931_v2 = vsel %vm474_vm8, %v923_v35, %v1547_v17 }
  0xf7   :  { %v1555_v13 = vpop.permute.xlu1 %1554 }
  0xf8   :  { %v1557_v31 = vunpack.i.h.bf16 %v1555_v13  ;;  %v1556_v40 = vunpack.i.l.bf16 %v1555_v13 }
  0xfa   :  { %v1550_v33 = vpop.permute.xlu0 %1549 }
  0xfb   :  { %v1552_v57 = vunpack.i.h.bf16 %v1550_v33  ;;  %v1551_v32 = vunpack.i.l.bf16 %v1550_v33  ;;  %v1605_v4 = vpop.permute.xlu2 %1604 }
  0xfc   :  { %v1607_v24 = vunpack.i.h.bf16 %v1605_v4  ;;  %v1606_v17 = vunpack.i.l.bf16 %v1605_v4 }
  0xfd   :  { %v938_v51 = vsel %vm483_vm9, %v930_v25, %v1551_v32  ;;  %v939_v37 = vsel %vm483_vm9, %v931_v2, %v1552_v57 }
  0xfe   :  { %v946_v42 = vsel %vm492_vm10, %v938_v51, %v1556_v40  ;;  %v947_v39 = vsel %vm492_vm10, %v939_v37, %v1557_v31 }
  0xff   :  { %v1570_v36 = vpop.permute.xlu1 %1569  ;;  %v956_v11 = vpack.c.bf16 %v947_v39, %v946_v42 }
 0x100   :  { %v1572_v58 = vunpack.i.h.bf16 %v1570_v36  ;;  %v1571_v50 = vunpack.i.l.bf16 %v1570_v36 }
 0x101   :  { %1269 = vmatmul.msk.bf16.vlgmr.msra.gmra.mxu3 %vm994_vm11, %v956_v11 }
 0x102   :  { %v1565_v41 = vpop.permute.xlu0 %1564  ;;  %v473_v62 = vsel %vm465_vm7, %v2150_v49, %v1572_v58  ;;  %v472_v1 = vsel %vm465_vm7, %v2154_v45, %v1571_v50 }
 0x103   :  { %v1567_v9 = vunpack.i.h.bf16 %v1565_v41  ;;  %v1566_v14 = vunpack.i.l.bf16 %v1565_v41  ;;  %v1620_v35 = vpop.permute.xlu2 %1619 }
 0x104   :  { %v1622_v36 = vunpack.i.h.bf16 %v1620_v35  ;;  %v1621_v11 = vunpack.i.l.bf16 %v1620_v35 }
 0x105   :  { %v896_v60 = vsel %vm438_vm4, %v888_v15, %v1566_v14  ;;  %v897_v18 = vsel %vm438_vm4, %v889_v46, %v1567_v9 }
 0x106   :  { %v904_v0 = vsel %vm447_vm5, %v896_v60, %v1576_v47  ;;  %v905_v27 = vsel %vm447_vm5, %v897_v18, %v1577_v26 }
 0x107   :  { %v1585_v10 = vpop.permute.xlu1 %1584 }
 0x108   :  { %v1587_v56 = vunpack.i.h.bf16 %v1585_v10  ;;  %v1586_v59 = vunpack.i.l.bf16 %v1585_v10 }
 0x10a   :  { %v1580_v44 = vpop.permute.xlu0 %1579  ;;  %v912_v38 = vsel %vm456_vm6, %v904_v0, %v1586_v59  ;;  %v913_v30 = vsel %vm456_vm6, %v905_v27, %v1587_v56 }
 0x10b   :  { %v1582_v34 = vunpack.i.h.bf16 %v1580_v44  ;;  %v1581_v61 = vunpack.i.l.bf16 %v1580_v44  ;;  %v1635_v50 = vpop.permute.xlu2 %1634  ;;  %v893_v44 = vsel %vm20_vm0, %v1993_v29, %v1622_v36 }
 0x10c   :  { %v1636_v55 = vunpack.i.l.bf16 %v1635_v50 }
 0x10d   :  { %v482_v16 = vsel %vm474_vm8, %v473_v62, %v1582_v34  ;;  %v481_v54 = vsel %vm474_vm8, %v472_v1, %v1581_v61  ;;  %v892_v34 = vsel %vm20_vm0, %v1974_v19, %v1621_v11 }
 0x10e   :  { %v491_v49 = vsel %vm483_vm9, %v482_v16, %v1592_v5  ;;  %v490_v45 = vsel %vm483_vm9, %v481_v54, %v1591_v6  ;;  %v1637_v6 = vunpack.i.h.bf16 %v1635_v50 }
 0x10f   :  { %v1600_v8 = vpop.permute.xlu1 %1599 }
 0x110   :  { %v1602_v12 = vunpack.i.h.bf16 %v1600_v8  ;;  %v1601_v20 = vunpack.i.l.bf16 %v1600_v8 }
 0x112   :  { %v499_v43 = vsel %vm492_vm10, %v490_v45, %v1601_v20  ;;  %v500_v22 = vsel %vm492_vm10, %v491_v49, %v1602_v12  ;;  %v1595_v23 = vpop.permute.xlu0 %1594 }
 0x113   :  { %v953_v63 = vpack.c.bf16 %v500_v22, %v499_v43  ;;  %v1597_v7 = vunpack.i.h.bf16 %v1595_v23  ;;  %v1596_v48 = vunpack.i.l.bf16 %v1595_v23  ;;  %v1650_v14 = vpop.permute.xlu2 %1649 }
 0x114   :  { %v1652_v46 = vunpack.i.h.bf16 %v1650_v14  ;;  %v1651_v15 = vunpack.i.l.bf16 %v1650_v14 }
 0x115   :  { %1266 = vmatmul.msk.bf16.gmra.mxu1 %vm994_vm11, %v953_v63  ;;  %v920_v21 = vsel %vm465_vm7, %v912_v38, %v1596_v48  ;;  %v921_v53 = vsel %vm465_vm7, %v913_v30, %v1597_v7 }
 0x116   :  { %v928_v28 = vsel %vm474_vm8, %v920_v21, %v1606_v17  ;;  %v929_v25 = vsel %vm474_vm8, %v921_v53, %v1607_v24 }
 0x117   :  { %v1615_v13 = vpop.permute.xlu1 %1614 }
 0x118   :  { %v1617_v40 = vunpack.i.h.bf16 %v1615_v13  ;;  %v1616_v33 = vunpack.i.l.bf16 %v1615_v13 }
 0x11a   :  { %v1610_v31 = vpop.permute.xlu0 %1609 }
 0x11b   :  { %v1612_v57 = vunpack.i.h.bf16 %v1610_v31  ;;  %v1611_v32 = vunpack.i.l.bf16 %v1610_v31 }
 0x11d   :  { %v936_v2 = vsel %vm483_vm9, %v928_v28, %v1611_v32  ;;  %v937_v51 = vsel %vm483_vm9, %v929_v25, %v1612_v57 }
 0x11e   :  { %v944_v37 = vsel %vm492_vm10, %v936_v2, %v1616_v33  ;;  %v945_v42 = vsel %vm492_vm10, %v937_v51, %v1617_v40 }
 0x11f   :  { %v955_v39 = vpack.c.bf16 %v945_v42, %v944_v37  ;;  %v1630_v41 = vpop.permute.xlu1 %1629 }
 0x120   :  { %v1632_v61 = vunpack.i.h.bf16 %v1630_v41  ;;  %v1631_v62 = vunpack.i.l.bf16 %v1630_v41 }
 0x121   :  { %1268 = vmatmul.msk.bf16.gmra.mxu2 %vm994_vm11, %v955_v39 }
 0x122   :  { %v1625_v3 = vpop.permute.xlu0 %1624 }
 0x123   :  { %v1627_v10 = vunpack.i.h.bf16 %v1625_v3  ;;  %v1626_v58 = vunpack.i.l.bf16 %v1625_v3 }
 0x125   :  { %v900_v1 = vsel %vm438_vm4, %v892_v34, %v1626_v58  ;;  %v901_v5 = vsel %vm438_vm4, %v893_v44, %v1627_v10 }
 0x126   :  { %v908_v52 = vsel %vm447_vm5, %v900_v1, %v1631_v62  ;;  %v909_v16 = vsel %vm447_vm5, %v901_v5, %v1632_v61 }
 0x127   :  { %v1645_v8 = vpop.permute.xlu1 %1644  ;;  %v916_v29 = vsel %vm456_vm6, %v908_v52, %v1636_v55  ;;  %v917_v19 = vsel %vm456_vm6, %v909_v16, %v1637_v6 }
 0x128   :  { %v1647_v4 = vunpack.i.h.bf16 %v1645_v8  ;;  %v1646_v9 = vunpack.i.l.bf16 %v1645_v8 }
 0x12a   :  { %v1640_v54 = vpop.permute.xlu0 %1639 }
 0x12b   :  { %v1642_v12 = vunpack.i.h.bf16 %v1640_v54  ;;  %v1641_v20 = vunpack.i.l.bf16 %v1640_v54 }
 0x12d   :  { %v924_v49 = vsel %vm465_vm7, %v916_v29, %v1641_v20  ;;  %v925_v45 = vsel %vm465_vm7, %v917_v19, %v1642_v12 }
 0x12e   :  { %v932_v43 = vsel %vm474_vm8, %v924_v49, %v1646_v9  ;;  %v933_v22 = vsel %vm474_vm8, %v925_v45, %v1647_v4 }
 0x12f   :  { %v940_v47 = vsel %vm483_vm9, %v932_v43, %v1651_v15  ;;  %v941_v60 = vsel %vm483_vm9, %v933_v22, %v1652_v46 }
 0x132   :  { %v1655_v23 = vpop.permute.xlu0 %1654 }
 0x133   :  { %v1657_v63 = vunpack.i.h.bf16 %v1655_v23  ;;  %v1656_v26 = vunpack.i.l.bf16 %v1655_v23 }
 0x135   :  { %v948_v18 = vsel %vm492_vm10, %v940_v47, %v1656_v26  ;;  %v949_v56 = vsel %vm492_vm10, %v941_v60, %v1657_v63 }
 0x136   :  { %v957_v59 = vpack.c.bf16 %v949_v56, %v948_v18 }
 0x138   :  { %1270 = vmatmul.msk.bf16.gmra.mxu3 %vm994_vm11, %v957_v59 }
 0x13e   :  { %v1032_v7 = vpop.f32.mrf.mxu0 }
 0x13f   :  { %v2324_v48 = vpack.c.bf16 %v1032_v7, %v1032_v7 }
 0x141   :  { %1089 = vst.msk [vmem:[%s2536_s4] sm:$0xf] %vm1088_vm12, %v2324_v48  ;;  %v1105_v0 = vunpack.c.l.bf16 %v2324_v48 }
 0x143   :  { %v1121_v30 = vsel %vm20_vm0, %v1105_v0, 0.0 }
 0x146   :  { %v1034_v13 = vpop.f32.mrf.mxu0 }
 0x147   :  { %v2332_v27 = vpack.c.bf16 %v1034_v13, %v1034_v13 }
 0x149   :  { %1090 = vst.msk [vmem:[%s2536_s4 + $0x4] sm:$0xf] %vm1088_vm12, %v2332_v27  ;;  %v1106_v38 = vunpack.c.l.bf16 %v2332_v27 }
 0x14b   :  { %v1122_v24 = vsel %vm20_vm0, %v1106_v38, 0.0 }
 0x14c   :  { %v1123_v17 = vadd.f32 %v1122_v24, %v1121_v30 }
 0x152   :  { %v1042_v21 = vpop.f32.mrf.mxu1 }
 0x153   :  { %v2346_v53 = vpack.c.bf16 %v1042_v21, %v1042_v21 }
 0x155   :  { %1093 = vst.msk [vmem:[%s2536_s4 + $0x10] sm:$0xf] %vm1088_vm12, %v2346_v53  ;;  %v1109_v39 = vunpack.c.l.bf16 %v2346_v53 }
 0x157   :  { %v1128_v58 = vsel %vm20_vm0, %v1109_v39, 0.0 }
 0x15a   :  { %v1044_v35 = vpop.f32.mrf.mxu1 }
 0x15b   :  { %v2353_v31 = vpack.c.bf16 %v1044_v35, %v1044_v35 }
 0x15d   :  { %1094 = vst.msk [vmem:[%s2536_s4 + $0x14] sm:$0xf] %vm1088_vm12, %v2353_v31  ;;  %v1110_v41 = vunpack.c.l.bf16 %v2353_v31 }
 0x15f   :  { %v1130_v44 = vsel %vm20_vm0, %v1110_v41, 0.0 }
 0x164   :  { %v1052_v40 = vpop.f32.mrf.mxu2 }
 0x165   :  { %v2360_v33 = vpack.c.bf16 %v1052_v40, %v1052_v40 }
 0x167   :  { %1097 = vst.msk [vmem:[%s2536_s4 + $0x20] sm:$0xf] %vm1088_vm12, %v2360_v33  ;;  %v1113_v12 = vunpack.c.l.bf16 %v2360_v33 }
 0x169   :  { %v1136_v14 = vsel %vm20_vm0, %v1113_v12, 0.0 }
 0x16c   :  { %v1054_v57 = vpop.f32.mrf.mxu2 }
 0x16d   :  { %v2367_v32 = vpack.c.bf16 %v1054_v57, %v1054_v57 }
 0x16f   :  { %1098 = vst.msk [vmem:[%s2536_s4 + $0x24] sm:$0xf] %vm1088_vm12, %v2367_v32  ;;  %v1114_v19 = vunpack.c.l.bf16 %v2367_v32 }
 0x171   :  { %v1138_v45 = vsel %vm20_vm0, %v1114_v19, 0.0 }
 0x172   :  { %v1037_v28 = vpop.f32.mrf.mxu0 }
 0x173   :  { %v2374_v25 = vpack.c.bf16 %v1037_v28, %v1037_v28 }
 0x175   :  { %1091 = vst.msk [vmem:[%s2536_s4 + $0x8] sm:$0xf] %vm1088_vm12, %v2374_v25  ;;  %v1107_v2 = vunpack.c.l.bf16 %v2374_v25 }
 0x177   :  { %v1124_v37 = vsel %vm20_vm0, %v1107_v2, 0.0 }
 0x178   :  { %v1125_v11 = vadd.f32 %v1124_v37, %v1123_v17 }
 0x17a   :  { %v1039_v51 = vpop.f32.mrf.mxu0 }
 0x17b   :  { %v2385_v42 = vpack.c.bf16 %v1039_v51, %v1039_v51 }
 0x17d   :  { %1092 = vst.msk [vmem:[%s2536_s4 + $0xc] sm:$0xf] %vm1088_vm12, %v2385_v42  ;;  %v1108_v36 = vunpack.c.l.bf16 %v2385_v42 }
 0x17f   :  { %v1126_v3 = vsel %vm20_vm0, %v1108_v36, 0.0 }
 0x180   :  { %v1127_v10 = vadd.f32 %v1126_v3, %v1125_v11 }
 0x182   :  { %v1129_v50 = vadd.f32 %v1128_v58, %v1127_v10 }
 0x184   :  { %v1131_v34 = vadd.f32 %v1130_v44, %v1129_v50  ;;  %v1062_v61 = vpop.f32.mrf.mxu3 }
 0x185   :  { %v2404_v62 = vpack.c.bf16 %v1062_v61, %v1062_v61 }
 0x187   :  { %1101 = vst.msk [vmem:[%s2536_s4 + $0x30] sm:$0xf] %vm1088_vm12, %v2404_v62  ;;  %v1117_v59 = vunpack.c.l.bf16 %v2404_v62 }
 0x189   :  { %v1144_v30 = vsel %vm20_vm0, %v1117_v59, 0.0 }
 0x18c   :  { %v1064_v1 = vpop.f32.mrf.mxu3 }
 0x18d   :  { %v2411_v5 = vpack.c.bf16 %v1064_v1, %v1064_v1 }
 0x18f   :  { %1102 = vst.msk [vmem:[%s2536_s4 + $0x34] sm:$0xf] %vm1088_vm12, %v2411_v5  ;;  %v1118_v24 = vunpack.c.l.bf16 %v2411_v5 }
 0x191   :  { %v1146_v40 = vsel %vm20_vm0, %v1118_v24, 0.0 }
 0x192   :  { %v1047_v6 = vpop.f32.mrf.mxu1 }
 0x193   :  { %v2418_v55 = vpack.c.bf16 %v1047_v6, %v1047_v6 }
 0x195   :  { %1095 = vst.msk [vmem:[%s2536_s4 + $0x18] sm:$0xf] %vm1088_vm12, %v2418_v55  ;;  %v1111_v52 = vunpack.c.l.bf16 %v2418_v55 }
 0x197   :  { %v1132_v54 = vsel %vm20_vm0, %v1111_v52, 0.0 }
 0x198   :  { %v1133_v29 = vadd.f32 %v1132_v54, %v1131_v34 }
 0x19a   :  { %v1049_v16 = vpop.f32.mrf.mxu1 }
 0x19b   :  { %v2429_v8 = vpack.c.bf16 %v1049_v16, %v1049_v16 }
 0x19d   :  { %1096 = vst.msk [vmem:[%s2536_s4 + $0x1c] sm:$0xf] %vm1088_vm12, %v2429_v8  ;;  %v1112_v20 = vunpack.c.l.bf16 %v2429_v8 }
 0x19f   :  { %v1134_v4 = vsel %vm20_vm0, %v1112_v20, 0.0 }
 0x1a0   :  { %v1135_v9 = vadd.f32 %v1134_v4, %v1133_v29 }
 0x1a2   :  { %v1137_v49 = vadd.f32 %v1136_v14, %v1135_v9 }
 0x1a4   :  { %v1139_v46 = vadd.f32 %v1138_v45, %v1137_v49  ;;  %v1057_v15 = vpop.f32.mrf.mxu2 }
 0x1a5   :  { %v2444_v43 = vpack.c.bf16 %v1057_v15, %v1057_v15 }
 0x1a7   :  { %1099 = vst.msk [vmem:[%s2536_s4 + $0x28] sm:$0xf] %vm1088_vm12, %v2444_v43  ;;  %v1115_v63 = vunpack.c.l.bf16 %v2444_v43 }
 0x1a9   :  { %v1140_v47 = vsel %vm20_vm0, %v1115_v63, 0.0 }
 0x1aa   :  { %v1141_v18 = vadd.f32 %v1140_v47, %v1139_v46 }
 0x1ac   :  { %v1059_v22 = vpop.f32.mrf.mxu2 }
 0x1ad   :  { %v2451_v23 = vpack.c.bf16 %v1059_v22, %v1059_v22 }
 0x1af   :  { %1100 = vst.msk [vmem:[%s2536_s4 + $0x2c] sm:$0xf] %vm1088_vm12, %v2451_v23  ;;  %v1116_v26 = vunpack.c.l.bf16 %v2451_v23 }
 0x1b1   :  { %v1142_v60 = vsel %vm20_vm0, %v1116_v26, 0.0 }
 0x1b2   :  { %v1143_v13 = vadd.f32 %v1142_v60, %v1141_v18 }
 0x1b4   :  { %v1145_v21 = vadd.f32 %v1144_v30, %v1143_v13 }
 0x1b6   :  { %v1147_v32 = vadd.f32 %v1146_v40, %v1145_v21 }
 0x1bb   :  { %v1067_v56 = vpop.f32.mrf.mxu3 }
 0x1bc   :  { %v2465_v7 = vpack.c.bf16 %v1067_v56, %v1067_v56 }
 0x1be   :  { %1103 = vst.msk [vmem:[%s2536_s4 + $0x38] sm:$0xf] %vm1088_vm12, %v2465_v7  ;;  %v1119_v17 = vunpack.c.l.bf16 %v2465_v7 }
 0x1c0   :  { %v1148_v33 = vsel %vm20_vm0, %v1119_v17, 0.0 }
 0x1c1   :  { %v1149_v51 = vadd.f32 %v1148_v33, %v1147_v32 }
 0x1c3   :  { %v1069_v35 = vpop.f32.mrf.mxu3 }
 0x1c4   :  { %v2479_v57 = vpack.c.bf16 %v1069_v35, %v1069_v35 }
 0x1c6   :  { %1104 = vst.msk [vmem:[%s2536_s4 + $0x3c] sm:$0xf] %vm1088_vm12, %v2479_v57  ;;  %v1120_v28 = vunpack.c.l.bf16 %v2479_v57 }
 0x1c8   :  { %v1150_v37 = vsel %vm20_vm0, %v1120_v28, 0.0 }
 0x1c9   :  { %v1151_v11 = vadd.f32 %v1150_v37, %v1149_v51 }
 0x1cb   :  { %v1152_v3 = vrot.slane %v1151_v11, 4 }
 0x1cd   :  { %v1153_v10 = vadd.f32 %v1152_v3, %v1151_v11 }
 0x1cf   :  { %v1154_v58 = vrot.slane %v1153_v10, 2 }
 0x1d1   :  { %v1155_v50 = vadd.f32 %v1154_v58, %v1153_v10 }
 0x1d3   :  { %v1156_v44 = vrot.slane %v1155_v50, 1 }
 0x1d5   :  { %v2488_v34 = vadd.f32 %v1156_v44, %v1155_v50 }
 0x1d7   :  { %v1158_v61 = vmul.f32 0.0078125, %v2488_v34 }
 0x1d9   :  { %v1159_v62 = vsub.f32 %v1105_v0, %v1158_v61  ;;  %v1160_v1 = vsub.f32 %v1106_v38, %v1158_v61  ;;  %v1163_v5 = vsub.f32 %v1109_v39, %v1158_v61  ;;  %v1164_v6 = vsub.f32 %v1110_v41, %v1158_v61 }
 0x1da   :  { %v1161_v16 = vsub.f32 %v1107_v2, %v1158_v61  ;;  %v1167_v54 = vsub.f32 %v1113_v12, %v1158_v61  ;;  %v1168_v29 = vsub.f32 %v1114_v19, %v1158_v61  ;;  %v1162_v4 = vsub.f32 %v1108_v36, %v1158_v61 }
 0x1db   :  { %v1175_v9 = vmul.f32 %v1159_v62, %v1159_v62  ;;  %v1176_v48 = vmul.f32 %v1160_v1, %v1160_v1  ;;  %v1165_v31 = vsub.f32 %v1111_v52, %v1158_v61  ;;  %v1179_v39 = vmul.f32 %v1163_v5, %v1163_v5 }
 0x1dc   :  { %v1177_v0 = vmul.f32 %v1161_v16, %v1161_v16  ;;  %v1178_v14 = vmul.f32 %v1162_v4, %v1162_v4  ;;  %v1166_v42 = vsub.f32 %v1112_v20, %v1158_v61  ;;  %v1180_v36 = vmul.f32 %v1164_v6, %v1164_v6 }
 0x1dd   :  { %v1191_v27 = vsel %vm20_vm0, %v1175_v9, 0.0  ;;  %v1192_v38 = vsel %vm20_vm0, %v1176_v48, 0.0  ;;  %v1181_v19 = vmul.f32 %v1165_v31, %v1165_v31  ;;  %v1198_v49 = vsel %vm20_vm0, %v1179_v39, 0.0 }
 0x1de   :  { %v1193_v53 = vadd.f32 %v1192_v38, %v1191_v27  ;;  %v1194_v25 = vsel %vm20_vm0, %v1177_v0, 0.0  ;;  %v1196_v41 = vsel %vm20_vm0, %v1178_v14, 0.0  ;;  %v1182_v46 = vmul.f32 %v1166_v42, %v1166_v42 }
 0x1df   :  { %v1200_v15 = vsel %vm20_vm0, %v1180_v36, 0.0  ;;  %v1169_v52 = vsub.f32 %v1115_v63, %v1158_v61  ;;  %v1183_v43 = vmul.f32 %v1167_v54, %v1167_v54  ;;  %v1202_v22 = vsel %vm20_vm0, %v1181_v19, 0.0 }
 0x1e0   :  { %v1195_v2 = vadd.f32 %v1194_v25, %v1193_v53  ;;  %v1170_v8 = vsub.f32 %v1116_v26, %v1158_v61  ;;  %v1184_v20 = vmul.f32 %v1168_v29, %v1168_v29  ;;  %v1204_v60 = vsel %vm20_vm0, %v1182_v46, 0.0 }
 0x1e1   :  { %v1171_v56 = vsub.f32 %v1117_v59, %v1158_v61  ;;  %v1185_v13 = vmul.f32 %v1169_v52, %v1169_v52  ;;  %v1206_v30 = vsel %vm20_vm0, %v1183_v43, 0.0  ;;  %v1172_v35 = vsub.f32 %v1118_v24, %v1158_v61 }
 0x1e2   :  { %v1197_v12 = vadd.f32 %v1196_v41, %v1195_v2  ;;  %v1186_v40 = vmul.f32 %v1170_v8, %v1170_v8  ;;  %v1208_v63 = vsel %vm20_vm0, %v1184_v20, 0.0  ;;  %v1173_v57 = vsub.f32 %v1119_v17, %v1158_v61 }
 0x1e3   :  { %v1187_v32 = vmul.f32 %v1171_v56, %v1171_v56  ;;  %v1210_v23 = vsel %vm20_vm0, %v1185_v13, 0.0  ;;  %v1174_v51 = vsub.f32 %v1120_v28, %v1158_v61  ;;  %v1188_v37 = vmul.f32 %v1172_v35, %v1172_v35 }
 0x1e4   :  { %v1199_v45 = vadd.f32 %v1198_v49, %v1197_v12  ;;  %v1212_v59 = vsel %vm20_vm0, %v1186_v40, 0.0  ;;  %v1189_v3 = vmul.f32 %v1173_v57, %v1173_v57 }
 0x1e5   :  { %v1214_v10 = vsel %vm20_vm0, %v1187_v32, 0.0  ;;  %v1190_v58 = vmul.f32 %v1174_v51, %v1174_v51  ;;  %v1216_v50 = vsel %vm20_vm0, %v1188_v37, 0.0 }
 0x1e6   :  { %v1201_v55 = vadd.f32 %v1200_v15, %v1199_v45  ;;  %v1218_v7 = vsel %vm20_vm0, %v1189_v3, 0.0 }
 0x1e7   :  { %v1220_v62 = vsel %vm20_vm0, %v1190_v58, 0.0 }
 0x1e8   :  { %v1203_v47 = vadd.f32 %v1202_v22, %v1201_v55 }
 0x1ea   :  { %v1205_v18 = vadd.f32 %v1204_v60, %v1203_v47 }
 0x1ec   :  { %v1207_v21 = vadd.f32 %v1206_v30, %v1205_v18 }
 0x1ee   :  { %v1209_v33 = vadd.f32 %v1208_v63, %v1207_v21 }
 0x1f0   :  { %v1211_v26 = vadd.f32 %v1210_v23, %v1209_v33 }
 0x1f2   :  { %v1213_v11 = vadd.f32 %v1212_v59, %v1211_v26 }
 0x1f4   :  { %v1215_v24 = vadd.f32 %v1214_v10, %v1213_v11 }
 0x1f6   :  { %v1217_v44 = vadd.f32 %v1216_v50, %v1215_v24 }
 0x1f8   :  { %v1219_v17 = vadd.f32 %v1218_v7, %v1217_v44 }
 0x1fa   :  { %v1221_v1 = vadd.f32 %v1220_v62, %v1219_v17 }
 0x1fc   :  { %v1222_v5 = vrot.slane %v1221_v1, 4 }
 0x1fe   :  { %v1223_v28 = vadd.f32 %v1222_v5, %v1221_v1 }
 0x200   :  { %v1224_v61 = vrot.slane %v1223_v28, 2 }
 0x202   :  { %v1225_v6 = vadd.f32 %v1224_v61, %v1223_v28 }
 0x204   :  { %v1226_v16 = vrot.slane %v1225_v6, 1 }
 0x206   :  { %v1227_v54 = vadd.f32 %v1226_v16, %v1225_v6 }
 0x208   :  { %v1229_v29 = vsel %vm1228_vm13, %v2488_v34, %v1227_v54 }
 0x209   :  { %1230 = vst.msk [vmem:[%s2537_s5] sm:$0x3] %vm22_vm1, %v1229_v29 }

</bundles_post_ra>
